<compile_context>
chip_gen: v7x
topology: tpu7x:2x2x1
jax: 0.10.0
libtpu: 0.0.40
codegen_flags: <defaults>
</compile_context>

<pallas_src>
import math
import functools

import jax
import jax.numpy as jnp
from jax.experimental import pallas as pl
from jax.experimental.pallas import tpu as pltpu


_SQRT_2_OVER_PI = math.sqrt(2.0 / math.pi)


# TODO(synk): nn.GELU() is the exact erf GELU; the tanh approximation is used here
# (|diff| < ~1e-3) because erf lowering in Mosaic is not guaranteed across versions.
def _gelu(x):
    return 0.5 * x * (1.0 + jnp.tanh(_SQRT_2_OVER_PI * (x + 0.044715 * x * x * x)))


def _layernorm(x, gamma, beta, eps=1e-5):
    mu = jnp.mean(x, axis=-1, keepdims=True)
    xc = x - mu
    var = jnp.mean(xc * xc, axis=-1, keepdims=True)
    return xc * jax.lax.rsqrt(var + eps) * gamma + beta


# ----------------------------------------------------------------------------------
# Fused kernel
# ----------------------------------------------------------------------------------
def _mha_stacked(q2, k2, v2, *, attn_bias, head_mask, tb, seq_len, n_head, head_dim, cdt):
    """Masked multi-head attention with F.softmax(att, dim=2) (query-axis) semantics.

    q2/k2/v2: (tb*L, D) f32.  Heads are handled WITHOUT per-head lane slicing: K and V
    are tiled to (tb, H*L, D) and multiplied by a per-head channel mask, so scores for
    all heads come from one batched matmul as (tb, L, H*L), and the second batched
    matmul yields per-head outputs already concatenated along channels as (tb, L, D).
    """
    L, H = seq_len, n_head
    D = H * head_dim
    q = q2.reshape(tb, L, D)
    k = k2.reshape(tb, L, D)
    v = v2.reshape(tb, L, D)
    k_st = (jnp.tile(k, (1, H, 1)) * head_mask).astype(cdt)      # (tb, H*L, D)
    v_st = (jnp.tile(v, (1, H, 1)) * head_mask).astype(cdt)      # (tb, H*L, D)

    scale = 1.0 / math.sqrt(float(head_dim))
    att = jnp.einsum("bid,bpd->bip", q.astype(cdt), k_st,
                     preferred_element_type=jnp.float32) * scale  # (tb, L, H*L) f32
    att = att + attn_bias                                          # causal (0 / -1e9), f32

    # F.softmax(att, dim=2): normalize over the QUERY axis (axis 1 here).  Exact division.
    att = att - jnp.max(att, axis=1, keepdims=True)
    att = jnp.exp(att)
    att = att / jnp.sum(att, axis=1, keepdims=True)

    y = jnp.einsum("bip,bpd->bid", att.astype(cdt), v_st,
                   preferred_element_type=jnp.float32)             # (tb, L, D) f32
    return y.reshape(tb * L, D)


def _decoder_kernel(act_ref, rep_ref, bias_ref, hmask_ref,
                    wae_ref, vecs_ref, blk_w_ref, blk_b_ref,
                    hw1_ref, hw2_ref, hb2_ref, out_ref,
                    *, n_block, n_head, head_dim, seq_len, n_embd, action_dim, cdt):
    tb = act_ref.shape[0]
    L, D, A, H = seq_len, n_embd, action_dim, n_head
    rows = tb * L

    def dot(x, w):  # x f32 activation, w bf16 weight; accumulate f32 on the MXU
        return jnp.dot(x.astype(cdt), w, preferred_element_type=jnp.float32)

    mha = functools.partial(_mha_stacked,
                            attn_bias=bias_ref[...], head_mask=hmask_ref[...],
                            tb=tb, seq_len=L, n_head=H, head_dim=head_dim, cdt=cdt)

    vecs = vecs_ref[...]            # (5, D)  f32: ln0_g, ln0_b, head_b1, head_ln_g, head_ln_b
    bvec = blk_b_ref[...]           # (n_block*16, D) f32 per-block biases / LN params

    # --- 1) action encoder (Linear no-bias + GELU) + top LayerNorm -------------------
    a2 = act_ref[...].reshape(rows, A)
    x = _layernorm(_gelu(dot(a2, wae_ref[...])), vecs[0:1], vecs[1:2])

    rep2 = rep_ref[...].reshape(rows, D)

    # --- 2) decode blocks (statically unrolled; all weights resident in VMEM) --------
    for b in range(n_block):
        wo = 10 * b
        bo = 16 * b
        # attn1: masked self-attention (k = v = q = x); separate q/k/v matmuls
        q = dot(x, blk_w_ref[wo + 0]) + bvec[bo + 0:bo + 1]
        k = dot(x, blk_w_ref[wo + 1]) + bvec[bo + 1:bo + 2]
        v = dot(x, blk_w_ref[wo + 2]) + bvec[bo + 2:bo + 3]
        y = dot(mha(q, k, v), blk_w_ref[wo + 3]) + bvec[bo + 3:bo + 4]
        x = _layernorm(x + y, bvec[bo + 4:bo + 5], bvec[bo + 5:bo + 6])

        # attn2: key = value = x, query = rep_enc
        q = dot(rep2, blk_w_ref[wo + 4]) + bvec[bo + 6:bo + 7]
        k = dot(x, blk_w_ref[wo + 5]) + bvec[bo + 7:bo + 8]
        v = dot(x, blk_w_ref[wo + 6]) + bvec[bo + 8:bo + 9]
        y = dot(mha(q, k, v), blk_w_ref[wo + 7]) + bvec[bo + 9:bo + 10]
        x = _layernorm(rep2 + y, bvec[bo + 10:bo + 11], bvec[bo + 11:bo + 12])

        # MLP
        h = _gelu(dot(x, blk_w_ref[wo + 8]) + bvec[bo + 12:bo + 13])
        h = dot(h, blk_w_ref[wo + 9]) + bvec[bo + 13:bo + 14]
        x = _layernorm(x + h, bvec[bo + 14:bo + 15], bvec[bo + 15:bo + 16])

    # --- 3) head + softmax over actions ----------------------------------------------
    h = _gelu(dot(x, hw1_ref[...]) + vecs[2:3])
    h = _layernorm(h, vecs[3:4], vecs[4:5])
    logits = dot(h, hw2_ref[...]) + hb2_ref[...]
    logits = logits - jnp.max(logits, axis=-1, keepdims=True)
    e = jnp.exp(logits)
    prob = e / jnp.sum(e, axis=-1, keepdims=True)
    out_ref[...] = prob.reshape(tb, L, A)


# ----------------------------------------------------------------------------------
# Wrapper
# ----------------------------------------------------------------------------------
def _tpu_kind():
    try:
        return jax.devices()[0].device_kind.lower()
    except Exception:
        return ""


def _choose_tile_b(batch, seq):
    """Batch elements per grid step, generation-aware.

    Single-TensorCore parts (v5e/v6e): one grid step (no parallelism benefit from more,
    and splitting only halves MXU rows and doubles per-step overhead).  Parts with two
    TensorCores per device (v7x, v4/v5p megacore): keep >= 2 parallel grid steps so both
    cores get work, while filling the MXU (TB*seq up to ~target_rows)."""
    kind = _tpu_kind()
    single_tc = ("v6" in kind) or ("lite" in kind) or ("v5e" in kind)
    n_tc = 1 if single_tc else 2
    target_rows = 256 if (("lite" in kind) or ("v5e" in kind)) else 512
    cap = max(1, target_rows // seq)
    divisors = [d for d in range(1, batch + 1) if batch % d == 0]
    if n_tc >= 2:
        multi = [d for d in divisors if d <= cap and batch // d >= n_tc]
        if multi:
            return max(multi)
    capped = [d for d in divisors if d <= cap]
    return max(capped) if capped else batch


def decoder_forward(action, obs_rep, params, *, n_head, compute_dtype=jnp.bfloat16):
    """action: (B, L, A) f32; obs_rep: (B, L, D) f32; returns per-action probs (B, L, A)."""
    B, L, A = action.shape
    D = obs_rep.shape[-1]
    assert obs_rep.shape == (B, L, D)
    assert D % n_head == 0
    H = n_head
    hd = D // H
    HL = H * L
    n_block = len(params["blocks"])
    cdt = compute_dtype
    f32 = jnp.float32

    TB = _choose_tile_b(B, L)
    grid = (B // TB,)

    # Constant masks, built ONCE (hoisted out of all per-head / per-block work).
    q_idx = jnp.arange(L, dtype=jnp.int32)[:, None]             # (L, 1)   query index i
    k_idx = jnp.arange(HL, dtype=jnp.int32)[None, :] % L        # (1, H*L) key index j = p mod L
    attn_bias = jnp.where(q_idx >= k_idx, 0.0, -1e9).astype(f32)        # (L, H*L)
    p_head = jnp.arange(HL, dtype=jnp.int32)[:, None] // L      # (H*L, 1) head of stacked row
    c_head = jnp.arange(D, dtype=jnp.int32)[None, :] // hd      # (1, D)   head of channel
    head_mask = (p_head == c_head).astype(f32)                  # (H*L, D)

    # Pack per-block weights along a leading axis (MXU operands in bf16; biases/LN f32).
    # TODO(synk): in production, pre-pack these once outside the jitted step function.
    blk_w = jnp.concatenate([
        jnp.stack([bp["attn1_wq"], bp["attn1_wk"], bp["attn1_wv"], bp["attn1_wp"],
                   bp["attn2_wq"], bp["attn2_wk"], bp["attn2_wv"], bp["attn2_wp"],
                   bp["mlp_w1"], bp["mlp_w2"]], axis=0)
        for bp in params["blocks"]], axis=0).astype(cdt)                 # (n_block*10, D, D)
    blk_b = jnp.concatenate([
        jnp.concatenate([bp["attn1_bq"], bp["attn1_bk"], bp["attn1_bv"], bp["attn1_bp"],
                         bp["ln1_g"], bp["ln1_b"],
                         bp["attn2_bq"], bp["attn2_bk"], bp["attn2_bv"], bp["attn2_bp"],
                         bp["ln2_g"], bp["ln2_b"],
                         bp["mlp_b1"], bp["mlp_b2"],
                         bp["ln3_g"], bp["ln3_b"]], axis=0)
        for bp in params["blocks"]], axis=0).astype(f32)                 # (n_block*16, D)
    vecs = jnp.concatenate([params["ln0_g"], params["ln0_b"], params["head_b1"],
                            params["head_ln_g"], params["head_ln_b"]], axis=0).astype(f32)

    w_ae = params["w_ae"].astype(cdt)
    hw1 = params["head_w1"].astype(cdt)
    hw2 = params["head_w2"].astype(cdt)
    hb2 = params["head_b2"].astype(f32)

    def tile_spec(last):
        return pl.BlockSpec((TB, L, last), lambda i: (i, 0, 0))

    def full_spec(shape):
        return pl.BlockSpec(shape, lambda i, _n=len(shape): (0,) * _n)

    rows = B * L
    cost = pl.CostEstimate(
        flops=2 * rows * (A * D + n_block * (10 * D * D + 4 * HL * D) + D * D + D * A),
        transcendentals=rows * (D * (2 + n_block) + 2 * n_block * HL + A
                                + D * (2 + 3 * n_block)),
        bytes_accessed=(4 * (2 * B * L * A + B * L * D + L * HL + HL * D
                             + 5 * D + n_block * 16 * D + A)
                        + 2 * (A * D + n_block * 10 * D * D + D * D + D * A)),
    )

    kernel = functools.partial(
        _decoder_kernel, n_block=n_block, n_head=H, head_dim=hd,
        seq_len=L, n_embd=D, action_dim=A, cdt=cdt)

    return pl.pallas_call(
        kernel,
        out_shape=jax.ShapeDtypeStruct((B, L, A), f32),
        grid=grid,
        in_specs=[tile_spec(A), tile_spec(D),
                  full_spec((L, HL)), full_spec((HL, D)),
                  full_spec((A, D)), full_spec((5, D)),
                  full_spec((n_block * 10, D, D)), full_spec((n_block * 16, D)),
                  full_spec((D, D)), full_spec((D, A)), full_spec((1, A))],
        out_specs=tile_spec(A),
        compiler_params=pltpu.CompilerParams(dimension_semantics=("parallel",)),
        cost_estimate=cost,
    )(action, obs_rep, attn_bias, head_mask, w_ae, vecs, blk_w, blk_b, hw1, hw2, hb2)


# ----------------------------------------------------------------------------------
# Pure-JAX reference (mirrors the PyTorch forward exactly, incl. softmax over dim=2)
# ----------------------------------------------------------------------------------
def _attention_ref(k_in, v_in, q_in, wq, bq, wk, bk, wv, bv, wp, bp, *, n_head, masked):
    B, L, D = q_in.shape
    hd = D // n_head
    k = (k_in @ wk + bk).reshape(B, L, n_head, hd).transpose(0, 2, 1, 3)
    q = (q_in @ wq + bq).reshape(B, L, n_head, hd).transpose(0, 2, 1, 3)
    v = (v_in @ wv + bv).reshape(B, L, n_head, hd).transpose(0, 2, 1, 3)
    att = jnp.einsum("bhqd,bhkd->bhqk", q, k) * (1.0 / math.sqrt(hd))
    if masked:
        tril = jnp.tril(jnp.ones((L, L), jnp.float32))
        att = jnp.where(tril[None, None] == 0, -1e9, att)
    att = jax.nn.softmax(att, axis=2)      # dim=2 == query axis, as in the PyTorch code
    y = jnp.einsum("bhqk,bhkd->bhqd", att, v)
    y = y.transpose(0, 2, 1, 3).reshape(B, L, D)
    return y @ wp + bp


def decoder_ref(action, obs_rep, params, *, n_head):
    x = _layernorm(_gelu(action @ params["w_ae"]), params["ln0_g"], params["ln0_b"])
    for bp in params["blocks"]:
        y = _attention_ref(x, x, x,
                           bp["attn1_wq"], bp["attn1_bq"],
                           bp["attn1_wk"], bp["attn1_bk"],
                           bp["attn1_wv"], bp["attn1_bv"],
                           bp["attn1_wp"], bp["attn1_bp"], n_head=n_head, masked=True)
        x = _layernorm(x + y, bp["ln1_g"], bp["ln1_b"])
        y = _attention_ref(x, x, obs_rep,
                           bp["attn2_wq"], bp["attn2_bq"],
                           bp["attn2_wk"], bp["attn2_bk"],
                           bp["attn2_wv"], bp["attn2_bv"],
                           bp["attn2_wp"], bp["attn2_bp"], n_head=n_head, masked=True)
        x = _layernorm(obs_rep + y, bp["ln2_g"], bp["ln2_b"])
        h = _gelu(x @ bp["mlp_w1"] + bp["mlp_b1"]) @ bp["mlp_w2"] + bp["mlp_b2"]
        x = _layernorm(x + h, bp["ln3_g"], bp["ln3_b"])
    h = _layernorm(_gelu(x @ params["head_w1"] + params["head_b1"]),
                   params["head_ln_g"], params["head_ln_b"])
    logits = h @ params["head_w2"] + params["head_b2"]
    return jax.nn.softmax(logits, axis=2)


# ----------------------------------------------------------------------------------
# Synthetic parameters
# ----------------------------------------------------------------------------------
def make_params(rng, action_dim, n_embd, n_head, n_block):
    """Synthetic params (stand-in for orthogonal init_ with gain=0.01 / relu gain).
    Biases and LayerNorm affine params are randomized slightly so those code paths
    are actually exercised by the self-test (the real module inits them to 0 / 1)."""
    D, A = n_embd, action_dim
    gain, relu_gain = 0.01, math.sqrt(2.0)
    keys = iter(jax.random.split(rng, 128))

    def dense(fan_in, fan_out, g):
        return (g / math.sqrt(fan_in)) * jax.random.normal(
            next(keys), (fan_in, fan_out), jnp.float32)

    def bias(n):
        return 0.02 * jax.random.normal(next(keys), (1, n), jnp.float32)

    def ln_pair():
        g = 1.0 + 0.05 * jax.random.normal(next(keys), (1, D), jnp.float32)
        b = 0.05 * jax.random.normal(next(keys), (1, D), jnp.float32)
        return g, b

    ln0_g, ln0_b = ln_pair()
    head_ln_g, head_ln_b = ln_pair()
    params = {
        "w_ae": dense(A, D, relu_gain),
        "ln0_g": ln0_g, "ln0_b": ln0_b,
        "blocks": [],
        "head_w1": dense(D, D, relu_gain), "head_b1": bias(D),
        "head_ln_g": head_ln_g, "head_ln_b": head_ln_b,
        "head_w2": dense(D, A, gain), "head_b2": bias(A),
    }
    for _ in range(n_block):
        g1, b1 = ln_pair()
        g2, b2 = ln_pair()
        g3, b3 = ln_pair()
        params["blocks"].append({
            "attn1_wq": dense(D, D, gain), "attn1_bq": bias(D),
            "attn1_wk": dense(D, D, gain), "attn1_bk": bias(D),
            "attn1_wv": dense(D, D, gain), "attn1_bv": bias(D),
            "attn1_wp": dense(D, D, gain), "attn1_bp": bias(D),
            "ln1_g": g1, "ln1_b": b1,
            "attn2_wq": dense(D, D, gain), "attn2_bq": bias(D),
            "attn2_wk": dense(D, D, gain), "attn2_bk": bias(D),
            "attn2_wv": dense(D, D, gain), "attn2_bv": bias(D),
            "attn2_wp": dense(D, D, gain), "attn2_bp": bias(D),
            "ln2_g": g2, "ln2_b": b2,
            "mlp_w1": dense(D, D, relu_gain), "mlp_b1": bias(D),
            "mlp_w2": dense(D, D, gain), "mlp_b2": bias(D),
            "ln3_g": g3, "ln3_b": b3,
        })
    return params


if __name__ == "__main__":
    # Small shapes consistent with the module: n_agent=7 -> L = n_agent + 1 = 8.
    B, n_agent, n_embd, n_head, n_block, action_dim = 4, 7, 32, 4, 2, 5
    L = n_agent + 1

    root = jax.random.PRNGKey(0)
    k_params, k_act, k_obs = jax.random.split(root, 3)

    params = make_params(k_params, action_dim, n_embd, n_head, n_block)
    action = jax.random.normal(k_act, (B, L, action_dim), dtype=jnp.float32)
    obs_rep = jax.random.normal(k_obs, (B, L, n_embd), dtype=jnp.float32)

    fwd = jax.jit(functools.partial(decoder_forward, n_head=n_head))
    prob = jax.block_until_ready(fwd(action, obs_rep, params))

    ref = decoder_ref(action, obs_rep, params, n_head=n_head)

    assert prob.shape == (B, L, action_dim)
    assert bool(jnp.all(jnp.isfinite(prob)))
    assert jnp.allclose(jnp.sum(prob, axis=-1), 1.0, atol=1e-4), "probs don't sum to 1"
    # Kernel uses bf16 MXU operands (f32 accumulate / LN / softmax); ref is full f32.
    assert jnp.allclose(prob, ref, atol=2e-3, rtol=2e-2), (
        "mismatch vs reference, max abs err "
        f"{float(jnp.max(jnp.abs(prob - ref)))}")
    print("KERNEL_OK")
</pallas_src>

<mosaic_0001>
module attributes {stable_mosaic.version = 11 : i64} {
  func.func @_decoder_kernel(%arg0: i32, %arg1: memref<2x8x5xf32, #tpu.memory_space<vmem>>, %arg2: memref<2x8x32xf32, #tpu.memory_space<vmem>>, %arg3: memref<8x32xf32, #tpu.memory_space<vmem>>, %arg4: memref<32x32xf32, #tpu.memory_space<vmem>>, %arg5: memref<5x32xbf16, #tpu.memory_space<vmem>>, %arg6: memref<5x32xf32, #tpu.memory_space<vmem>>, %arg7: memref<20x32x32xbf16, #tpu.memory_space<vmem>>, %arg8: memref<32x32xf32, #tpu.memory_space<vmem>>, %arg9: memref<32x32xbf16, #tpu.memory_space<vmem>>, %arg10: memref<32x5xbf16, #tpu.memory_space<vmem>>, %arg11: memref<1x5xf32, #tpu.memory_space<vmem>>, %arg12: memref<2x8x5xf32, #tpu.memory_space<vmem>>) attributes {dimension_semantics = [#tpu.dimension_semantics<parallel>], iteration_bounds = array<i64: 2>, scalar_prefetch = 0 : i64, scratch_operands = 0 : i64, tpu.core_type = #tpu.core_type<tc>, window_params = [{transform_indices = @transform_0, window_bounds = array<i64: 2, 8, 5>}, {transform_indices = @transform_1, window_bounds = array<i64: 2, 8, 32>}, {pipeline_mode = #tpu.pipeline_mode<synchronous>, transform_indices = @transform_2, window_bounds = array<i64: 8, 32>}, {pipeline_mode = #tpu.pipeline_mode<synchronous>, transform_indices = @transform_3, window_bounds = array<i64: 32, 32>}, {pipeline_mode = #tpu.pipeline_mode<synchronous>, transform_indices = @transform_4, window_bounds = array<i64: 5, 32>}, {pipeline_mode = #tpu.pipeline_mode<synchronous>, transform_indices = @transform_5, window_bounds = array<i64: 5, 32>}, {pipeline_mode = #tpu.pipeline_mode<synchronous>, transform_indices = @transform_6, window_bounds = array<i64: 20, 32, 32>}, {pipeline_mode = #tpu.pipeline_mode<synchronous>, transform_indices = @transform_7, window_bounds = array<i64: 32, 32>}, {pipeline_mode = #tpu.pipeline_mode<synchronous>, transform_indices = @transform_8, window_bounds = array<i64: 32, 32>}, {pipeline_mode = #tpu.pipeline_mode<synchronous>, transform_indices = @transform_9, window_bounds = array<i64: 32, 5>}, {pipeline_mode = #tpu.pipeline_mode<synchronous>, transform_indices = @transform_10, window_bounds = array<i64: 1, 5>}, {transform_indices = @transform_11, window_bounds = array<i64: 2, 8, 5>}]} {
    %c0 = arith.constant 0 : index
    %c0_0 = arith.constant 0 : index
    %0 = vector.load %arg3[%c0, %c0_0] : memref<8x32xf32, #tpu.memory_space<vmem>>, vector<8x32xf32>
    %c0_1 = arith.constant 0 : index
    %c0_2 = arith.constant 0 : index
    %1 = vector.load %arg4[%c0_1, %c0_2] : memref<32x32xf32, #tpu.memory_space<vmem>>, vector<32x32xf32>
    %c0_3 = arith.constant 0 : index
    %c0_4 = arith.constant 0 : index
    %2 = vector.load %arg6[%c0_3, %c0_4] : memref<5x32xf32, #tpu.memory_space<vmem>>, vector<5x32xf32>
    %c0_5 = arith.constant 0 : index
    %c0_6 = arith.constant 0 : index
    %3 = vector.load %arg8[%c0_5, %c0_6] : memref<32x32xf32, #tpu.memory_space<vmem>>, vector<32x32xf32>
    %c0_7 = arith.constant 0 : index
    %c0_8 = arith.constant 0 : index
    %c0_9 = arith.constant 0 : index
    %4 = vector.load %arg1[%c0_7, %c0_8, %c0_9] : memref<2x8x5xf32, #tpu.memory_space<vmem>>, vector<2x8x5xf32>
    %5 = vector.shape_cast %4 : vector<2x8x5xf32> to vector<16x5xf32>
    %c0_10 = arith.constant 0 : index
    %c0_11 = arith.constant 0 : index
    %6 = vector.load %arg5[%c0_10, %c0_11] : memref<5x32xbf16, #tpu.memory_space<vmem>>, vector<5x32xbf16>
    %7 = arith.truncf %5 : vector<16x5xf32> to vector<16x5xbf16>
    %cst = arith.constant dense<0.000000e+00> : vector<16x32xf32>
    %8 = tpu.matmul %7, %6, %cst {dimension_numbers = #tpu.dot_dimension_numbers<[1], [0], [0], [1], [0, 0, 1, 1], [], []>} : vector<16x5xbf16>, vector<5x32xbf16>, vector<16x32xf32> -> vector<16x32xf32>
    %cst_12 = arith.constant 5.000000e-01 : f32
    %9 = vector.broadcast %cst_12 : f32 to vector<16x32xf32>
    %10 = arith.mulf %9, %8 : vector<16x32xf32>
    %cst_13 = arith.constant 4.471500e-02 : f32
    %11 = vector.broadcast %cst_13 : f32 to vector<16x32xf32>
    %12 = arith.mulf %11, %8 : vector<16x32xf32>
    %13 = arith.mulf %12, %8 : vector<16x32xf32>
    %14 = arith.mulf %13, %8 : vector<16x32xf32>
    %15 = arith.addf %8, %14 : vector<16x32xf32>
    %cst_14 = arith.constant 0.797884583 : f32
    %16 = vector.broadcast %cst_14 : f32 to vector<16x32xf32>
    %17 = arith.mulf %16, %15 : vector<16x32xf32>
    %18 = math.tanh %17 : vector<16x32xf32>
    %cst_15 = arith.constant 1.000000e+00 : f32
    %19 = vector.broadcast %cst_15 : f32 to vector<16x32xf32>
    %20 = arith.addf %19, %18 : vector<16x32xf32>
    %21 = arith.mulf %10, %20 : vector<16x32xf32>
    %22 = vector.extract_strided_slice %2 {offsets = [0, 0], sizes = [1, 32], strides = [1, 1]} : vector<5x32xf32> to vector<1x32xf32>
    %23 = vector.extract_strided_slice %2 {offsets = [1, 0], sizes = [1, 32], strides = [1, 1]} : vector<5x32xf32> to vector<1x32xf32>
    %cst_16 = arith.constant dense<0.000000e+00> : vector<16xf32>
    %24 = vector.multi_reduction <add>, %21, %cst_16 [1] : vector<16x32xf32> to vector<16xf32>
    %25 = vector.shape_cast %24 : vector<16xf32> to vector<16x1xf32>
    %cst_17 = arith.constant 3.200000e+01 : f32
    %26 = vector.broadcast %cst_17 : f32 to vector<16x1xf32>
    %27 = arith.divf %25, %26 : vector<16x1xf32>
    %28 = vector.broadcast %27 : vector<16x1xf32> to vector<16x32xf32>
    %29 = arith.subf %21, %28 : vector<16x32xf32>
    %30 = arith.mulf %29, %29 : vector<16x32xf32>
    %cst_18 = arith.constant dense<0.000000e+00> : vector<16xf32>
    %31 = vector.multi_reduction <add>, %30, %cst_18 [1] : vector<16x32xf32> to vector<16xf32>
    %32 = vector.shape_cast %31 : vector<16xf32> to vector<16x1xf32>
    %cst_19 = arith.constant 3.200000e+01 : f32
    %33 = vector.broadcast %cst_19 : f32 to vector<16x1xf32>
    %34 = arith.divf %32, %33 : vector<16x1xf32>
    %cst_20 = arith.constant 9.99999974E-6 : f32
    %35 = vector.broadcast %cst_20 : f32 to vector<16x1xf32>
    %36 = arith.addf %34, %35 : vector<16x1xf32>
    %37 = math.rsqrt %36 : vector<16x1xf32>
    %38 = vector.broadcast %37 : vector<16x1xf32> to vector<16x32xf32>
    %39 = arith.mulf %29, %38 : vector<16x32xf32>
    %40 = vector.broadcast %22 : vector<1x32xf32> to vector<16x32xf32>
    %41 = arith.mulf %39, %40 : vector<16x32xf32>
    %42 = vector.broadcast %23 : vector<1x32xf32> to vector<16x32xf32>
    %43 = arith.addf %41, %42 : vector<16x32xf32>
    %c0_21 = arith.constant 0 : index
    %c0_22 = arith.constant 0 : index
    %c0_23 = arith.constant 0 : index
    %44 = vector.load %arg2[%c0_21, %c0_22, %c0_23] : memref<2x8x32xf32, #tpu.memory_space<vmem>>, vector<2x8x32xf32>
    %45 = vector.shape_cast %44 : vector<2x8x32xf32> to vector<16x32xf32>
    %c0_24 = arith.constant 0 : index
    %c0_25 = arith.constant 0 : index
    %c0_26 = arith.constant 0 : index
    %46 = vector.load %arg7[%c0_24, %c0_25, %c0_26] : memref<20x32x32xbf16, #tpu.memory_space<vmem>>, vector<1x32x32xbf16>
    %47 = vector.shape_cast %46 : vector<1x32x32xbf16> to vector<32x32xbf16>
    %48 = arith.truncf %43 : vector<16x32xf32> to vector<16x32xbf16>
    %cst_27 = arith.constant dense<0.000000e+00> : vector<16x32xf32>
    %49 = tpu.matmul %48, %47, %cst_27 {dimension_numbers = #tpu.dot_dimension_numbers<[1], [0], [0], [1], [0, 0, 1, 1], [], []>} : vector<16x32xbf16>, vector<32x32xbf16>, vector<16x32xf32> -> vector<16x32xf32>
    %50 = vector.extract_strided_slice %3 {offsets = [0, 0], sizes = [1, 32], strides = [1, 1]} : vector<32x32xf32> to vector<1x32xf32>
    %51 = vector.broadcast %50 : vector<1x32xf32> to vector<16x32xf32>
    %52 = arith.addf %49, %51 : vector<16x32xf32>
    %c1 = arith.constant 1 : index
    %c0_28 = arith.constant 0 : index
    %c0_29 = arith.constant 0 : index
    %53 = vector.load %arg7[%c1, %c0_28, %c0_29] : memref<20x32x32xbf16, #tpu.memory_space<vmem>>, vector<1x32x32xbf16>
    %54 = vector.shape_cast %53 : vector<1x32x32xbf16> to vector<32x32xbf16>
    %55 = arith.truncf %43 : vector<16x32xf32> to vector<16x32xbf16>
    %cst_30 = arith.constant dense<0.000000e+00> : vector<16x32xf32>
    %56 = tpu.matmul %55, %54, %cst_30 {dimension_numbers = #tpu.dot_dimension_numbers<[1], [0], [0], [1], [0, 0, 1, 1], [], []>} : vector<16x32xbf16>, vector<32x32xbf16>, vector<16x32xf32> -> vector<16x32xf32>
    %57 = vector.extract_strided_slice %3 {offsets = [1, 0], sizes = [1, 32], strides = [1, 1]} : vector<32x32xf32> to vector<1x32xf32>
    %58 = vector.broadcast %57 : vector<1x32xf32> to vector<16x32xf32>
    %59 = arith.addf %56, %58 : vector<16x32xf32>
    %c2 = arith.constant 2 : index
    %c0_31 = arith.constant 0 : index
    %c0_32 = arith.constant 0 : index
    %60 = vector.load %arg7[%c2, %c0_31, %c0_32] : memref<20x32x32xbf16, #tpu.memory_space<vmem>>, vector<1x32x32xbf16>
    %61 = vector.shape_cast %60 : vector<1x32x32xbf16> to vector<32x32xbf16>
    %62 = arith.truncf %43 : vector<16x32xf32> to vector<16x32xbf16>
    %cst_33 = arith.constant dense<0.000000e+00> : vector<16x32xf32>
    %63 = tpu.matmul %62, %61, %cst_33 {dimension_numbers = #tpu.dot_dimension_numbers<[1], [0], [0], [1], [0, 0, 1, 1], [], []>} : vector<16x32xbf16>, vector<32x32xbf16>, vector<16x32xf32> -> vector<16x32xf32>
    %64 = vector.extract_strided_slice %3 {offsets = [2, 0], sizes = [1, 32], strides = [1, 1]} : vector<32x32xf32> to vector<1x32xf32>
    %65 = vector.broadcast %64 : vector<1x32xf32> to vector<16x32xf32>
    %66 = arith.addf %63, %65 : vector<16x32xf32>
    %67 = vector.shape_cast %52 : vector<16x32xf32> to vector<2x8x32xf32>
    %68 = vector.shape_cast %59 : vector<16x32xf32> to vector<2x8x32xf32>
    %69 = vector.shape_cast %66 : vector<16x32xf32> to vector<2x8x32xf32>
    %70 = tpu.concatenate %68, %68, %68, %68 in 1 : vector<2x8x32xf32>, vector<2x8x32xf32>, vector<2x8x32xf32>, vector<2x8x32xf32> -> vector<2x32x32xf32>
    %71 = vector.shape_cast %1 : vector<32x32xf32> to vector<1x32x32xf32>
    %72 = vector.broadcast %71 : vector<1x32x32xf32> to vector<2x32x32xf32>
    %73 = arith.mulf %70, %72 : vector<2x32x32xf32>
    %74 = arith.truncf %73 : vector<2x32x32xf32> to vector<2x32x32xbf16>
    %75 = tpu.concatenate %69, %69, %69, %69 in 1 : vector<2x8x32xf32>, vector<2x8x32xf32>, vector<2x8x32xf32>, vector<2x8x32xf32> -> vector<2x32x32xf32>
    %76 = vector.shape_cast %1 : vector<32x32xf32> to vector<1x32x32xf32>
    %77 = vector.broadcast %76 : vector<1x32x32xf32> to vector<2x32x32xf32>
    %78 = arith.mulf %75, %77 : vector<2x32x32xf32>
    %79 = arith.truncf %78 : vector<2x32x32xf32> to vector<2x32x32xbf16>
    %80 = arith.truncf %67 : vector<2x8x32xf32> to vector<2x8x32xbf16>
    "tpu.trace_start"() <{level = 10 : i32, message = "bid,bpd->bip"}> : () -> ()
    %cst_34 = arith.constant dense<0.000000e+00> : vector<2x8x32xf32>
    %81 = tpu.matmul %80, %74, %cst_34 {dimension_numbers = #tpu.dot_dimension_numbers<[2], [2], [1], [1], [0, 0, 0, 1, 1, 1], [0], [0]>} : vector<2x8x32xbf16>, vector<2x32x32xbf16>, vector<2x8x32xf32> -> vector<2x8x32xf32>
    "tpu.trace_stop"() : () -> ()
    %cst_35 = arith.constant 0.353553385 : f32
    %82 = vector.broadcast %cst_35 : f32 to vector<2x8x32xf32>
    %83 = arith.mulf %81, %82 : vector<2x8x32xf32>
    %84 = vector.shape_cast %0 : vector<8x32xf32> to vector<1x8x32xf32>
    %85 = vector.broadcast %84 : vector<1x8x32xf32> to vector<2x8x32xf32>
    %86 = arith.addf %83, %85 : vector<2x8x32xf32>
    %cst_36 = arith.constant dense<0xFF800000> : vector<2x32xf32>
    %87 = vector.multi_reduction <maximumf>, %86, %cst_36 [1] : vector<2x8x32xf32> to vector<2x32xf32>
    %88 = vector.shape_cast %87 : vector<2x32xf32> to vector<2x1x32xf32>
    %89 = vector.broadcast %88 : vector<2x1x32xf32> to vector<2x8x32xf32>
    %90 = arith.subf %86, %89 : vector<2x8x32xf32>
    %91 = math.exp %90 : vector<2x8x32xf32>
    %cst_37 = arith.constant dense<0.000000e+00> : vector<2x32xf32>
    %92 = vector.multi_reduction <add>, %91, %cst_37 [1] : vector<2x8x32xf32> to vector<2x32xf32>
    %93 = vector.shape_cast %92 : vector<2x32xf32> to vector<2x1x32xf32>
    %94 = vector.broadcast %93 : vector<2x1x32xf32> to vector<2x8x32xf32>
    %95 = arith.divf %91, %94 : vector<2x8x32xf32>
    %96 = arith.truncf %95 : vector<2x8x32xf32> to vector<2x8x32xbf16>
    "tpu.trace_start"() <{level = 10 : i32, message = "bip,bpd->bid"}> : () -> ()
    %cst_38 = arith.constant dense<0.000000e+00> : vector<2x8x32xf32>
    %97 = tpu.matmul %96, %79, %cst_38 {dimension_numbers = #tpu.dot_dimension_numbers<[2], [1], [1], [2], [0, 0, 0, 1, 1, 2], [0], [0]>} : vector<2x8x32xbf16>, vector<2x32x32xbf16>, vector<2x8x32xf32> -> vector<2x8x32xf32>
    "tpu.trace_stop"() : () -> ()
    %98 = vector.shape_cast %97 : vector<2x8x32xf32> to vector<16x32xf32>
    %c3 = arith.constant 3 : index
    %c0_39 = arith.constant 0 : index
    %c0_40 = arith.constant 0 : index
    %99 = vector.load %arg7[%c3, %c0_39, %c0_40] : memref<20x32x32xbf16, #tpu.memory_space<vmem>>, vector<1x32x32xbf16>
    %100 = vector.shape_cast %99 : vector<1x32x32xbf16> to vector<32x32xbf16>
    %101 = arith.truncf %98 : vector<16x32xf32> to vector<16x32xbf16>
    %cst_41 = arith.constant dense<0.000000e+00> : vector<16x32xf32>
    %102 = tpu.matmul %101, %100, %cst_41 {dimension_numbers = #tpu.dot_dimension_numbers<[1], [0], [0], [1], [0, 0, 1, 1], [], []>} : vector<16x32xbf16>, vector<32x32xbf16>, vector<16x32xf32> -> vector<16x32xf32>
    %103 = vector.extract_strided_slice %3 {offsets = [3, 0], sizes = [1, 32], strides = [1, 1]} : vector<32x32xf32> to vector<1x32xf32>
    %104 = vector.broadcast %103 : vector<1x32xf32> to vector<16x32xf32>
    %105 = arith.addf %102, %104 : vector<16x32xf32>
    %106 = arith.addf %43, %105 : vector<16x32xf32>
    %107 = vector.extract_strided_slice %3 {offsets = [4, 0], sizes = [1, 32], strides = [1, 1]} : vector<32x32xf32> to vector<1x32xf32>
    %108 = vector.extract_strided_slice %3 {offsets = [5, 0], sizes = [1, 32], strides = [1, 1]} : vector<32x32xf32> to vector<1x32xf32>
    %cst_42 = arith.constant dense<0.000000e+00> : vector<16xf32>
    %109 = vector.multi_reduction <add>, %106, %cst_42 [1] : vector<16x32xf32> to vector<16xf32>
    %110 = vector.shape_cast %109 : vector<16xf32> to vector<16x1xf32>
    %cst_43 = arith.constant 3.200000e+01 : f32
    %111 = vector.broadcast %cst_43 : f32 to vector<16x1xf32>
    %112 = arith.divf %110, %111 : vector<16x1xf32>
    %113 = vector.broadcast %112 : vector<16x1xf32> to vector<16x32xf32>
    %114 = arith.subf %106, %113 : vector<16x32xf32>
    %115 = arith.mulf %114, %114 : vector<16x32xf32>
    %cst_44 = arith.constant dense<0.000000e+00> : vector<16xf32>
    %116 = vector.multi_reduction <add>, %115, %cst_44 [1] : vector<16x32xf32> to vector<16xf32>
    %117 = vector.shape_cast %116 : vector<16xf32> to vector<16x1xf32>
    %cst_45 = arith.constant 3.200000e+01 : f32
    %118 = vector.broadcast %cst_45 : f32 to vector<16x1xf32>
    %119 = arith.divf %117, %118 : vector<16x1xf32>
    %cst_46 = arith.constant 9.99999974E-6 : f32
    %120 = vector.broadcast %cst_46 : f32 to vector<16x1xf32>
    %121 = arith.addf %119, %120 : vector<16x1xf32>
    %122 = math.rsqrt %121 : vector<16x1xf32>
    %123 = vector.broadcast %122 : vector<16x1xf32> to vector<16x32xf32>
    %124 = arith.mulf %114, %123 : vector<16x32xf32>
    %125 = vector.broadcast %107 : vector<1x32xf32> to vector<16x32xf32>
    %126 = arith.mulf %124, %125 : vector<16x32xf32>
    %127 = vector.broadcast %108 : vector<1x32xf32> to vector<16x32xf32>
    %128 = arith.addf %126, %127 : vector<16x32xf32>
    %c4 = arith.constant 4 : index
    %c0_47 = arith.constant 0 : index
    %c0_48 = arith.constant 0 : index
    %129 = vector.load %arg7[%c4, %c0_47, %c0_48] : memref<20x32x32xbf16, #tpu.memory_space<vmem>>, vector<1x32x32xbf16>
    %130 = vector.shape_cast %129 : vector<1x32x32xbf16> to vector<32x32xbf16>
    %131 = arith.truncf %45 : vector<16x32xf32> to vector<16x32xbf16>
    %cst_49 = arith.constant dense<0.000000e+00> : vector<16x32xf32>
    %132 = tpu.matmul %131, %130, %cst_49 {dimension_numbers = #tpu.dot_dimension_numbers<[1], [0], [0], [1], [0, 0, 1, 1], [], []>} : vector<16x32xbf16>, vector<32x32xbf16>, vector<16x32xf32> -> vector<16x32xf32>
    %133 = vector.extract_strided_slice %3 {offsets = [6, 0], sizes = [1, 32], strides = [1, 1]} : vector<32x32xf32> to vector<1x32xf32>
    %134 = vector.broadcast %133 : vector<1x32xf32> to vector<16x32xf32>
    %135 = arith.addf %132, %134 : vector<16x32xf32>
    %c5 = arith.constant 5 : index
    %c0_50 = arith.constant 0 : index
    %c0_51 = arith.constant 0 : index
    %136 = vector.load %arg7[%c5, %c0_50, %c0_51] : memref<20x32x32xbf16, #tpu.memory_space<vmem>>, vector<1x32x32xbf16>
    %137 = vector.shape_cast %136 : vector<1x32x32xbf16> to vector<32x32xbf16>
    %138 = arith.truncf %128 : vector<16x32xf32> to vector<16x32xbf16>
    %cst_52 = arith.constant dense<0.000000e+00> : vector<16x32xf32>
    %139 = tpu.matmul %138, %137, %cst_52 {dimension_numbers = #tpu.dot_dimension_numbers<[1], [0], [0], [1], [0, 0, 1, 1], [], []>} : vector<16x32xbf16>, vector<32x32xbf16>, vector<16x32xf32> -> vector<16x32xf32>
    %140 = vector.extract_strided_slice %3 {offsets = [7, 0], sizes = [1, 32], strides = [1, 1]} : vector<32x32xf32> to vector<1x32xf32>
    %141 = vector.broadcast %140 : vector<1x32xf32> to vector<16x32xf32>
    %142 = arith.addf %139, %141 : vector<16x32xf32>
    %c6 = arith.constant 6 : index
    %c0_53 = arith.constant 0 : index
    %c0_54 = arith.constant 0 : index
    %143 = vector.load %arg7[%c6, %c0_53, %c0_54] : memref<20x32x32xbf16, #tpu.memory_space<vmem>>, vector<1x32x32xbf16>
    %144 = vector.shape_cast %143 : vector<1x32x32xbf16> to vector<32x32xbf16>
    %145 = arith.truncf %128 : vector<16x32xf32> to vector<16x32xbf16>
    %cst_55 = arith.constant dense<0.000000e+00> : vector<16x32xf32>
    %146 = tpu.matmul %145, %144, %cst_55 {dimension_numbers = #tpu.dot_dimension_numbers<[1], [0], [0], [1], [0, 0, 1, 1], [], []>} : vector<16x32xbf16>, vector<32x32xbf16>, vector<16x32xf32> -> vector<16x32xf32>
    %147 = vector.extract_strided_slice %3 {offsets = [8, 0], sizes = [1, 32], strides = [1, 1]} : vector<32x32xf32> to vector<1x32xf32>
    %148 = vector.broadcast %147 : vector<1x32xf32> to vector<16x32xf32>
    %149 = arith.addf %146, %148 : vector<16x32xf32>
    %150 = vector.shape_cast %135 : vector<16x32xf32> to vector<2x8x32xf32>
    %151 = vector.shape_cast %142 : vector<16x32xf32> to vector<2x8x32xf32>
    %152 = vector.shape_cast %149 : vector<16x32xf32> to vector<2x8x32xf32>
    %153 = tpu.concatenate %151, %151, %151, %151 in 1 : vector<2x8x32xf32>, vector<2x8x32xf32>, vector<2x8x32xf32>, vector<2x8x32xf32> -> vector<2x32x32xf32>
    %154 = vector.shape_cast %1 : vector<32x32xf32> to vector<1x32x32xf32>
    %155 = vector.broadcast %154 : vector<1x32x32xf32> to vector<2x32x32xf32>
    %156 = arith.mulf %153, %155 : vector<2x32x32xf32>
    %157 = arith.truncf %156 : vector<2x32x32xf32> to vector<2x32x32xbf16>
    %158 = tpu.concatenate %152, %152, %152, %152 in 1 : vector<2x8x32xf32>, vector<2x8x32xf32>, vector<2x8x32xf32>, vector<2x8x32xf32> -> vector<2x32x32xf32>
    %159 = vector.shape_cast %1 : vector<32x32xf32> to vector<1x32x32xf32>
    %160 = vector.broadcast %159 : vector<1x32x32xf32> to vector<2x32x32xf32>
    %161 = arith.mulf %158, %160 : vector<2x32x32xf32>
    %162 = arith.truncf %161 : vector<2x32x32xf32> to vector<2x32x32xbf16>
    %163 = arith.truncf %150 : vector<2x8x32xf32> to vector<2x8x32xbf16>
    "tpu.trace_start"() <{level = 10 : i32, message = "bid,bpd->bip"}> : () -> ()
    %cst_56 = arith.constant dense<0.000000e+00> : vector<2x8x32xf32>
    %164 = tpu.matmul %163, %157, %cst_56 {dimension_numbers = #tpu.dot_dimension_numbers<[2], [2], [1], [1], [0, 0, 0, 1, 1, 1], [0], [0]>} : vector<2x8x32xbf16>, vector<2x32x32xbf16>, vector<2x8x32xf32> -> vector<2x8x32xf32>
    "tpu.trace_stop"() : () -> ()
    %cst_57 = arith.constant 0.353553385 : f32
    %165 = vector.broadcast %cst_57 : f32 to vector<2x8x32xf32>
    %166 = arith.mulf %164, %165 : vector<2x8x32xf32>
    %167 = vector.shape_cast %0 : vector<8x32xf32> to vector<1x8x32xf32>
    %168 = vector.broadcast %167 : vector<1x8x32xf32> to vector<2x8x32xf32>
    %169 = arith.addf %166, %168 : vector<2x8x32xf32>
    %cst_58 = arith.constant dense<0xFF800000> : vector<2x32xf32>
    %170 = vector.multi_reduction <maximumf>, %169, %cst_58 [1] : vector<2x8x32xf32> to vector<2x32xf32>
    %171 = vector.shape_cast %170 : vector<2x32xf32> to vector<2x1x32xf32>
    %172 = vector.broadcast %171 : vector<2x1x32xf32> to vector<2x8x32xf32>
    %173 = arith.subf %169, %172 : vector<2x8x32xf32>
    %174 = math.exp %173 : vector<2x8x32xf32>
    %cst_59 = arith.constant dense<0.000000e+00> : vector<2x32xf32>
    %175 = vector.multi_reduction <add>, %174, %cst_59 [1] : vector<2x8x32xf32> to vector<2x32xf32>
    %176 = vector.shape_cast %175 : vector<2x32xf32> to vector<2x1x32xf32>
    %177 = vector.broadcast %176 : vector<2x1x32xf32> to vector<2x8x32xf32>
    %178 = arith.divf %174, %177 : vector<2x8x32xf32>
    %179 = arith.truncf %178 : vector<2x8x32xf32> to vector<2x8x32xbf16>
    "tpu.trace_start"() <{level = 10 : i32, message = "bip,bpd->bid"}> : () -> ()
    %cst_60 = arith.constant dense<0.000000e+00> : vector<2x8x32xf32>
    %180 = tpu.matmul %179, %162, %cst_60 {dimension_numbers = #tpu.dot_dimension_numbers<[2], [1], [1], [2], [0, 0, 0, 1, 1, 2], [0], [0]>} : vector<2x8x32xbf16>, vector<2x32x32xbf16>, vector<2x8x32xf32> -> vector<2x8x32xf32>
    "tpu.trace_stop"() : () -> ()
    %181 = vector.shape_cast %180 : vector<2x8x32xf32> to vector<16x32xf32>
    %c7 = arith.constant 7 : index
    %c0_61 = arith.constant 0 : index
    %c0_62 = arith.constant 0 : index
    %182 = vector.load %arg7[%c7, %c0_61, %c0_62] : memref<20x32x32xbf16, #tpu.memory_space<vmem>>, vector<1x32x32xbf16>
    %183 = vector.shape_cast %182 : vector<1x32x32xbf16> to vector<32x32xbf16>
    %184 = arith.truncf %181 : vector<16x32xf32> to vector<16x32xbf16>
    %cst_63 = arith.constant dense<0.000000e+00> : vector<16x32xf32>
    %185 = tpu.matmul %184, %183, %cst_63 {dimension_numbers = #tpu.dot_dimension_numbers<[1], [0], [0], [1], [0, 0, 1, 1], [], []>} : vector<16x32xbf16>, vector<32x32xbf16>, vector<16x32xf32> -> vector<16x32xf32>
    %186 = vector.extract_strided_slice %3 {offsets = [9, 0], sizes = [1, 32], strides = [1, 1]} : vector<32x32xf32> to vector<1x32xf32>
    %187 = vector.broadcast %186 : vector<1x32xf32> to vector<16x32xf32>
    %188 = arith.addf %185, %187 : vector<16x32xf32>
    %189 = arith.addf %45, %188 : vector<16x32xf32>
    %190 = vector.extract_strided_slice %3 {offsets = [10, 0], sizes = [1, 32], strides = [1, 1]} : vector<32x32xf32> to vector<1x32xf32>
    %191 = vector.extract_strided_slice %3 {offsets = [11, 0], sizes = [1, 32], strides = [1, 1]} : vector<32x32xf32> to vector<1x32xf32>
    %cst_64 = arith.constant dense<0.000000e+00> : vector<16xf32>
    %192 = vector.multi_reduction <add>, %189, %cst_64 [1] : vector<16x32xf32> to vector<16xf32>
    %193 = vector.shape_cast %192 : vector<16xf32> to vector<16x1xf32>
    %cst_65 = arith.constant 3.200000e+01 : f32
    %194 = vector.broadcast %cst_65 : f32 to vector<16x1xf32>
    %195 = arith.divf %193, %194 : vector<16x1xf32>
    %196 = vector.broadcast %195 : vector<16x1xf32> to vector<16x32xf32>
    %197 = arith.subf %189, %196 : vector<16x32xf32>
    %198 = arith.mulf %197, %197 : vector<16x32xf32>
    %cst_66 = arith.constant dense<0.000000e+00> : vector<16xf32>
    %199 = vector.multi_reduction <add>, %198, %cst_66 [1] : vector<16x32xf32> to vector<16xf32>
    %200 = vector.shape_cast %199 : vector<16xf32> to vector<16x1xf32>
    %cst_67 = arith.constant 3.200000e+01 : f32
    %201 = vector.broadcast %cst_67 : f32 to vector<16x1xf32>
    %202 = arith.divf %200, %201 : vector<16x1xf32>
    %cst_68 = arith.constant 9.99999974E-6 : f32
    %203 = vector.broadcast %cst_68 : f32 to vector<16x1xf32>
    %204 = arith.addf %202, %203 : vector<16x1xf32>
    %205 = math.rsqrt %204 : vector<16x1xf32>
    %206 = vector.broadcast %205 : vector<16x1xf32> to vector<16x32xf32>
    %207 = arith.mulf %197, %206 : vector<16x32xf32>
    %208 = vector.broadcast %190 : vector<1x32xf32> to vector<16x32xf32>
    %209 = arith.mulf %207, %208 : vector<16x32xf32>
    %210 = vector.broadcast %191 : vector<1x32xf32> to vector<16x32xf32>
    %211 = arith.addf %209, %210 : vector<16x32xf32>
    %c8 = arith.constant 8 : index
    %c0_69 = arith.constant 0 : index
    %c0_70 = arith.constant 0 : index
    %212 = vector.load %arg7[%c8, %c0_69, %c0_70] : memref<20x32x32xbf16, #tpu.memory_space<vmem>>, vector<1x32x32xbf16>
    %213 = vector.shape_cast %212 : vector<1x32x32xbf16> to vector<32x32xbf16>
    %214 = arith.truncf %211 : vector<16x32xf32> to vector<16x32xbf16>
    %cst_71 = arith.constant dense<0.000000e+00> : vector<16x32xf32>
    %215 = tpu.matmul %214, %213, %cst_71 {dimension_numbers = #tpu.dot_dimension_numbers<[1], [0], [0], [1], [0, 0, 1, 1], [], []>} : vector<16x32xbf16>, vector<32x32xbf16>, vector<16x32xf32> -> vector<16x32xf32>
    %216 = vector.extract_strided_slice %3 {offsets = [12, 0], sizes = [1, 32], strides = [1, 1]} : vector<32x32xf32> to vector<1x32xf32>
    %217 = vector.broadcast %216 : vector<1x32xf32> to vector<16x32xf32>
    %218 = arith.addf %215, %217 : vector<16x32xf32>
    %cst_72 = arith.constant 5.000000e-01 : f32
    %219 = vector.broadcast %cst_72 : f32 to vector<16x32xf32>
    %220 = arith.mulf %219, %218 : vector<16x32xf32>
    %cst_73 = arith.constant 4.471500e-02 : f32
    %221 = vector.broadcast %cst_73 : f32 to vector<16x32xf32>
    %222 = arith.mulf %221, %218 : vector<16x32xf32>
    %223 = arith.mulf %222, %218 : vector<16x32xf32>
    %224 = arith.mulf %223, %218 : vector<16x32xf32>
    %225 = arith.addf %218, %224 : vector<16x32xf32>
    %cst_74 = arith.constant 0.797884583 : f32
    %226 = vector.broadcast %cst_74 : f32 to vector<16x32xf32>
    %227 = arith.mulf %226, %225 : vector<16x32xf32>
    %228 = math.tanh %227 : vector<16x32xf32>
    %cst_75 = arith.constant 1.000000e+00 : f32
    %229 = vector.broadcast %cst_75 : f32 to vector<16x32xf32>
    %230 = arith.addf %229, %228 : vector<16x32xf32>
    %231 = arith.mulf %220, %230 : vector<16x32xf32>
    %c9 = arith.constant 9 : index
    %c0_76 = arith.constant 0 : index
    %c0_77 = arith.constant 0 : index
    %232 = vector.load %arg7[%c9, %c0_76, %c0_77] : memref<20x32x32xbf16, #tpu.memory_space<vmem>>, vector<1x32x32xbf16>
    %233 = vector.shape_cast %232 : vector<1x32x32xbf16> to vector<32x32xbf16>
    %234 = arith.truncf %231 : vector<16x32xf32> to vector<16x32xbf16>
    %cst_78 = arith.constant dense<0.000000e+00> : vector<16x32xf32>
    %235 = tpu.matmul %234, %233, %cst_78 {dimension_numbers = #tpu.dot_dimension_numbers<[1], [0], [0], [1], [0, 0, 1, 1], [], []>} : vector<16x32xbf16>, vector<32x32xbf16>, vector<16x32xf32> -> vector<16x32xf32>
    %236 = vector.extract_strided_slice %3 {offsets = [13, 0], sizes = [1, 32], strides = [1, 1]} : vector<32x32xf32> to vector<1x32xf32>
    %237 = vector.broadcast %236 : vector<1x32xf32> to vector<16x32xf32>
    %238 = arith.addf %235, %237 : vector<16x32xf32>
    %239 = arith.addf %211, %238 : vector<16x32xf32>
    %240 = vector.extract_strided_slice %3 {offsets = [14, 0], sizes = [1, 32], strides = [1, 1]} : vector<32x32xf32> to vector<1x32xf32>
    %241 = vector.extract_strided_slice %3 {offsets = [15, 0], sizes = [1, 32], strides = [1, 1]} : vector<32x32xf32> to vector<1x32xf32>
    %cst_79 = arith.constant dense<0.000000e+00> : vector<16xf32>
    %242 = vector.multi_reduction <add>, %239, %cst_79 [1] : vector<16x32xf32> to vector<16xf32>
    %243 = vector.shape_cast %242 : vector<16xf32> to vector<16x1xf32>
    %cst_80 = arith.constant 3.200000e+01 : f32
    %244 = vector.broadcast %cst_80 : f32 to vector<16x1xf32>
    %245 = arith.divf %243, %244 : vector<16x1xf32>
    %246 = vector.broadcast %245 : vector<16x1xf32> to vector<16x32xf32>
    %247 = arith.subf %239, %246 : vector<16x32xf32>
    %248 = arith.mulf %247, %247 : vector<16x32xf32>
    %cst_81 = arith.constant dense<0.000000e+00> : vector<16xf32>
    %249 = vector.multi_reduction <add>, %248, %cst_81 [1] : vector<16x32xf32> to vector<16xf32>
    %250 = vector.shape_cast %249 : vector<16xf32> to vector<16x1xf32>
    %cst_82 = arith.constant 3.200000e+01 : f32
    %251 = vector.broadcast %cst_82 : f32 to vector<16x1xf32>
    %252 = arith.divf %250, %251 : vector<16x1xf32>
    %cst_83 = arith.constant 9.99999974E-6 : f32
    %253 = vector.broadcast %cst_83 : f32 to vector<16x1xf32>
    %254 = arith.addf %252, %253 : vector<16x1xf32>
    %255 = math.rsqrt %254 : vector<16x1xf32>
    %256 = vector.broadcast %255 : vector<16x1xf32> to vector<16x32xf32>
    %257 = arith.mulf %247, %256 : vector<16x32xf32>
    %258 = vector.broadcast %240 : vector<1x32xf32> to vector<16x32xf32>
    %259 = arith.mulf %257, %258 : vector<16x32xf32>
    %260 = vector.broadcast %241 : vector<1x32xf32> to vector<16x32xf32>
    %261 = arith.addf %259, %260 : vector<16x32xf32>
    %c10 = arith.constant 10 : index
    %c0_84 = arith.constant 0 : index
    %c0_85 = arith.constant 0 : index
    %262 = vector.load %arg7[%c10, %c0_84, %c0_85] : memref<20x32x32xbf16, #tpu.memory_space<vmem>>, vector<1x32x32xbf16>
    %263 = vector.shape_cast %262 : vector<1x32x32xbf16> to vector<32x32xbf16>
    %264 = arith.truncf %261 : vector<16x32xf32> to vector<16x32xbf16>
    %cst_86 = arith.constant dense<0.000000e+00> : vector<16x32xf32>
    %265 = tpu.matmul %264, %263, %cst_86 {dimension_numbers = #tpu.dot_dimension_numbers<[1], [0], [0], [1], [0, 0, 1, 1], [], []>} : vector<16x32xbf16>, vector<32x32xbf16>, vector<16x32xf32> -> vector<16x32xf32>
    %266 = vector.extract_strided_slice %3 {offsets = [16, 0], sizes = [1, 32], strides = [1, 1]} : vector<32x32xf32> to vector<1x32xf32>
    %267 = vector.broadcast %266 : vector<1x32xf32> to vector<16x32xf32>
    %268 = arith.addf %265, %267 : vector<16x32xf32>
    %c11 = arith.constant 11 : index
    %c0_87 = arith.constant 0 : index
    %c0_88 = arith.constant 0 : index
    %269 = vector.load %arg7[%c11, %c0_87, %c0_88] : memref<20x32x32xbf16, #tpu.memory_space<vmem>>, vector<1x32x32xbf16>
    %270 = vector.shape_cast %269 : vector<1x32x32xbf16> to vector<32x32xbf16>
    %271 = arith.truncf %261 : vector<16x32xf32> to vector<16x32xbf16>
    %cst_89 = arith.constant dense<0.000000e+00> : vector<16x32xf32>
    %272 = tpu.matmul %271, %270, %cst_89 {dimension_numbers = #tpu.dot_dimension_numbers<[1], [0], [0], [1], [0, 0, 1, 1], [], []>} : vector<16x32xbf16>, vector<32x32xbf16>, vector<16x32xf32> -> vector<16x32xf32>
    %273 = vector.extract_strided_slice %3 {offsets = [17, 0], sizes = [1, 32], strides = [1, 1]} : vector<32x32xf32> to vector<1x32xf32>
    %274 = vector.broadcast %273 : vector<1x32xf32> to vector<16x32xf32>
    %275 = arith.addf %272, %274 : vector<16x32xf32>
    %c12 = arith.constant 12 : index
    %c0_90 = arith.constant 0 : index
    %c0_91 = arith.constant 0 : index
    %276 = vector.load %arg7[%c12, %c0_90, %c0_91] : memref<20x32x32xbf16, #tpu.memory_space<vmem>>, vector<1x32x32xbf16>
    %277 = vector.shape_cast %276 : vector<1x32x32xbf16> to vector<32x32xbf16>
    %278 = arith.truncf %261 : vector<16x32xf32> to vector<16x32xbf16>
    %cst_92 = arith.constant dense<0.000000e+00> : vector<16x32xf32>
    %279 = tpu.matmul %278, %277, %cst_92 {dimension_numbers = #tpu.dot_dimension_numbers<[1], [0], [0], [1], [0, 0, 1, 1], [], []>} : vector<16x32xbf16>, vector<32x32xbf16>, vector<16x32xf32> -> vector<16x32xf32>
    %280 = vector.extract_strided_slice %3 {offsets = [18, 0], sizes = [1, 32], strides = [1, 1]} : vector<32x32xf32> to vector<1x32xf32>
    %281 = vector.broadcast %280 : vector<1x32xf32> to vector<16x32xf32>
    %282 = arith.addf %279, %281 : vector<16x32xf32>
    %283 = vector.shape_cast %268 : vector<16x32xf32> to vector<2x8x32xf32>
    %284 = vector.shape_cast %275 : vector<16x32xf32> to vector<2x8x32xf32>
    %285 = vector.shape_cast %282 : vector<16x32xf32> to vector<2x8x32xf32>
    %286 = tpu.concatenate %284, %284, %284, %284 in 1 : vector<2x8x32xf32>, vector<2x8x32xf32>, vector<2x8x32xf32>, vector<2x8x32xf32> -> vector<2x32x32xf32>
    %287 = vector.shape_cast %1 : vector<32x32xf32> to vector<1x32x32xf32>
    %288 = vector.broadcast %287 : vector<1x32x32xf32> to vector<2x32x32xf32>
    %289 = arith.mulf %286, %288 : vector<2x32x32xf32>
    %290 = arith.truncf %289 : vector<2x32x32xf32> to vector<2x32x32xbf16>
    %291 = tpu.concatenate %285, %285, %285, %285 in 1 : vector<2x8x32xf32>, vector<2x8x32xf32>, vector<2x8x32xf32>, vector<2x8x32xf32> -> vector<2x32x32xf32>
    %292 = vector.shape_cast %1 : vector<32x32xf32> to vector<1x32x32xf32>
    %293 = vector.broadcast %292 : vector<1x32x32xf32> to vector<2x32x32xf32>
    %294 = arith.mulf %291, %293 : vector<2x32x32xf32>
    %295 = arith.truncf %294 : vector<2x32x32xf32> to vector<2x32x32xbf16>
    %296 = arith.truncf %283 : vector<2x8x32xf32> to vector<2x8x32xbf16>
    "tpu.trace_start"() <{level = 10 : i32, message = "bid,bpd->bip"}> : () -> ()
    %cst_93 = arith.constant dense<0.000000e+00> : vector<2x8x32xf32>
    %297 = tpu.matmul %296, %290, %cst_93 {dimension_numbers = #tpu.dot_dimension_numbers<[2], [2], [1], [1], [0, 0, 0, 1, 1, 1], [0], [0]>} : vector<2x8x32xbf16>, vector<2x32x32xbf16>, vector<2x8x32xf32> -> vector<2x8x32xf32>
    "tpu.trace_stop"() : () -> ()
    %cst_94 = arith.constant 0.353553385 : f32
    %298 = vector.broadcast %cst_94 : f32 to vector<2x8x32xf32>
    %299 = arith.mulf %297, %298 : vector<2x8x32xf32>
    %300 = vector.shape_cast %0 : vector<8x32xf32> to vector<1x8x32xf32>
    %301 = vector.broadcast %300 : vector<1x8x32xf32> to vector<2x8x32xf32>
    %302 = arith.addf %299, %301 : vector<2x8x32xf32>
    %cst_95 = arith.constant dense<0xFF800000> : vector<2x32xf32>
    %303 = vector.multi_reduction <maximumf>, %302, %cst_95 [1] : vector<2x8x32xf32> to vector<2x32xf32>
    %304 = vector.shape_cast %303 : vector<2x32xf32> to vector<2x1x32xf32>
    %305 = vector.broadcast %304 : vector<2x1x32xf32> to vector<2x8x32xf32>
    %306 = arith.subf %302, %305 : vector<2x8x32xf32>
    %307 = math.exp %306 : vector<2x8x32xf32>
    %cst_96 = arith.constant dense<0.000000e+00> : vector<2x32xf32>
    %308 = vector.multi_reduction <add>, %307, %cst_96 [1] : vector<2x8x32xf32> to vector<2x32xf32>
    %309 = vector.shape_cast %308 : vector<2x32xf32> to vector<2x1x32xf32>
    %310 = vector.broadcast %309 : vector<2x1x32xf32> to vector<2x8x32xf32>
    %311 = arith.divf %307, %310 : vector<2x8x32xf32>
    %312 = arith.truncf %311 : vector<2x8x32xf32> to vector<2x8x32xbf16>
    "tpu.trace_start"() <{level = 10 : i32, message = "bip,bpd->bid"}> : () -> ()
    %cst_97 = arith.constant dense<0.000000e+00> : vector<2x8x32xf32>
    %313 = tpu.matmul %312, %295, %cst_97 {dimension_numbers = #tpu.dot_dimension_numbers<[2], [1], [1], [2], [0, 0, 0, 1, 1, 2], [0], [0]>} : vector<2x8x32xbf16>, vector<2x32x32xbf16>, vector<2x8x32xf32> -> vector<2x8x32xf32>
    "tpu.trace_stop"() : () -> ()
    %314 = vector.shape_cast %313 : vector<2x8x32xf32> to vector<16x32xf32>
    %c13 = arith.constant 13 : index
    %c0_98 = arith.constant 0 : index
    %c0_99 = arith.constant 0 : index
    %315 = vector.load %arg7[%c13, %c0_98, %c0_99] : memref<20x32x32xbf16, #tpu.memory_space<vmem>>, vector<1x32x32xbf16>
    %316 = vector.shape_cast %315 : vector<1x32x32xbf16> to vector<32x32xbf16>
    %317 = arith.truncf %314 : vector<16x32xf32> to vector<16x32xbf16>
    %cst_100 = arith.constant dense<0.000000e+00> : vector<16x32xf32>
    %318 = tpu.matmul %317, %316, %cst_100 {dimension_numbers = #tpu.dot_dimension_numbers<[1], [0], [0], [1], [0, 0, 1, 1], [], []>} : vector<16x32xbf16>, vector<32x32xbf16>, vector<16x32xf32> -> vector<16x32xf32>
    %319 = vector.extract_strided_slice %3 {offsets = [19, 0], sizes = [1, 32], strides = [1, 1]} : vector<32x32xf32> to vector<1x32xf32>
    %320 = vector.broadcast %319 : vector<1x32xf32> to vector<16x32xf32>
    %321 = arith.addf %318, %320 : vector<16x32xf32>
    %322 = arith.addf %261, %321 : vector<16x32xf32>
    %323 = vector.extract_strided_slice %3 {offsets = [20, 0], sizes = [1, 32], strides = [1, 1]} : vector<32x32xf32> to vector<1x32xf32>
    %324 = vector.extract_strided_slice %3 {offsets = [21, 0], sizes = [1, 32], strides = [1, 1]} : vector<32x32xf32> to vector<1x32xf32>
    %cst_101 = arith.constant dense<0.000000e+00> : vector<16xf32>
    %325 = vector.multi_reduction <add>, %322, %cst_101 [1] : vector<16x32xf32> to vector<16xf32>
    %326 = vector.shape_cast %325 : vector<16xf32> to vector<16x1xf32>
    %cst_102 = arith.constant 3.200000e+01 : f32
    %327 = vector.broadcast %cst_102 : f32 to vector<16x1xf32>
    %328 = arith.divf %326, %327 : vector<16x1xf32>
    %329 = vector.broadcast %328 : vector<16x1xf32> to vector<16x32xf32>
    %330 = arith.subf %322, %329 : vector<16x32xf32>
    %331 = arith.mulf %330, %330 : vector<16x32xf32>
    %cst_103 = arith.constant dense<0.000000e+00> : vector<16xf32>
    %332 = vector.multi_reduction <add>, %331, %cst_103 [1] : vector<16x32xf32> to vector<16xf32>
    %333 = vector.shape_cast %332 : vector<16xf32> to vector<16x1xf32>
    %cst_104 = arith.constant 3.200000e+01 : f32
    %334 = vector.broadcast %cst_104 : f32 to vector<16x1xf32>
    %335 = arith.divf %333, %334 : vector<16x1xf32>
    %cst_105 = arith.constant 9.99999974E-6 : f32
    %336 = vector.broadcast %cst_105 : f32 to vector<16x1xf32>
    %337 = arith.addf %335, %336 : vector<16x1xf32>
    %338 = math.rsqrt %337 : vector<16x1xf32>
    %339 = vector.broadcast %338 : vector<16x1xf32> to vector<16x32xf32>
    %340 = arith.mulf %330, %339 : vector<16x32xf32>
    %341 = vector.broadcast %323 : vector<1x32xf32> to vector<16x32xf32>
    %342 = arith.mulf %340, %341 : vector<16x32xf32>
    %343 = vector.broadcast %324 : vector<1x32xf32> to vector<16x32xf32>
    %344 = arith.addf %342, %343 : vector<16x32xf32>
    %c14 = arith.constant 14 : index
    %c0_106 = arith.constant 0 : index
    %c0_107 = arith.constant 0 : index
    %345 = vector.load %arg7[%c14, %c0_106, %c0_107] : memref<20x32x32xbf16, #tpu.memory_space<vmem>>, vector<1x32x32xbf16>
    %346 = vector.shape_cast %345 : vector<1x32x32xbf16> to vector<32x32xbf16>
    %347 = arith.truncf %45 : vector<16x32xf32> to vector<16x32xbf16>
    %cst_108 = arith.constant dense<0.000000e+00> : vector<16x32xf32>
    %348 = tpu.matmul %347, %346, %cst_108 {dimension_numbers = #tpu.dot_dimension_numbers<[1], [0], [0], [1], [0, 0, 1, 1], [], []>} : vector<16x32xbf16>, vector<32x32xbf16>, vector<16x32xf32> -> vector<16x32xf32>
    %349 = vector.extract_strided_slice %3 {offsets = [22, 0], sizes = [1, 32], strides = [1, 1]} : vector<32x32xf32> to vector<1x32xf32>
    %350 = vector.broadcast %349 : vector<1x32xf32> to vector<16x32xf32>
    %351 = arith.addf %348, %350 : vector<16x32xf32>
    %c15 = arith.constant 15 : index
    %c0_109 = arith.constant 0 : index
    %c0_110 = arith.constant 0 : index
    %352 = vector.load %arg7[%c15, %c0_109, %c0_110] : memref<20x32x32xbf16, #tpu.memory_space<vmem>>, vector<1x32x32xbf16>
    %353 = vector.shape_cast %352 : vector<1x32x32xbf16> to vector<32x32xbf16>
    %354 = arith.truncf %344 : vector<16x32xf32> to vector<16x32xbf16>
    %cst_111 = arith.constant dense<0.000000e+00> : vector<16x32xf32>
    %355 = tpu.matmul %354, %353, %cst_111 {dimension_numbers = #tpu.dot_dimension_numbers<[1], [0], [0], [1], [0, 0, 1, 1], [], []>} : vector<16x32xbf16>, vector<32x32xbf16>, vector<16x32xf32> -> vector<16x32xf32>
    %356 = vector.extract_strided_slice %3 {offsets = [23, 0], sizes = [1, 32], strides = [1, 1]} : vector<32x32xf32> to vector<1x32xf32>
    %357 = vector.broadcast %356 : vector<1x32xf32> to vector<16x32xf32>
    %358 = arith.addf %355, %357 : vector<16x32xf32>
    %c16 = arith.constant 16 : index
    %c0_112 = arith.constant 0 : index
    %c0_113 = arith.constant 0 : index
    %359 = vector.load %arg7[%c16, %c0_112, %c0_113] : memref<20x32x32xbf16, #tpu.memory_space<vmem>>, vector<1x32x32xbf16>
    %360 = vector.shape_cast %359 : vector<1x32x32xbf16> to vector<32x32xbf16>
    %361 = arith.truncf %344 : vector<16x32xf32> to vector<16x32xbf16>
    %cst_114 = arith.constant dense<0.000000e+00> : vector<16x32xf32>
    %362 = tpu.matmul %361, %360, %cst_114 {dimension_numbers = #tpu.dot_dimension_numbers<[1], [0], [0], [1], [0, 0, 1, 1], [], []>} : vector<16x32xbf16>, vector<32x32xbf16>, vector<16x32xf32> -> vector<16x32xf32>
    %363 = vector.extract_strided_slice %3 {offsets = [24, 0], sizes = [1, 32], strides = [1, 1]} : vector<32x32xf32> to vector<1x32xf32>
    %364 = vector.broadcast %363 : vector<1x32xf32> to vector<16x32xf32>
    %365 = arith.addf %362, %364 : vector<16x32xf32>
    %366 = vector.shape_cast %351 : vector<16x32xf32> to vector<2x8x32xf32>
    %367 = vector.shape_cast %358 : vector<16x32xf32> to vector<2x8x32xf32>
    %368 = vector.shape_cast %365 : vector<16x32xf32> to vector<2x8x32xf32>
    %369 = tpu.concatenate %367, %367, %367, %367 in 1 : vector<2x8x32xf32>, vector<2x8x32xf32>, vector<2x8x32xf32>, vector<2x8x32xf32> -> vector<2x32x32xf32>
    %370 = vector.shape_cast %1 : vector<32x32xf32> to vector<1x32x32xf32>
    %371 = vector.broadcast %370 : vector<1x32x32xf32> to vector<2x32x32xf32>
    %372 = arith.mulf %369, %371 : vector<2x32x32xf32>
    %373 = arith.truncf %372 : vector<2x32x32xf32> to vector<2x32x32xbf16>
    %374 = tpu.concatenate %368, %368, %368, %368 in 1 : vector<2x8x32xf32>, vector<2x8x32xf32>, vector<2x8x32xf32>, vector<2x8x32xf32> -> vector<2x32x32xf32>
    %375 = vector.shape_cast %1 : vector<32x32xf32> to vector<1x32x32xf32>
    %376 = vector.broadcast %375 : vector<1x32x32xf32> to vector<2x32x32xf32>
    %377 = arith.mulf %374, %376 : vector<2x32x32xf32>
    %378 = arith.truncf %377 : vector<2x32x32xf32> to vector<2x32x32xbf16>
    %379 = arith.truncf %366 : vector<2x8x32xf32> to vector<2x8x32xbf16>
    "tpu.trace_start"() <{level = 10 : i32, message = "bid,bpd->bip"}> : () -> ()
    %cst_115 = arith.constant dense<0.000000e+00> : vector<2x8x32xf32>
    %380 = tpu.matmul %379, %373, %cst_115 {dimension_numbers = #tpu.dot_dimension_numbers<[2], [2], [1], [1], [0, 0, 0, 1, 1, 1], [0], [0]>} : vector<2x8x32xbf16>, vector<2x32x32xbf16>, vector<2x8x32xf32> -> vector<2x8x32xf32>
    "tpu.trace_stop"() : () -> ()
    %cst_116 = arith.constant 0.353553385 : f32
    %381 = vector.broadcast %cst_116 : f32 to vector<2x8x32xf32>
    %382 = arith.mulf %380, %381 : vector<2x8x32xf32>
    %383 = vector.shape_cast %0 : vector<8x32xf32> to vector<1x8x32xf32>
    %384 = vector.broadcast %383 : vector<1x8x32xf32> to vector<2x8x32xf32>
    %385 = arith.addf %382, %384 : vector<2x8x32xf32>
    %cst_117 = arith.constant dense<0xFF800000> : vector<2x32xf32>
    %386 = vector.multi_reduction <maximumf>, %385, %cst_117 [1] : vector<2x8x32xf32> to vector<2x32xf32>
    %387 = vector.shape_cast %386 : vector<2x32xf32> to vector<2x1x32xf32>
    %388 = vector.broadcast %387 : vector<2x1x32xf32> to vector<2x8x32xf32>
    %389 = arith.subf %385, %388 : vector<2x8x32xf32>
    %390 = math.exp %389 : vector<2x8x32xf32>
    %cst_118 = arith.constant dense<0.000000e+00> : vector<2x32xf32>
    %391 = vector.multi_reduction <add>, %390, %cst_118 [1] : vector<2x8x32xf32> to vector<2x32xf32>
    %392 = vector.shape_cast %391 : vector<2x32xf32> to vector<2x1x32xf32>
    %393 = vector.broadcast %392 : vector<2x1x32xf32> to vector<2x8x32xf32>
    %394 = arith.divf %390, %393 : vector<2x8x32xf32>
    %395 = arith.truncf %394 : vector<2x8x32xf32> to vector<2x8x32xbf16>
    "tpu.trace_start"() <{level = 10 : i32, message = "bip,bpd->bid"}> : () -> ()
    %cst_119 = arith.constant dense<0.000000e+00> : vector<2x8x32xf32>
    %396 = tpu.matmul %395, %378, %cst_119 {dimension_numbers = #tpu.dot_dimension_numbers<[2], [1], [1], [2], [0, 0, 0, 1, 1, 2], [0], [0]>} : vector<2x8x32xbf16>, vector<2x32x32xbf16>, vector<2x8x32xf32> -> vector<2x8x32xf32>
    "tpu.trace_stop"() : () -> ()
    %397 = vector.shape_cast %396 : vector<2x8x32xf32> to vector<16x32xf32>
    %c17 = arith.constant 17 : index
    %c0_120 = arith.constant 0 : index
    %c0_121 = arith.constant 0 : index
    %398 = vector.load %arg7[%c17, %c0_120, %c0_121] : memref<20x32x32xbf16, #tpu.memory_space<vmem>>, vector<1x32x32xbf16>
    %399 = vector.shape_cast %398 : vector<1x32x32xbf16> to vector<32x32xbf16>
    %400 = arith.truncf %397 : vector<16x32xf32> to vector<16x32xbf16>
    %cst_122 = arith.constant dense<0.000000e+00> : vector<16x32xf32>
    %401 = tpu.matmul %400, %399, %cst_122 {dimension_numbers = #tpu.dot_dimension_numbers<[1], [0], [0], [1], [0, 0, 1, 1], [], []>} : vector<16x32xbf16>, vector<32x32xbf16>, vector<16x32xf32> -> vector<16x32xf32>
    %402 = vector.extract_strided_slice %3 {offsets = [25, 0], sizes = [1, 32], strides = [1, 1]} : vector<32x32xf32> to vector<1x32xf32>
    %403 = vector.broadcast %402 : vector<1x32xf32> to vector<16x32xf32>
    %404 = arith.addf %401, %403 : vector<16x32xf32>
    %405 = arith.addf %45, %404 : vector<16x32xf32>
    %406 = vector.extract_strided_slice %3 {offsets = [26, 0], sizes = [1, 32], strides = [1, 1]} : vector<32x32xf32> to vector<1x32xf32>
    %407 = vector.extract_strided_slice %3 {offsets = [27, 0], sizes = [1, 32], strides = [1, 1]} : vector<32x32xf32> to vector<1x32xf32>
    %cst_123 = arith.constant dense<0.000000e+00> : vector<16xf32>
    %408 = vector.multi_reduction <add>, %405, %cst_123 [1] : vector<16x32xf32> to vector<16xf32>
    %409 = vector.shape_cast %408 : vector<16xf32> to vector<16x1xf32>
    %cst_124 = arith.constant 3.200000e+01 : f32
    %410 = vector.broadcast %cst_124 : f32 to vector<16x1xf32>
    %411 = arith.divf %409, %410 : vector<16x1xf32>
    %412 = vector.broadcast %411 : vector<16x1xf32> to vector<16x32xf32>
    %413 = arith.subf %405, %412 : vector<16x32xf32>
    %414 = arith.mulf %413, %413 : vector<16x32xf32>
    %cst_125 = arith.constant dense<0.000000e+00> : vector<16xf32>
    %415 = vector.multi_reduction <add>, %414, %cst_125 [1] : vector<16x32xf32> to vector<16xf32>
    %416 = vector.shape_cast %415 : vector<16xf32> to vector<16x1xf32>
    %cst_126 = arith.constant 3.200000e+01 : f32
    %417 = vector.broadcast %cst_126 : f32 to vector<16x1xf32>
    %418 = arith.divf %416, %417 : vector<16x1xf32>
    %cst_127 = arith.constant 9.99999974E-6 : f32
    %419 = vector.broadcast %cst_127 : f32 to vector<16x1xf32>
    %420 = arith.addf %418, %419 : vector<16x1xf32>
    %421 = math.rsqrt %420 : vector<16x1xf32>
    %422 = vector.broadcast %421 : vector<16x1xf32> to vector<16x32xf32>
    %423 = arith.mulf %413, %422 : vector<16x32xf32>
    %424 = vector.broadcast %406 : vector<1x32xf32> to vector<16x32xf32>
    %425 = arith.mulf %423, %424 : vector<16x32xf32>
    %426 = vector.broadcast %407 : vector<1x32xf32> to vector<16x32xf32>
    %427 = arith.addf %425, %426 : vector<16x32xf32>
    %c18 = arith.constant 18 : index
    %c0_128 = arith.constant 0 : index
    %c0_129 = arith.constant 0 : index
    %428 = vector.load %arg7[%c18, %c0_128, %c0_129] : memref<20x32x32xbf16, #tpu.memory_space<vmem>>, vector<1x32x32xbf16>
    %429 = vector.shape_cast %428 : vector<1x32x32xbf16> to vector<32x32xbf16>
    %430 = arith.truncf %427 : vector<16x32xf32> to vector<16x32xbf16>
    %cst_130 = arith.constant dense<0.000000e+00> : vector<16x32xf32>
    %431 = tpu.matmul %430, %429, %cst_130 {dimension_numbers = #tpu.dot_dimension_numbers<[1], [0], [0], [1], [0, 0, 1, 1], [], []>} : vector<16x32xbf16>, vector<32x32xbf16>, vector<16x32xf32> -> vector<16x32xf32>
    %432 = vector.extract_strided_slice %3 {offsets = [28, 0], sizes = [1, 32], strides = [1, 1]} : vector<32x32xf32> to vector<1x32xf32>
    %433 = vector.broadcast %432 : vector<1x32xf32> to vector<16x32xf32>
    %434 = arith.addf %431, %433 : vector<16x32xf32>
    %cst_131 = arith.constant 5.000000e-01 : f32
    %435 = vector.broadcast %cst_131 : f32 to vector<16x32xf32>
    %436 = arith.mulf %435, %434 : vector<16x32xf32>
    %cst_132 = arith.constant 4.471500e-02 : f32
    %437 = vector.broadcast %cst_132 : f32 to vector<16x32xf32>
    %438 = arith.mulf %437, %434 : vector<16x32xf32>
    %439 = arith.mulf %438, %434 : vector<16x32xf32>
    %440 = arith.mulf %439, %434 : vector<16x32xf32>
    %441 = arith.addf %434, %440 : vector<16x32xf32>
    %cst_133 = arith.constant 0.797884583 : f32
    %442 = vector.broadcast %cst_133 : f32 to vector<16x32xf32>
    %443 = arith.mulf %442, %441 : vector<16x32xf32>
    %444 = math.tanh %443 : vector<16x32xf32>
    %cst_134 = arith.constant 1.000000e+00 : f32
    %445 = vector.broadcast %cst_134 : f32 to vector<16x32xf32>
    %446 = arith.addf %445, %444 : vector<16x32xf32>
    %447 = arith.mulf %436, %446 : vector<16x32xf32>
    %c19 = arith.constant 19 : index
    %c0_135 = arith.constant 0 : index
    %c0_136 = arith.constant 0 : index
    %448 = vector.load %arg7[%c19, %c0_135, %c0_136] : memref<20x32x32xbf16, #tpu.memory_space<vmem>>, vector<1x32x32xbf16>
    %449 = vector.shape_cast %448 : vector<1x32x32xbf16> to vector<32x32xbf16>
    %450 = arith.truncf %447 : vector<16x32xf32> to vector<16x32xbf16>
    %cst_137 = arith.constant dense<0.000000e+00> : vector<16x32xf32>
    %451 = tpu.matmul %450, %449, %cst_137 {dimension_numbers = #tpu.dot_dimension_numbers<[1], [0], [0], [1], [0, 0, 1, 1], [], []>} : vector<16x32xbf16>, vector<32x32xbf16>, vector<16x32xf32> -> vector<16x32xf32>
    %452 = vector.extract_strided_slice %3 {offsets = [29, 0], sizes = [1, 32], strides = [1, 1]} : vector<32x32xf32> to vector<1x32xf32>
    %453 = vector.broadcast %452 : vector<1x32xf32> to vector<16x32xf32>
    %454 = arith.addf %451, %453 : vector<16x32xf32>
    %455 = arith.addf %427, %454 : vector<16x32xf32>
    %456 = vector.extract_strided_slice %3 {offsets = [30, 0], sizes = [1, 32], strides = [1, 1]} : vector<32x32xf32> to vector<1x32xf32>
    %457 = vector.extract_strided_slice %3 {offsets = [31, 0], sizes = [1, 32], strides = [1, 1]} : vector<32x32xf32> to vector<1x32xf32>
    %cst_138 = arith.constant dense<0.000000e+00> : vector<16xf32>
    %458 = vector.multi_reduction <add>, %455, %cst_138 [1] : vector<16x32xf32> to vector<16xf32>
    %459 = vector.shape_cast %458 : vector<16xf32> to vector<16x1xf32>
    %cst_139 = arith.constant 3.200000e+01 : f32
    %460 = vector.broadcast %cst_139 : f32 to vector<16x1xf32>
    %461 = arith.divf %459, %460 : vector<16x1xf32>
    %462 = vector.broadcast %461 : vector<16x1xf32> to vector<16x32xf32>
    %463 = arith.subf %455, %462 : vector<16x32xf32>
    %464 = arith.mulf %463, %463 : vector<16x32xf32>
    %cst_140 = arith.constant dense<0.000000e+00> : vector<16xf32>
    %465 = vector.multi_reduction <add>, %464, %cst_140 [1] : vector<16x32xf32> to vector<16xf32>
    %466 = vector.shape_cast %465 : vector<16xf32> to vector<16x1xf32>
    %cst_141 = arith.constant 3.200000e+01 : f32
    %467 = vector.broadcast %cst_141 : f32 to vector<16x1xf32>
    %468 = arith.divf %466, %467 : vector<16x1xf32>
    %cst_142 = arith.constant 9.99999974E-6 : f32
    %469 = vector.broadcast %cst_142 : f32 to vector<16x1xf32>
    %470 = arith.addf %468, %469 : vector<16x1xf32>
    %471 = math.rsqrt %470 : vector<16x1xf32>
    %472 = vector.broadcast %471 : vector<16x1xf32> to vector<16x32xf32>
    %473 = arith.mulf %463, %472 : vector<16x32xf32>
    %474 = vector.broadcast %456 : vector<1x32xf32> to vector<16x32xf32>
    %475 = arith.mulf %473, %474 : vector<16x32xf32>
    %476 = vector.broadcast %457 : vector<1x32xf32> to vector<16x32xf32>
    %477 = arith.addf %475, %476 : vector<16x32xf32>
    %c0_143 = arith.constant 0 : index
    %c0_144 = arith.constant 0 : index
    %478 = vector.load %arg9[%c0_143, %c0_144] : memref<32x32xbf16, #tpu.memory_space<vmem>>, vector<32x32xbf16>
    %479 = arith.truncf %477 : vector<16x32xf32> to vector<16x32xbf16>
    %cst_145 = arith.constant dense<0.000000e+00> : vector<16x32xf32>
    %480 = tpu.matmul %479, %478, %cst_145 {dimension_numbers = #tpu.dot_dimension_numbers<[1], [0], [0], [1], [0, 0, 1, 1], [], []>} : vector<16x32xbf16>, vector<32x32xbf16>, vector<16x32xf32> -> vector<16x32xf32>
    %481 = vector.extract_strided_slice %2 {offsets = [2, 0], sizes = [1, 32], strides = [1, 1]} : vector<5x32xf32> to vector<1x32xf32>
    %482 = vector.broadcast %481 : vector<1x32xf32> to vector<16x32xf32>
    %483 = arith.addf %480, %482 : vector<16x32xf32>
    %cst_146 = arith.constant 5.000000e-01 : f32
    %484 = vector.broadcast %cst_146 : f32 to vector<16x32xf32>
    %485 = arith.mulf %484, %483 : vector<16x32xf32>
    %cst_147 = arith.constant 4.471500e-02 : f32
    %486 = vector.broadcast %cst_147 : f32 to vector<16x32xf32>
    %487 = arith.mulf %486, %483 : vector<16x32xf32>
    %488 = arith.mulf %487, %483 : vector<16x32xf32>
    %489 = arith.mulf %488, %483 : vector<16x32xf32>
    %490 = arith.addf %483, %489 : vector<16x32xf32>
    %cst_148 = arith.constant 0.797884583 : f32
    %491 = vector.broadcast %cst_148 : f32 to vector<16x32xf32>
    %492 = arith.mulf %491, %490 : vector<16x32xf32>
    %493 = math.tanh %492 : vector<16x32xf32>
    %cst_149 = arith.constant 1.000000e+00 : f32
    %494 = vector.broadcast %cst_149 : f32 to vector<16x32xf32>
    %495 = arith.addf %494, %493 : vector<16x32xf32>
    %496 = arith.mulf %485, %495 : vector<16x32xf32>
    %497 = vector.extract_strided_slice %2 {offsets = [3, 0], sizes = [1, 32], strides = [1, 1]} : vector<5x32xf32> to vector<1x32xf32>
    %498 = vector.extract_strided_slice %2 {offsets = [4, 0], sizes = [1, 32], strides = [1, 1]} : vector<5x32xf32> to vector<1x32xf32>
    %cst_150 = arith.constant dense<0.000000e+00> : vector<16xf32>
    %499 = vector.multi_reduction <add>, %496, %cst_150 [1] : vector<16x32xf32> to vector<16xf32>
    %500 = vector.shape_cast %499 : vector<16xf32> to vector<16x1xf32>
    %cst_151 = arith.constant 3.200000e+01 : f32
    %501 = vector.broadcast %cst_151 : f32 to vector<16x1xf32>
    %502 = arith.divf %500, %501 : vector<16x1xf32>
    %503 = vector.broadcast %502 : vector<16x1xf32> to vector<16x32xf32>
    %504 = arith.subf %496, %503 : vector<16x32xf32>
    %505 = arith.mulf %504, %504 : vector<16x32xf32>
    %cst_152 = arith.constant dense<0.000000e+00> : vector<16xf32>
    %506 = vector.multi_reduction <add>, %505, %cst_152 [1] : vector<16x32xf32> to vector<16xf32>
    %507 = vector.shape_cast %506 : vector<16xf32> to vector<16x1xf32>
    %cst_153 = arith.constant 3.200000e+01 : f32
    %508 = vector.broadcast %cst_153 : f32 to vector<16x1xf32>
    %509 = arith.divf %507, %508 : vector<16x1xf32>
    %cst_154 = arith.constant 9.99999974E-6 : f32
    %510 = vector.broadcast %cst_154 : f32 to vector<16x1xf32>
    %511 = arith.addf %509, %510 : vector<16x1xf32>
    %512 = math.rsqrt %511 : vector<16x1xf32>
    %513 = vector.broadcast %512 : vector<16x1xf32> to vector<16x32xf32>
    %514 = arith.mulf %504, %513 : vector<16x32xf32>
    %515 = vector.broadcast %497 : vector<1x32xf32> to vector<16x32xf32>
    %516 = arith.mulf %514, %515 : vector<16x32xf32>
    %517 = vector.broadcast %498 : vector<1x32xf32> to vector<16x32xf32>
    %518 = arith.addf %516, %517 : vector<16x32xf32>
    %c0_155 = arith.constant 0 : index
    %c0_156 = arith.constant 0 : index
    %519 = vector.load %arg10[%c0_155, %c0_156] : memref<32x5xbf16, #tpu.memory_space<vmem>>, vector<32x5xbf16>
    %520 = arith.truncf %518 : vector<16x32xf32> to vector<16x32xbf16>
    %cst_157 = arith.constant dense<0.000000e+00> : vector<16x5xf32>
    %521 = tpu.matmul %520, %519, %cst_157 {dimension_numbers = #tpu.dot_dimension_numbers<[1], [0], [0], [1], [0, 0, 1, 1], [], []>} : vector<16x32xbf16>, vector<32x5xbf16>, vector<16x5xf32> -> vector<16x5xf32>
    %c0_158 = arith.constant 0 : index
    %c0_159 = arith.constant 0 : index
    %522 = vector.load %arg11[%c0_158, %c0_159] : memref<1x5xf32, #tpu.memory_space<vmem>>, vector<1x5xf32>
    %523 = vector.broadcast %522 : vector<1x5xf32> to vector<16x5xf32>
    %524 = arith.addf %521, %523 : vector<16x5xf32>
    %cst_160 = arith.constant dense<0xFF800000> : vector<16xf32>
    %525 = vector.multi_reduction <maximumf>, %524, %cst_160 [1] : vector<16x5xf32> to vector<16xf32>
    %526 = vector.shape_cast %525 : vector<16xf32> to vector<16x1xf32>
    %527 = vector.broadcast %526 : vector<16x1xf32> to vector<16x5xf32>
    %528 = arith.subf %524, %527 : vector<16x5xf32>
    %529 = math.exp %528 : vector<16x5xf32>
    %cst_161 = arith.constant dense<0.000000e+00> : vector<16xf32>
    %530 = vector.multi_reduction <add>, %529, %cst_161 [1] : vector<16x5xf32> to vector<16xf32>
    %531 = vector.shape_cast %530 : vector<16xf32> to vector<16x1xf32>
    %532 = vector.broadcast %531 : vector<16x1xf32> to vector<16x5xf32>
    %533 = arith.divf %529, %532 : vector<16x5xf32>
    %534 = vector.shape_cast %533 : vector<16x5xf32> to vector<2x8x5xf32>
    %c0_162 = arith.constant 0 : index
    %c0_163 = arith.constant 0 : index
    %c0_164 = arith.constant 0 : index
    %535 = vector.load %arg12[%c0_162, %c0_163, %c0_164] : memref<2x8x5xf32, #tpu.memory_space<vmem>>, vector<2x8x5xf32>
    tpu.vector_store %arg12[%c0_162, %c0_163, %c0_164], %534 {strides = array<i32>} : memref<2x8x5xf32, #tpu.memory_space<vmem>>, vector<2x8x5xf32>,
    return
  }
  func.func @transform_0(%arg0: i32) -> (i32, i32, i32) {
    %c0_i32 = arith.constant 0 : i32
    %c0_i32_0 = arith.constant 0 : i32
    %c0_i32_1 = arith.constant 0 : i32
    return %arg0, %c0_i32, %c0_i32_0 : i32, i32, i32
  }
  func.func @transform_1(%arg0: i32) -> (i32, i32, i32) {
    %c0_i32 = arith.constant 0 : i32
    %c0_i32_0 = arith.constant 0 : i32
    %c0_i32_1 = arith.constant 0 : i32
    return %arg0, %c0_i32, %c0_i32_0 : i32, i32, i32
  }
  func.func @transform_2(%arg0: i32) -> (i32, i32) {
    %c0_i32 = arith.constant 0 : i32
    %c0_i32_0 = arith.constant 0 : i32
    %c0_i32_1 = arith.constant 0 : i32
    return %c0_i32, %c0_i32_0 : i32, i32
  }
  func.func @transform_3(%arg0: i32) -> (i32, i32) {
    %c0_i32 = arith.constant 0 : i32
    %c0_i32_0 = arith.constant 0 : i32
    %c0_i32_1 = arith.constant 0 : i32
    return %c0_i32, %c0_i32_0 : i32, i32
  }
  func.func @transform_4(%arg0: i32) -> (i32, i32) {
    %c0_i32 = arith.constant 0 : i32
    %c0_i32_0 = arith.constant 0 : i32
    %c0_i32_1 = arith.constant 0 : i32
    return %c0_i32, %c0_i32_0 : i32, i32
  }
  func.func @transform_5(%arg0: i32) -> (i32, i32) {
    %c0_i32 = arith.constant 0 : i32
    %c0_i32_0 = arith.constant 0 : i32
    %c0_i32_1 = arith.constant 0 : i32
    return %c0_i32, %c0_i32_0 : i32, i32
  }
  func.func @transform_6(%arg0: i32) -> (i32, i32, i32) {
    %c0_i32 = arith.constant 0 : i32
    %c0_i32_0 = arith.constant 0 : i32
    %c0_i32_1 = arith.constant 0 : i32
    %c0_i32_2 = arith.constant 0 : i32
    return %c0_i32, %c0_i32_0, %c0_i32_1 : i32, i32, i32
  }
  func.func @transform_7(%arg0: i32) -> (i32, i32) {
    %c0_i32 = arith.constant 0 : i32
    %c0_i32_0 = arith.constant 0 : i32
    %c0_i32_1 = arith.constant 0 : i32
    return %c0_i32, %c0_i32_0 : i32, i32
  }
  func.func @transform_8(%arg0: i32) -> (i32, i32) {
    %c0_i32 = arith.constant 0 : i32
    %c0_i32_0 = arith.constant 0 : i32
    %c0_i32_1 = arith.constant 0 : i32
    return %c0_i32, %c0_i32_0 : i32, i32
  }
  func.func @transform_9(%arg0: i32) -> (i32, i32) {
    %c0_i32 = arith.constant 0 : i32
    %c0_i32_0 = arith.constant 0 : i32
    %c0_i32_1 = arith.constant 0 : i32
    return %c0_i32, %c0_i32_0 : i32, i32
  }
  func.func @transform_10(%arg0: i32) -> (i32, i32) {
    %c0_i32 = arith.constant 0 : i32
    %c0_i32_0 = arith.constant 0 : i32
    %c0_i32_1 = arith.constant 0 : i32
    return %c0_i32, %c0_i32_0 : i32, i32
  }
  func.func @transform_11(%arg0: i32) -> (i32, i32, i32) {
    %c0_i32 = arith.constant 0 : i32
    %c0_i32_0 = arith.constant 0 : i32
    %c0_i32_1 = arith.constant 0 : i32
    return %arg0, %c0_i32, %c0_i32_0 : i32, i32, i32
  }
}

</mosaic_0001>

<bundles_post_ra>
// kernel: decoder_forward.1
= control target key start
LH: loop header
LB: loop body
LE: loop exit
PB: predicated region body
PF: predicated region fallthrough
CT: control target
= control target key end

     0   :  { %s4224_s17 = smov 0   ;;  %s4933_s0 = inlined_call_operand.vmem [shape: f32[4,8,5], index: 0, kind: input, shape index: {}]   ;;  %s4934_s1 = inlined_call_operand.vmem [shape: f32[4,8,32], index: 1, kind: input, shape index: {}]   ;;  %s4935_s2 = inlined_call_operand.vmem [shape: f32[8,32], index: 2, kind: input, shape index: {}]   ;;  %s4936_s3 = inlined_call_operand.vmem [shape: f32[32,32], index: 3, kind: input, shape index: {}]   ;;  %s4937_s4 = inlined_call_operand.vmem [shape: bf16[5,32], index: 4, kind: input, shape index: {}]   ;;  %s4938_s5 = inlined_call_operand.vmem [shape: f32[5,32], index: 5, kind: input, shape index: {}]   ;;  %s4939_s6 = inlined_call_operand.vmem [shape: bf16[20,32,32], index: 6, kind: input, shape index: {}]   ;;  %s4940_s7 = inlined_call_operand.vmem [shape: f32[32,32], index: 7, kind: input, shape index: {}]   ;;  %s4941_s8 = inlined_call_operand.vmem [shape: bf16[32,32], index: 8, kind: input, shape index: {}]   ;;  %s4942_s9 = inlined_call_operand.vmem [shape: bf16[32,5], index: 9, kind: input, shape index: {}]   ;;  %s4943_s10 = inlined_call_operand.vmem [shape: f32[1,5], index: 10, kind: input, shape index: {}]   ;;  %s4944_s11 = inlined_call_operand.vmem [shape: f32[4,8,5], index: 11, kind: output, shape index: {}]  }
   0x1 LB: > { %s3403_s18 = sadd.s32 4294967295, %s4159_s17   ;;  %p3407_p0 = scmp.ge.s32.totalorder %s4159_s17, 1  ;;  %s4159_s17 = sphi %s4224_s17, %s21_s17  }
   0x2   : > { %p349_p1 = scmp.lt.s32.totalorder %s4159_s17, 3 }
   0x4   : > { %p350_p2 = pnand %p3407_p0, %p349_p1 }
   0x5   : > { %v425_v0 = vld [vmem:[%s4937_s4] sm:$0x7] (!%p350_p2)  ;;  %vm431_vm0 = vcmask (!%p350_p2), 1041408   ;;  %vm432_vm1 = vcmask (!%p350_p2), 1042432   ;;  %v4161_v1 = vmov (!%p350_p2), 0.0   ;;  %v4162_v2 = vmov (!%p350_p2), 65535  }
   0x6   : > { %353 = sbr.rel (%p350_p2) target bundleno = 8234 (0x202a), region = 64  ;;  %3692 = vmatprep.subr.bf16.mxu0 (!%p350_p2), %v4161_v1  ;;  %v433_v3 = vsel (!%p350_p2), %vm431_vm0, 4294967295, %v4162_v2  ;;  %s3408_s21 = sshll.u32 (!%p350_p2), %s3403_s18, 1  ;;  %3698 = vmatprep.subr.bf16.mxu1 (!%p350_p2), %v4161_v1  ;;  %vm4163_vm2 = vmmov (!%p350_p2), 0   ;;  %vm427_vm3 = vcmask (!%p350_p2), 39936   ;;  %vm497_vm4 = vcmask (!%p350_p2), 261120  }
   0x7   : > { %v434_v4 = vsel (!%p350_p2), %vm432_vm1, %v433_v3, 0  ;;  %3694 = vmatprep.mubr.msk.bf16.mxu0 (!%p350_p2), %vm4163_vm2, %v4161_v1  ;;  %p395_p3 = scmp.lt.s32.totalorder (!%p350_p2), %s3408_s21, 3  ;;  %3702 = vmatprep.mubr.msk.bf16.mxu1 (!%p350_p2), %vm4163_vm2, %v4161_v1  ;;  %v4013_v43 = vld [vmem:[%s4939_s6 + $0x10] sm:$0xff] (!%p350_p2)   ;;  %v4014_v44 = vld [vmem:[%s4939_s6] sm:$0xff] (!%p350_p2)   ;;  %v4015_v45 = vld [vmem:[%s4939_s6 + $0x18] sm:$0xff] (!%p350_p2)   ;;  %v525_v51 = vlaneseq (!%p350_p2) }
   0x8   : > { %v436_v5 = vand.u32 (!%p350_p2), %v434_v4, %v425_v0  ;;  %3699 = vmatpush3.bf16.msra.mxu1 (!%p350_p2), %v4014_v44  ;;  %v4016_v46 = vld [vmem:[%s4939_s6 + $0x8] sm:$0xff] (!%p350_p2)   ;;  %v418_v56 = vld [vmem:[%s4938_s5] sm:$0x1f] (!%p350_p2) }
   0x9   : > { %3700 = vmatprep.subr.bf16.mxu1 (!%p350_p2), %v4161_v1  ;;  %v4271_v54 = vshrl.u32 (!%p350_p2), %v525_v51, 7 }
   0xa   : > { %3693 = vmatpush3.bf16.msra.mxu0 (!%p350_p2), %v436_v5  ;;  %v4017_v5 = vld [vmem:[%s4939_s6 + $0x20] sm:$0xff] (!%p350_p2)  }
   0xb   : > { %3706 = vmatprep.subr.bf16.mxu0 (!%p350_p2), %v4161_v1  ;;  %v4274_v55 = vsub.s32 (!%p350_p2), 0, %v4271_v54  ;;  %v4281_v60 = vsub.s32 (!%p350_p2), 1, %v4271_v54 }
   0xc   : > { %3701 = vmatpush3.bf16.msra.mxu1 (!%p350_p2), %v4016_v46 }
   0xd   : > { %s4946_s21 = smov (!%p395_p3, %s3408_s21), 3  ;;  %3714 = vmatprep.subr.bf16.mxu1 %v4161_v1  ;;  %v528_v59 = vrot.slane %v418_v56, %v4274_v55  ;;  %v534_v0 = vrot.slane %v418_v56, %v4281_v60 }
   0xe   : > { %s4241_s22 = sshll.u32 %s4946_s21, 3 }
   0xf   : > { %s398_s25 = scalar_lea.vmem %s4933_s0, %s4241_s22  ;;  %s4421_s26 = scalar_lea.vmem %s4934_s1, %s4241_s22 }
  0x10   : > { %v423_v6 = vld [vmem:[%s398_s25] sm:$0xff]  ;;  %v424_v7 = vld [vmem:[%s398_s25 + $0x8] sm:$0xff]  ;;  %s410_s19 = scalar_lea.vmem %s4944_s11, %s4241_s22 }
  0x11   : > { %v426_v8 = vpack.c.bf16 %v424_v7, %v423_v6  ;;  %v4018_v7 = vld [vmem:[%s4939_s6 + $0x28] sm:$0xff]  }
  0x13   : > { %3695 = vmatmul.mubr.msk.bf16.vlgmr.msra.gmra.mrb[0].mxu0 %vm427_vm3, %v426_v8  ;;  %v4310_v8 = vld [vmem:[%s4940_s7] sm:$0xff] }
  0x14   : > { %3710 = vmatprep.mubr.msk.bf16.mxu0 %vm4163_vm2, %v4161_v1  ;;  %3707 = vmatpush3.bf16.msra.mxu0 %v4013_v43  ;;  %v547_v44 = vrot.slane %v4310_v8, %v4274_v55 }
  0x15   : > { %3708 = vmatprep.subr.bf16.mxu0 %v4161_v1 }
  0x18   : > { %3709 = vmatpush3.bf16.msra.mxu0 %v4015_v45 }
  0x19   : > { %3722 = vmatprep.subr.bf16.mxu0 %v4161_v1 }
  0xe6   : > { %v472_v9 = vpop.f32.mrb[0].mxu0 }
  0xe7   : > { %v481_v10 = vmul.f32 0.044715, %v472_v9  ;;  %v3696_v11 = vpop.f32.mrb[1].mxu0  ;;  %v479_v24 = vmul.f32 0.5, %v472_v9 }
  0xe8   : > { %v475_v12 = vpop.f32.mrb[2].mxu0 }
  0xe9   : > { %v483_v13 = vmul.f32 %v481_v10, %v472_v9  ;;  %v482_v14 = vmul.f32 0.044715, %v475_v12  ;;  %v3697_v15 = vpop.f32.mrb[3].mxu0  ;;  %v480_v28 = vmul.f32 0.5, %v475_v12 }
  0xeb   : > { %v485_v16 = vmul.f32 %v483_v13, %v472_v9  ;;  %v484_v17 = vmul.f32 %v482_v14, %v475_v12 }
  0xed   : > { %v486_v18 = vmul.f32 %v484_v17, %v475_v12  ;;  %v487_v19 = vadd.f32 %v485_v16, %v472_v9  ;;  %v612_v9 = vrot.slane %v4310_v8, %v4281_v60  ;;  %v4322_v16 = vld [vmem:[%s4936_s3 + $0x8] sm:$0xff] }
  0xef   : > { %v489_v20 = vmul.f32 0.7978846, %v487_v19  ;;  %v488_v21 = vadd.f32 %v486_v18, %v475_v12  ;;  %v4317_v12 = vld [vmem:[%s4936_s3] sm:$0xff] }
  0xf1   : > { %4057 = vtanh.f32 %v489_v20  ;;  %v490_v22 = vmul.f32 0.7978846, %v488_v21 }
  0xf3   : > { %4059 = vtanh.f32 %v490_v22 }
  0xfb   : > { %v4058_v23 = vpop.eup %4057 }
  0xfc   : > { %v493_v25 = vadd.f32 1.0, %v4058_v23 }
  0xfd   : > { %v4060_v26 = vpop.eup %4059 }
  0xfe   : > { %v495_v27 = vmul.f32 %v493_v25, %v479_v24  ;;  %v494_v29 = vadd.f32 1.0, %v4060_v26  ;;  %v4329_v24 = vld [vmem:[%s4936_s3 + $0x10] sm:$0xff]  ;;  %v4334_v25 = vld [vmem:[%s4936_s3 + $0x18] sm:$0xff] }
 0x100   : > { %v498_v30 = vsel %vm497_vm4, %v495_v27, 0.0  ;;  %v496_v31 = vmul.f32 %v494_v29, %v480_v28  ;;  %v4339_v29 = vsub.s32 2, %v4271_v54 }
 0x101   : > { %499 = vadd.xlane.f32.xlu0 %v498_v30 }
 0x102   : > { %v501_v32 = vsel %vm497_vm4, %v496_v31, 0.0 }
 0x105   : > { %502 = vadd.xlane.f32.xlu0 %v501_v32 }
 0x18e   : > { %v500_v33 = vpop.xlane.xlu0 %499 }
 0x18f   : > { %v505_v34 = vmul.f32 0.03125, %v500_v33 }
 0x191   : > { %v507_v35 = vsub.f32 %v495_v27, %v505_v34 }
 0x192   : > { %v503_v36 = vpop.xlane.xlu0 %502 }
 0x193   : > { %v506_v37 = vmul.f32 0.03125, %v503_v36  ;;  %v509_v38 = vmul.f32 %v507_v35, %v507_v35 }
 0x195   : > { %v508_v39 = vsub.f32 %v496_v31, %v506_v37  ;;  %v511_v40 = vsel %vm497_vm4, %v509_v38, 0.0 }
 0x196   : > { %512 = vadd.xlane.f32.xlu1 %v511_v40  ;;  %v674_v40 = vrot.slane %v4310_v8, %v4339_v29 }
 0x197   : > { %v510_v41 = vmul.f32 %v508_v39, %v508_v39 }
 0x199   : > { %v514_v42 = vsel %vm497_vm4, %v510_v41, 0.0 }
 0x19a   : > { %515 = vadd.xlane.f32.xlu1 %v514_v42 }
 0x223   : > { %v513_v47 = vpop.xlane.xlu1 %512 }
 0x224   : > { %v517_v48 = vmul.f32 0.03125, %v513_v47 }
 0x226   : > { %v519_v49 = vadd.f32 1e-05, %v517_v48 }
 0x227   : > { %v516_v50 = vpop.xlane.xlu1 %515 }
 0x228   : > { %4061 = vrsqrt.f32 %v519_v49  ;;  %v518_v52 = vmul.f32 0.03125, %v516_v50 }
 0x22a   : > { %v520_v53 = vadd.f32 1e-05, %v518_v52 }
 0x22c   : > { %4063 = vrsqrt.f32 %v520_v53 }
 0x232   : > { %v4062_v57 = vpop.eup %4061 }
 0x233   : > { %v523_v58 = vmul.f32 %v4062_v57, %v507_v35 }
 0x235   : > { %v529_v63 = vmul.f32 %v528_v59, %v523_v58 }
 0x236   : > { %v4064_v61 = vpop.eup %4063 }
 0x237   : > { %v524_v62 = vmul.f32 %v4064_v61, %v508_v39  ;;  %v4284_v3 = vadd.f32 %v534_v0, %v529_v63 }
 0x239   : > { %v530_v2 = vmul.f32 %v528_v59, %v524_v62 }
 0x23b   : > { %v4286_v4 = vadd.f32 %v534_v0, %v530_v2 }
 0x23d   : > { %v543_v6 = vpack.c.bf16 %v4286_v4, %v4284_v3 }
 0x23f   : > { %3703 = vmatmul.mubr.msk.bf16.vlgmr.msra.gmra.mrb[0].mxu1 %vm497_vm4, %v543_v6  ;;  %3711 = vmatmul.mubr.msk.bf16.vlgmr.msra.gmra.mrb[4].mxu0 %vm497_vm4, %v543_v6 }
 0x240   : > { %3715 = vmatpush3.bf16.msra.mxu1 %v4017_v5  ;;  %3718 = vmatprep.mubr.msk.bf16.mxu1 %vm4163_vm2, %v4161_v1 }
 0x241   : > { %3716 = vmatprep.subr.bf16.mxu1 %v4161_v1  ;;  %3726 = vmatprep.mubr.msk.bf16.mxu0 %vm4163_vm2, %v4161_v1 }
 0x244   : > { %3717 = vmatpush3.bf16.msra.mxu1 %v4018_v7  ;;  %v4378_v7 = vld [vmem:[%s4935_s2] sm:$0xff] }
 0x245   : > { %3730 = vmatprep.subr.bf16.mxu1 %v4161_v1 }
 0x247   : > { %3719 = vmatmul.mubr.msk.bf16.vlgmr.msra.gmra.mrb[4].mxu1 %vm497_vm4, %v543_v6 }
 0x248   : > { %3734 = vmatprep.mubr.msk.bf16.mxu1 %vm4163_vm2, %v4161_v1 }
 0x312   : > { %v597_v10 = vpop.f32.mrb[0].mxu1  ;;  %v659_v11 = vpop.f32.mrb[4].mxu0 }
 0x313   : > { %v660_v13 = vadd.f32 %v659_v11, %v612_v9  ;;  %v3704_v14 = vpop.f32.mrb[1].mxu1  ;;  %v3712_v15 = vpop.f32.mrb[5].mxu0  ;;  %v598_v49 = vadd.f32 %v597_v10, %v547_v44 }
 0x314   : > { %v600_v17 = vpop.f32.mrb[2].mxu1  ;;  %v662_v18 = vpop.f32.mrb[6].mxu0 }
 0x315   : > { %v663_v19 = vadd.f32 %v662_v18, %v612_v9  ;;  %v3705_v20 = vpop.f32.mrb[3].mxu1  ;;  %v3713_v21 = vpop.f32.mrb[7].mxu0  ;;  %v728_v22 = vmul.f32 %v660_v13, %v4317_v12  ;;  %v729_v23 = vmul.f32 %v660_v13, %v4322_v16  ;;  %v730_v33 = vmul.f32 %v660_v13, %v4329_v24 }
 0x316   : > { %v731_v34 = vmul.f32 %v660_v13, %v4334_v25  ;;  %v601_v50 = vadd.f32 %v600_v17, %v547_v44  ;;  %v752_v57 = vpack.c.bf16 %v598_v49, %v598_v49 }
 0x317   : > { %v732_v26 = vmul.f32 %v663_v19, %v4317_v12  ;;  %v733_v27 = vmul.f32 %v663_v19, %v4322_v16  ;;  %v736_v28 = vpack.c.bf16 %v729_v23, %v728_v22  ;;  %v734_v37 = vmul.f32 %v663_v19, %v4329_v24 }
 0x318   : > { %v735_v38 = vmul.f32 %v663_v19, %v4334_v25  ;;  %v737_v42 = vpack.c.bf16 %v731_v34, %v730_v33  ;;  %v753_v58 = vpack.c.bf16 %v601_v50, %v601_v50 }
 0x319   : > { %v738_v30 = vpack.c.bf16 %v733_v27, %v732_v26  ;;  %v758_v32 = vsel %vm497_vm4, %v736_v28, 0 }
 0x31a   : > { %v721_v31 = vpop.f32.mrb[4].mxu1  ;;  %3723 = vmatpush3.bf16.xpose.msra.mxu0 %v758_v32  ;;  %v739_v43 = vpack.c.bf16 %v735_v38, %v734_v37  ;;  %v761_v47 = vsel %vm497_vm4, %v737_v42, 0 }
 0x31b   : > { %v3720_v35 = vpop.f32.mrb[5].mxu1  ;;  %v807_v36 = vsel %vm497_vm4, %v738_v30, 0  ;;  %3724 = vmatprep.subr.bf16.mxu0 %v4161_v1  ;;  %v722_v45 = vadd.f32 %v721_v31, %v674_v40 }
 0x31c   : > { %v724_v39 = vpop.f32.mrb[6].mxu1  ;;  %3731 = vmatpush3.bf16.xpose.msra.mxu1 %v807_v36  ;;  %v810_v48 = vsel %vm497_vm4, %v739_v43, 0 }
 0x31d   : > { %v3721_v41 = vpop.f32.mrb[7].mxu1  ;;  %3732 = vmatprep.subr.bf16.mxu1 %v4161_v1  ;;  %v725_v46 = vadd.f32 %v724_v39, %v674_v40  ;;  %v740_v51 = vmul.f32 %v722_v45, %v4317_v12  ;;  %v741_v52 = vmul.f32 %v722_v45, %v4322_v16  ;;  %v742_v59 = vmul.f32 %v722_v45, %v4329_v24 }
 0x31e   : > { %v743_v61 = vmul.f32 %v722_v45, %v4334_v25 }
 0x31f   : > { %v744_v53 = vmul.f32 %v725_v46, %v4317_v12  ;;  %v745_v56 = vmul.f32 %v725_v46, %v4322_v16  ;;  %v748_v62 = vpack.c.bf16 %v741_v52, %v740_v51  ;;  %v746_v63 = vmul.f32 %v725_v46, %v4329_v24 }
 0x320   : > { %v747_v0 = vmul.f32 %v725_v46, %v4334_v25  ;;  %v749_v5 = vpack.c.bf16 %v743_v61, %v742_v59 }
 0x321   : > { %v750_v2 = vpack.c.bf16 %v745_v56, %v744_v53 }
 0x322   : > { %3725 = vmatpush3.bf16.xpose.msra.mxu0 %v761_v47  ;;  %v751_v6 = vpack.c.bf16 %v747_v0, %v746_v63 }
 0x323   : > { %3738 = vmatprep.subr.bf16.mxu0 %v4161_v1 }
 0x324   : > { %3733 = vmatpush3.bf16.xpose.msra.mxu1 %v810_v48 }
 0x325   : > { %3746 = vmatprep.subr.bf16.mxu1 %v4161_v1 }
 0x329   : > { %3727 = vmatmul.mubr.msk.bf16.vlgmr.msra.gmra.mrb[8].mxu0 %vm497_vm4, %v752_v57 }
 0x32a   : > { %3739 = vmatpush3.bf16.msra.mxu0 %v748_v62  ;;  %3742 = vmatprep.mubr.msk.bf16.mxu0 %vm4163_vm2, %v4161_v1 }
 0x32b   : > { %3735 = vmatmul.mubr.msk.bf16.vlgmr.msra.gmra.mrb[8].mxu1 %vm497_vm4, %v753_v58  ;;  %3740 = vmatprep.subr.bf16.mxu0 %v4161_v1 }
 0x32c   : > { %3747 = vmatpush3.bf16.msra.mxu1 %v750_v2  ;;  %3750 = vmatprep.mubr.msk.bf16.mxu1 %vm4163_vm2, %v4161_v1 }
 0x32d   : > { %3748 = vmatprep.subr.bf16.mxu1 %v4161_v1 }
 0x32e   : > { %3741 = vmatpush3.bf16.msra.mxu0 %v749_v5 }
 0x32f   : > { %3754 = vmatprep.subr.bf16.mxu0 %v4161_v1 }
 0x330   : > { %3749 = vmatpush3.bf16.msra.mxu1 %v751_v6  ;;  %v4019_v6 = vld [vmem:[%s4939_s6 + $0x30] sm:$0xff]  }
 0x331   : > { %3762 = vmatprep.subr.bf16.mxu1 %v4161_v1 }
 0x3fc   : > { %v797_v9 = vpop.f32.mrb[8].mxu0 }
 0x3fd   : > { %v852_v10 = vmul.f32 0.35355338, %v797_v9  ;;  %v3728_v11 = vpop.f32.mrb[9].mxu0 }
 0x3fe   : > { %v846_v13 = vpop.f32.mrb[8].mxu1  ;;  %v800_v14 = vpop.f32.mrb[10].mxu0  ;;  %v4020_v11 = vld [vmem:[%s4939_s6 + $0x38] sm:$0xff]  }
 0x3ff   : > { %v853_v15 = vmul.f32 0.35355338, %v846_v13  ;;  %v3736_v17 = vpop.f32.mrb[9].mxu1  ;;  %v854_v18 = vadd.f32 %v852_v10, %v4378_v7  ;;  %v3729_v19 = vpop.f32.mrb[11].mxu0 }
 0x400   : > { %v849_v20 = vpop.f32.mrb[10].mxu1 }
 0x401   : > { %v855_v21 = vadd.f32 %v853_v15, %v4378_v7  ;;  %v3737_v22 = vpop.f32.mrb[11].mxu1  ;;  %v856_v23 = vsel %vm497_vm4, %v854_v18, -inf }
 0x402   : > { %v857_v26 = vrot.slane %v856_v23, 4 }
 0x403   : > { %v863_v27 = vsel %vm497_vm4, %v855_v21, -inf }
 0x404   : > { %v864_v28 = vrot.slane %v863_v27, 4  ;;  %v858_v30 = vmax.f32 %v856_v23, %v857_v26  ;;  %v4404_v23 = vsub.s32 3, %v4271_v54 }
 0x406   : > { %v865_v31 = vmax.f32 %v863_v27, %v864_v28  ;;  %v859_v32 = vrot.slane %v858_v30, 2  ;;  %v991_v26 = vrot.slane %v4310_v8, %v4404_v23 }
 0x408   : > { %v866_v33 = vrot.slane %v865_v31, 2  ;;  %v860_v34 = vmax.f32 %v858_v30, %v859_v32 }
 0x40a   : > { %v867_v35 = vmax.f32 %v865_v31, %v866_v33  ;;  %v861_v36 = vrot.slane %v860_v34, 1 }
 0x40c   : > { %v868_v37 = vrot.slane %v867_v35, 1  ;;  %v862_v38 = vmax.f32 %v860_v34, %v861_v36 }
 0x40e   : > { %v869_v39 = vmax.f32 %v867_v35, %v868_v37  ;;  %v870_v40 = vsub.f32 %v854_v18, %v862_v38 }
 0x410   : > { %v871_v41 = vsub.f32 %v855_v21, %v869_v39  ;;  %v872_v42 = vmul.f32 1.442695, %v870_v40 }
 0x412   : > { %v874_v43 = vmul.f32 1.442695, %v871_v41  ;;  %4065 = vpow2.f32 %v872_v42 }
 0x414   : > { %4067 = vpow2.f32 %v874_v43 }
 0x41c   : > { %v4066_v44 = vpop.eup %4065 }
 0x41d   : > { %v876_v46 = vsel %vm497_vm4, %v4066_v44, 0.0 }
 0x41e   : > { %v4068_v45 = vpop.eup %4067  ;;  %v877_v47 = vrot.slane %v876_v46, 4 }
 0x41f   : > { %v883_v48 = vsel %vm497_vm4, %v4068_v45, 0.0 }
 0x420   : > { %v884_v49 = vrot.slane %v883_v48, 4  ;;  %v878_v50 = vadd.f32 %v877_v47, %v876_v46  ;;  %v4022_v47 = vld [vmem:[%s4939_s6 + $0x48] sm:$0xff]  }
 0x422   : > { %v885_v51 = vadd.f32 %v884_v49, %v883_v48  ;;  %v879_v52 = vrot.slane %v878_v50, 2  ;;  %v4428_v48 = vld [vmem:[%s4421_s26] sm:$0xff]  ;;  %v4431_v49 = vld [vmem:[%s4421_s26 + $0x8] sm:$0xff] }
 0x424   : > { %v886_v53 = vrot.slane %v885_v51, 2  ;;  %v880_v56 = vadd.f32 %v879_v52, %v878_v50  ;;  %v4435_v50 = vpack.c.bf16 %v4431_v49, %v4428_v48  ;;  %v4024_v52 = vld [vmem:[%s4939_s6 + $0x60] sm:$0xff]  }
 0x426   : > { %v887_v57 = vadd.f32 %v886_v53, %v885_v51  ;;  %v881_v58 = vrot.slane %v880_v56, 1  ;;  %v4023_v51 = vld [vmem:[%s4939_s6 + $0x50] sm:$0xff]   ;;  %v4025_v53 = vld [vmem:[%s4939_s6 + $0x58] sm:$0xff]  }
 0x428   : > { %v888_v59 = vrot.slane %v887_v57, 1  ;;  %v882_v61 = vadd.f32 %v881_v58, %v880_v56  ;;  %v4026_v56 = vld [vmem:[%s4939_s6 + $0x68] sm:$0xff]  }
 0x42a   : > { %v889_v62 = vadd.f32 %v888_v59, %v887_v57  ;;  %4069 = vrcp.f32 %v882_v61 }
 0x42c   : > { %4071 = vrcp.f32 %v889_v62 }
 0x434   : > { %v4070_v63 = vpop.eup %4069 }
 0x435   : > { %v891_v2 = vmul.f32 %v4070_v63, %v4066_v44 }
 0x436   : > { %v4072_v0 = vpop.eup %4071 }
 0x437   : > { %v893_v5 = vmul.f32 %v4072_v0, %v4068_v45  ;;  %v894_v9 = vpack.c.bf16 %v891_v2, %v891_v2  ;;  %v4459_v0 = vsub.s32 4, %v4271_v54 }
 0x439   : > { %v895_v10 = vpack.c.bf16 %v893_v5, %v893_v5  ;;  %3743 = vmatmul.mubr.msk.bf16.vlgmr.msra.gmra.mrb[12].mxu0 %vm497_vm4, %v894_v9  ;;  %v1079_v2 = vrot.slane %v4310_v8, %v4459_v0  ;;  %v4464_v5 = vsub.s32 5, %v4271_v54 }
 0x43a   : > { %3755 = vmatpush3.bf16.msra.mxu0 %v4019_v6  ;;  %3758 = vmatprep.mubr.msk.bf16.mxu0 %vm4163_vm2, %v4161_v1 }
 0x43b   : > { %3751 = vmatmul.mubr.msk.bf16.vlgmr.msra.gmra.mrb[12].mxu1 %vm497_vm4, %v895_v10  ;;  %3756 = vmatprep.subr.bf16.mxu0 %v4161_v1 }
 0x43c   : > { %3766 = vmatprep.mubr.msk.bf16.mxu1 %vm4163_vm2, %v4161_v1 }
 0x43e   : > { %3757 = vmatpush3.bf16.msra.mxu0 %v4020_v11 }
 0x43f   : > { %3770 = vmatprep.subr.bf16.mxu0 %v4161_v1 }
 0x50c   : > { %v933_v13 = vpop.f32.mrb[12].mxu0 }
 0x50d   : > { %v3744_v14 = vpop.f32.mrb[13].mxu0 }
 0x50e   : > { %v976_v15 = vpop.f32.mrb[12].mxu1  ;;  %v936_v17 = vpop.f32.mrb[14].mxu0  ;;  %v1085_v14 = vrot.slane %v4310_v8, %v4464_v5 }
 0x50f   : > { %v987_v18 = vpack.c.bf16 %v976_v15, %v933_v13  ;;  %v3752_v19 = vpop.f32.mrb[13].mxu1  ;;  %v3745_v20 = vpop.f32.mrb[15].mxu0 }
 0x510   : > { %v979_v21 = vpop.f32.mrb[14].mxu1 }
 0x511   : > { %v3753_v22 = vpop.f32.mrb[15].mxu1  ;;  %3759 = vmatmul.mubr.msk.bf16.vlgmr.msra.gmra.mrb[16].mxu0 %vm497_vm4, %v987_v18 }
 0x512   : > { %3774 = vmatprep.mubr.msk.bf16.mxu0 %vm4163_vm2, %v4161_v1  ;;  %3771 = vmatpush3.bf16.msra.mxu0 %v4023_v51 }
 0x513   : > { %3772 = vmatprep.subr.bf16.mxu0 %v4161_v1 }
 0x516   : > { %3773 = vmatpush3.bf16.msra.mxu0 %v4025_v53 }
 0x517   : > { %3786 = vmatprep.subr.bf16.mxu0 %v4161_v1 }
 0x5e4   : > { %v1041_v27 = vpop.f32.mrb[16].mxu0 }
 0x5e5   : > { %v1042_v28 = vadd.f32 %v1041_v27, %v991_v26  ;;  %v3760_v30 = vpop.f32.mrb[17].mxu0  ;;  %v4475_v27 = vsub.s32 7, %v4271_v54 }
 0x5e6   : > { %v1044_v31 = vpop.f32.mrb[18].mxu0 }
 0x5e7   : > { %v1045_v32 = vadd.f32 %v1044_v31, %v991_v26  ;;  %v3761_v33 = vpop.f32.mrb[19].mxu0  ;;  %v1048_v34 = vadd.f32 %v1042_v28, %v4284_v3  ;;  %v1163_v28 = vrot.slane %v4310_v8, %v4475_v27 }
 0x5e9   : > { %v1050_v35 = vsel %vm497_vm4, %v1048_v34, 0.0  ;;  %v1049_v36 = vadd.f32 %v1045_v32, %v4286_v4  ;;  %v4021_v4 = vld [vmem:[%s4939_s6 + $0x40] sm:$0xff]  }
 0x5ea   : > { %1051 = vadd.xlane.f32.xlu0 %v1050_v35  ;;  %3763 = vmatpush3.bf16.msra.mxu1 %v4021_v4 }
 0x5eb   : > { %v1053_v37 = vsel %vm497_vm4, %v1049_v36, 0.0  ;;  %3764 = vmatprep.subr.bf16.mxu1 %v4161_v1 }
 0x5ec   : > { %1054 = vadd.xlane.f32.xlu1 %v1053_v37 }
 0x5ee   : > { %3765 = vmatpush3.bf16.msra.mxu1 %v4022_v47 }
 0x5ef   : > { %3778 = vmatprep.subr.bf16.mxu1 %v4161_v1 }
 0x5f1   : > { %3767 = vmatmul.mubr.msk.bf16.vlgmr.msra.gmra.mrb[16].mxu1 %vm497_vm4, %v4435_v50 }
 0x5f2   : > { %3779 = vmatpush3.bf16.msra.mxu1 %v4024_v52  ;;  %3782 = vmatprep.mubr.msk.bf16.mxu1 %vm4163_vm2, %v4161_v1 }
 0x5f3   : > { %3780 = vmatprep.subr.bf16.mxu1 %v4161_v1 }
 0x5f6   : > { %3781 = vmatpush3.bf16.msra.mxu1 %v4026_v56 }
 0x5f7   : > { %3794 = vmatprep.subr.bf16.mxu1 %v4161_v1 }
 0x677   : > { %v1052_v38 = vpop.xlane.xlu0 %1051 }
 0x678   : > { %v1056_v39 = vmul.f32 0.03125, %v1052_v38 }
 0x679   : > { %v1055_v40 = vpop.xlane.xlu1 %1054 }
 0x67a   : > { %v1058_v41 = vsub.f32 %v1048_v34, %v1056_v39  ;;  %v1057_v42 = vmul.f32 0.03125, %v1055_v40 }
 0x67c   : > { %v1059_v43 = vsub.f32 %v1049_v36, %v1057_v42  ;;  %v1060_v44 = vmul.f32 %v1058_v41, %v1058_v41 }
 0x67e   : > { %v1062_v45 = vsel %vm497_vm4, %v1060_v44, 0.0  ;;  %v1061_v46 = vmul.f32 %v1059_v43, %v1059_v43 }
 0x67f   : > { %1063 = vadd.xlane.f32.xlu0 %v1062_v45  ;;  %v4484_v45 = vsub.s32 6, %v4271_v54 }
 0x680   : > { %v1065_v3 = vsel %vm497_vm4, %v1061_v46, 0.0  ;;  %v4489_v46 = vld [vmem:[%s4940_s7 + $0x8] sm:$0xff] }
 0x681   : > { %1066 = vadd.xlane.f32.xlu1 %v1065_v3  ;;  %v1228_v56 = vrot.slane %v4489_v46, %v4274_v55 }
 0x6c4   : > { %v1147_v20 = vpop.f32.mrb[16].mxu1 }
 0x6c5   : > { %v3768_v21 = vpop.f32.mrb[17].mxu1 }
 0x6c6   : > { %v1150_v22 = vpop.f32.mrb[18].mxu1 }
 0x6c7   : > { %v3769_v26 = vpop.f32.mrb[19].mxu1 }
 0x70c   : > { %v1064_v57 = vpop.xlane.xlu0 %1063 }
 0x70d   : > { %v1068_v58 = vmul.f32 0.03125, %v1064_v57  ;;  %v1097_v57 = vrot.slane %v4310_v8, %v4484_v45 }
 0x70e   : > { %v1067_v59 = vpop.xlane.xlu1 %1066 }
 0x70f   : > { %v1070_v61 = vadd.f32 1e-05, %v1068_v58  ;;  %v1069_v62 = vmul.f32 0.03125, %v1067_v59 }
 0x711   : > { %4073 = vrsqrt.f32 %v1070_v61  ;;  %v1071_v63 = vadd.f32 1e-05, %v1069_v62  ;;  %v1148_v62 = vadd.f32 %v1147_v20, %v1097_v57 }
 0x713   : > { %4075 = vrsqrt.f32 %v1071_v63  ;;  %v1306_v8 = vpack.c.bf16 %v1148_v62, %v1148_v62 }
 0x71b   : > { %v4074_v6 = vpop.eup %4073 }
 0x71c   : > { %v1074_v9 = vmul.f32 %v4074_v6, %v1058_v41 }
 0x71d   : > { %v4076_v10 = vpop.eup %4075 }
 0x71e   : > { %v1080_v11 = vmul.f32 %v1079_v2, %v1074_v9  ;;  %v1075_v13 = vmul.f32 %v4076_v10, %v1059_v43 }
 0x720   : > { %v1081_v15 = vmul.f32 %v1079_v2, %v1075_v13  ;;  %v1086_v17 = vadd.f32 %v1085_v14, %v1080_v11  ;;  %v1151_v11 = vadd.f32 %v1150_v22, %v1097_v57 }
 0x722   : > { %v1087_v18 = vadd.f32 %v1085_v14, %v1081_v15 }
 0x724   : > { %v1159_v19 = vpack.c.bf16 %v1087_v18, %v1086_v17 }
 0x726   : > { %3775 = vmatmul.mubr.msk.bf16.vlgmr.msra.gmra.mrb[20].mxu0 %vm497_vm4, %v1159_v19  ;;  %3783 = vmatmul.mubr.msk.bf16.vlgmr.msra.gmra.mrb[20].mxu1 %vm497_vm4, %v1159_v19  ;;  %v1307_v19 = vpack.c.bf16 %v1151_v11, %v1151_v11 }
 0x727   : > { %3790 = vmatprep.mubr.msk.bf16.mxu0 %vm4163_vm2, %v4161_v1  ;;  %3798 = vmatprep.mubr.msk.bf16.mxu1 %vm4163_vm2, %v4161_v1 }
 0x7f9   : > { %v1213_v30 = vpop.f32.mrb[20].mxu0  ;;  %v1275_v31 = vpop.f32.mrb[20].mxu1 }
 0x7fa   : > { %v1214_v32 = vadd.f32 %v1213_v30, %v1163_v28  ;;  %v3776_v33 = vpop.f32.mrb[21].mxu0  ;;  %v3784_v34 = vpop.f32.mrb[21].mxu1  ;;  %v1276_v61 = vadd.f32 %v1275_v31, %v1228_v56 }
 0x7fb   : > { %v1216_v35 = vpop.f32.mrb[22].mxu0  ;;  %v1278_v36 = vpop.f32.mrb[22].mxu1 }
 0x7fc   : > { %v3777_v37 = vpop.f32.mrb[23].mxu0  ;;  %v3785_v38 = vpop.f32.mrb[23].mxu1  ;;  %v1217_v39 = vadd.f32 %v1216_v35, %v1163_v28  ;;  %v1282_v40 = vmul.f32 %v1214_v32, %v4317_v12  ;;  %v1283_v41 = vmul.f32 %v1214_v32, %v4322_v16  ;;  %v1284_v47 = vmul.f32 %v1214_v32, %v4329_v24 }
 0x7fd   : > { %v1285_v51 = vmul.f32 %v1214_v32, %v4334_v25  ;;  %v1279_v2 = vadd.f32 %v1278_v36, %v1228_v56  ;;  %v1294_v9 = vmul.f32 %v1276_v61, %v4317_v12  ;;  %v1295_v10 = vmul.f32 %v1276_v61, %v4322_v16 }
 0x7fe   : > { %v1290_v42 = vpack.c.bf16 %v1283_v41, %v1282_v40  ;;  %v1286_v43 = vmul.f32 %v1217_v39, %v4317_v12  ;;  %v1287_v44 = vmul.f32 %v1217_v39, %v4322_v16  ;;  %v1288_v54 = vmul.f32 %v1217_v39, %v4329_v24 }
 0x7ff   : > { %v1289_v53 = vmul.f32 %v1217_v39, %v4334_v25  ;;  %v1291_v58 = vpack.c.bf16 %v1285_v51, %v1284_v47  ;;  %v1298_v13 = vmul.f32 %v1279_v2, %v4317_v12  ;;  %v1299_v14 = vmul.f32 %v1279_v2, %v4322_v16 }
 0x800   : > { %v1312_v3 = vsel %vm497_vm4, %v1290_v42, 0  ;;  %v1292_v4 = vpack.c.bf16 %v1287_v44, %v1286_v43  ;;  %v1296_v15 = vmul.f32 %v1276_v61, %v4329_v24  ;;  %v1297_v17 = vmul.f32 %v1276_v61, %v4334_v25 }
 0x801   : > { %3787 = vmatpush3.bf16.xpose.msra.mxu0 %v1312_v3  ;;  %v1293_v59 = vpack.c.bf16 %v1289_v53, %v1288_v54  ;;  %v1315_v63 = vsel %vm497_vm4, %v1291_v58, 0  ;;  %v1302_v18 = vpack.c.bf16 %v1295_v10, %v1294_v9  ;;  %v1300_v20 = vmul.f32 %v1279_v2, %v4329_v24 }
 0x802   : > { %v1361_v52 = vsel %vm497_vm4, %v1292_v4, 0  ;;  %3788 = vmatprep.subr.bf16.mxu0 %v4161_v1  ;;  %v1301_v21 = vmul.f32 %v1279_v2, %v4334_v25  ;;  %v1304_v22 = vpack.c.bf16 %v1299_v14, %v1298_v13  ;;  %v1303_v12 = vpack.c.bf16 %v1297_v17, %v1296_v15 }
 0x803   : > { %3795 = vmatpush3.bf16.xpose.msra.mxu1 %v1361_v52  ;;  %v1364_v6 = vsel %vm497_vm4, %v1293_v59, 0 }
 0x804   : > { %3796 = vmatprep.subr.bf16.mxu1 %v4161_v1  ;;  %v1305_v16 = vpack.c.bf16 %v1301_v21, %v1300_v20 }
 0x809   : > { %3789 = vmatpush3.bf16.xpose.msra.mxu0 %v1315_v63 }
 0x80a   : > { %3802 = vmatprep.subr.bf16.mxu0 %v4161_v1 }
 0x80b   : > { %3797 = vmatpush3.bf16.xpose.msra.mxu1 %v1364_v6 }
 0x80c   : > { %3810 = vmatprep.subr.bf16.mxu1 %v4161_v1 }
 0x810   : > { %3791 = vmatmul.mubr.msk.bf16.vlgmr.msra.gmra.mrb[24].mxu0 %vm497_vm4, %v1306_v8 }
 0x811   : > { %3803 = vmatpush3.bf16.msra.mxu0 %v1302_v18  ;;  %3806 = vmatprep.mubr.msk.bf16.mxu0 %vm4163_vm2, %v4161_v1 }
 0x812   : > { %3799 = vmatmul.mubr.msk.bf16.vlgmr.msra.gmra.mrb[24].mxu1 %vm497_vm4, %v1307_v19  ;;  %3804 = vmatprep.subr.bf16.mxu0 %v4161_v1 }
 0x813   : > { %3811 = vmatpush3.bf16.msra.mxu1 %v1304_v22  ;;  %3814 = vmatprep.mubr.msk.bf16.mxu1 %vm4163_vm2, %v4161_v1 }
 0x814   : > { %3812 = vmatprep.subr.bf16.mxu1 %v4161_v1 }
 0x815   : > { %3805 = vmatpush3.bf16.msra.mxu0 %v1303_v12  ;;  %v4027_v12 = vld [vmem:[%s4939_s6 + $0x70] sm:$0xff]  }
 0x816   : > { %3818 = vmatprep.subr.bf16.mxu0 %v4161_v1 }
 0x817   : > { %3813 = vmatpush3.bf16.msra.mxu1 %v1305_v16 }
 0x818   : > { %3826 = vmatprep.subr.bf16.mxu1 %v4161_v1 }
 0x8e3   : > { %v1351_v24 = vpop.f32.mrb[24].mxu0 }
 0x8e4   : > { %v1406_v25 = vmul.f32 0.35355338, %v1351_v24  ;;  %v3792_v26 = vpop.f32.mrb[25].mxu0 }
 0x8e5   : > { %v1354_v28 = vpop.f32.mrb[26].mxu0  ;;  %v1400_v30 = vpop.f32.mrb[24].mxu1  ;;  %v4028_v26 = vld [vmem:[%s4939_s6 + $0x78] sm:$0xff]  }
 0x8e6   : > { %v1408_v31 = vadd.f32 %v1406_v25, %v4378_v7  ;;  %v1407_v32 = vmul.f32 0.35355338, %v1400_v30  ;;  %v3793_v33 = vpop.f32.mrb[27].mxu0  ;;  %v3800_v34 = vpop.f32.mrb[25].mxu1 }
 0x8e7   : > { %v1403_v35 = vpop.f32.mrb[26].mxu1 }
 0x8e8   : > { %v1410_v36 = vsel %vm497_vm4, %v1408_v31, -inf  ;;  %v1409_v37 = vadd.f32 %v1407_v32, %v4378_v7  ;;  %v3801_v38 = vpop.f32.mrb[27].mxu1 }
 0x8e9   : > { %v1411_v39 = vrot.slane %v1410_v36, 4  ;;  %v1545_v38 = vrot.slane %v4489_v46, %v4281_v60 }
 0x8ea   : > { %v1417_v40 = vsel %vm497_vm4, %v1409_v37, -inf }
 0x8eb   : > { %v1412_v41 = vmax.f32 %v1410_v36, %v1411_v39  ;;  %v1418_v42 = vrot.slane %v1417_v40, 4 }
 0x8ed   : > { %v1413_v43 = vrot.slane %v1412_v41, 2  ;;  %v1419_v44 = vmax.f32 %v1417_v40, %v1418_v42 }
 0x8ef   : > { %v1414_v3 = vmax.f32 %v1412_v41, %v1413_v43  ;;  %v1420_v4 = vrot.slane %v1419_v44, 2 }
 0x8f1   : > { %v1415_v47 = vrot.slane %v1414_v3, 1  ;;  %v1421_v51 = vmax.f32 %v1419_v44, %v1420_v4 }
 0x8f3   : > { %v1416_v52 = vmax.f32 %v1414_v3, %v1415_v47  ;;  %v1422_v54 = vrot.slane %v1421_v51, 1 }
 0x8f5   : > { %v1424_v53 = vsub.f32 %v1408_v31, %v1416_v52  ;;  %v1423_v56 = vmax.f32 %v1421_v51, %v1422_v54 }
 0x8f7   : > { %v1426_v57 = vmul.f32 1.442695, %v1424_v53  ;;  %v1425_v58 = vsub.f32 %v1409_v37, %v1423_v56 }
 0x8f9   : > { %4077 = vpow2.f32 %v1426_v57  ;;  %v1428_v7 = vmul.f32 1.442695, %v1425_v58 }
 0x8fb   : > { %4079 = vpow2.f32 %v1428_v7 }
 0x903   : > { %v4078_v59 = vpop.eup %4077 }
 0x904   : > { %v1430_v61 = vsel %vm497_vm4, %v4078_v59, 0.0 }
 0x905   : > { %v4080_v62 = vpop.eup %4079  ;;  %v1431_v63 = vrot.slane %v1430_v61, 4 }
 0x906   : > { %v1437_v2 = vsel %vm497_vm4, %v4080_v62, 0.0 }
 0x907   : > { %v1432_v6 = vadd.f32 %v1431_v63, %v1430_v61  ;;  %v1438_v9 = vrot.slane %v1437_v2, 4 }
 0x909   : > { %v1433_v10 = vrot.slane %v1432_v6, 2  ;;  %v1439_v8 = vadd.f32 %v1438_v9, %v1437_v2 }
 0x90b   : > { %v1434_v11 = vadd.f32 %v1433_v10, %v1432_v6  ;;  %v1440_v13 = vrot.slane %v1439_v8, 2 }
 0x90d   : > { %v1435_v14 = vrot.slane %v1434_v11, 1  ;;  %v1441_v15 = vadd.f32 %v1440_v13, %v1439_v8 }
 0x90f   : > { %v1436_v17 = vadd.f32 %v1435_v14, %v1434_v11  ;;  %v1442_v18 = vrot.slane %v1441_v15, 1  ;;  %v1633_v11 = vrot.slane %v4489_v46, %v4339_v29 }
 0x911   : > { %4081 = vrcp.f32 %v1436_v17  ;;  %v1443_v19 = vadd.f32 %v1442_v18, %v1441_v15 }
 0x913   : > { %4083 = vrcp.f32 %v1443_v19  ;;  %v1639_v19 = vrot.slane %v4489_v46, %v4404_v23 }
 0x91b   : > { %v4082_v20 = vpop.eup %4081 }
 0x91c   : > { %v1445_v21 = vmul.f32 %v4082_v20, %v4078_v59 }
 0x91d   : > { %v4084_v22 = vpop.eup %4083 }
 0x91e   : > { %v1448_v16 = vpack.c.bf16 %v1445_v21, %v1445_v21  ;;  %v1447_v24 = vmul.f32 %v4084_v22, %v4080_v62  ;;  %v4030_v62 = vld [vmem:[%s4939_s6 + $0x88] sm:$0xff]  }
 0x920   : > { %3807 = vmatmul.mubr.msk.bf16.vlgmr.msra.gmra.mrb[28].mxu0 %vm497_vm4, %v1448_v16  ;;  %v1449_v25 = vpack.c.bf16 %v1447_v24, %v1447_v24  ;;  %v4031_v16 = vld [vmem:[%s4939_s6 + $0x90] sm:$0xff]   ;;  %v4032_v24 = vld [vmem:[%s4939_s6 + $0x98] sm:$0xff]  }
 0x921   : > { %3819 = vmatpush3.bf16.msra.mxu0 %v4027_v12  ;;  %3822 = vmatprep.mubr.msk.bf16.mxu0 %vm4163_vm2, %v4161_v1 }
 0x922   : > { %3815 = vmatmul.mubr.msk.bf16.vlgmr.msra.gmra.mrb[28].mxu1 %vm497_vm4, %v1449_v25  ;;  %3820 = vmatprep.subr.bf16.mxu0 %v4161_v1  ;;  %v1651_v25 = vrot.slane %v4489_v46, %v4459_v0 }
 0x923   : > { %3830 = vmatprep.mubr.msk.bf16.mxu1 %vm4163_vm2, %v4161_v1 }
 0x925   : > { %3821 = vmatpush3.bf16.msra.mxu0 %v4028_v26 }
 0x926   : > { %3834 = vmatprep.subr.bf16.mxu0 %v4161_v1 }
 0x9f3   : > { %v1487_v28 = vpop.f32.mrb[28].mxu0 }
 0x9f4   : > { %v3808_v30 = vpop.f32.mrb[29].mxu0 }
 0x9f5   : > { %v1490_v31 = vpop.f32.mrb[30].mxu0  ;;  %v1530_v32 = vpop.f32.mrb[28].mxu1 }
 0x9f6   : > { %v1541_v33 = vpack.c.bf16 %v1530_v32, %v1487_v28  ;;  %v3809_v34 = vpop.f32.mrb[31].mxu0  ;;  %v3816_v35 = vpop.f32.mrb[29].mxu1 }
 0x9f7   : > { %v1533_v36 = vpop.f32.mrb[30].mxu1 }
 0x9f8   : > { %v3817_v37 = vpop.f32.mrb[31].mxu1  ;;  %3823 = vmatmul.mubr.msk.bf16.vlgmr.msra.gmra.mrb[32].mxu0 %vm497_vm4, %v1541_v33 }
 0x9f9   : > { %3838 = vmatprep.mubr.msk.bf16.mxu0 %vm4163_vm2, %v4161_v1  ;;  %3835 = vmatpush3.bf16.msra.mxu0 %v4031_v16 }
 0x9fa   : > { %3836 = vmatprep.subr.bf16.mxu0 %v4161_v1 }
 0x9fd   : > { %3837 = vmatpush3.bf16.msra.mxu0 %v4032_v24 }
 0x9fe   : > { %3850 = vmatprep.subr.bf16.mxu0 %v4161_v1 }
 0xacb   : > { %v1595_v39 = vpop.f32.mrb[32].mxu0 }
 0xacc   : > { %v1596_v40 = vadd.f32 %v1595_v39, %v1545_v38  ;;  %v3824_v41 = vpop.f32.mrb[33].mxu0 }
 0xacd   : > { %v1598_v42 = vpop.f32.mrb[34].mxu0 }
 0xace   : > { %v1599_v43 = vadd.f32 %v1598_v42, %v1545_v38  ;;  %v3825_v44 = vpop.f32.mrb[35].mxu0  ;;  %v1602_v3 = vadd.f32 %v1596_v40, %v4428_v48 }
 0xad0   : > { %v1604_v4 = vsel %vm497_vm4, %v1602_v3, 0.0  ;;  %v1603_v47 = vadd.f32 %v1599_v43, %v4431_v49  ;;  %v4029_v49 = vld [vmem:[%s4939_s6 + $0x80] sm:$0xff]  }
 0xad1   : > { %1605 = vadd.xlane.f32.xlu0 %v1604_v4  ;;  %3827 = vmatpush3.bf16.msra.mxu1 %v4029_v49 }
 0xad2   : > { %v1607_v51 = vsel %vm497_vm4, %v1603_v47, 0.0  ;;  %3828 = vmatprep.subr.bf16.mxu1 %v4161_v1 }
 0xad3   : > { %1608 = vadd.xlane.f32.xlu1 %v1607_v51 }
 0xad5   : > { %3829 = vmatpush3.bf16.msra.mxu1 %v4030_v62 }
 0xad6   : > { %3842 = vmatprep.subr.bf16.mxu1 %v4161_v1 }
 0xb5e   : > { %v1606_v52 = vpop.xlane.xlu0 %1605 }
 0xb5f   : > { %v1610_v54 = vmul.f32 0.03125, %v1606_v52 }
 0xb60   : > { %v1609_v53 = vpop.xlane.xlu1 %1608 }
 0xb61   : > { %v1612_v56 = vsub.f32 %v1602_v3, %v1610_v54  ;;  %v1611_v57 = vmul.f32 0.03125, %v1609_v53 }
 0xb63   : > { %v1613_v58 = vsub.f32 %v1603_v47, %v1611_v57  ;;  %v1614_v7 = vmul.f32 %v1612_v56, %v1612_v56  ;;  %v1735_v57 = vrot.slane %v4489_v46, %v4464_v5 }
 0xb65   : > { %v1616_v59 = vsel %vm497_vm4, %v1614_v7, 0.0  ;;  %v1615_v61 = vmul.f32 %v1613_v58, %v1613_v58 }
 0xb66   : > { %1617 = vadd.xlane.f32.xlu0 %v1616_v59 }
 0xb67   : > { %v1619_v48 = vsel %vm497_vm4, %v1615_v61, 0.0 }
 0xb68   : > { %1620 = vadd.xlane.f32.xlu1 %v1619_v48 }
 0xbf3   : > { %v1618_v63 = vpop.xlane.xlu0 %1617 }
 0xbf4   : > { %v1622_v2 = vmul.f32 0.03125, %v1618_v63 }
 0xbf5   : > { %v1621_v6 = vpop.xlane.xlu1 %1620 }
 0xbf6   : > { %v1624_v9 = vadd.f32 1e-05, %v1622_v2  ;;  %v1623_v10 = vmul.f32 0.03125, %v1621_v6 }
 0xbf8   : > { %4085 = vrsqrt.f32 %v1624_v9  ;;  %v1625_v8 = vadd.f32 1e-05, %v1623_v10 }
 0xbfa   : > { %4087 = vrsqrt.f32 %v1625_v8 }
 0xc02   : > { %v4086_v13 = vpop.eup %4085 }
 0xc03   : > { %v1628_v14 = vmul.f32 %v4086_v13, %v1612_v56 }
 0xc04   : > { %v4088_v15 = vpop.eup %4087 }
 0xc05   : > { %v1634_v17 = vmul.f32 %v1633_v11, %v1628_v14  ;;  %v1629_v18 = vmul.f32 %v4088_v15, %v1613_v58 }
 0xc07   : > { %v1635_v20 = vmul.f32 %v1633_v11, %v1629_v18  ;;  %v1640_v21 = vadd.f32 %v1639_v19, %v1634_v17 }
 0xc09   : > { %v1641_v22 = vadd.f32 %v1639_v19, %v1635_v20  ;;  %v4033_v20 = vld [vmem:[%s4939_s6 + $0xb0] sm:$0xff]  }
 0xc0b   : > { %v1647_v12 = vpack.c.bf16 %v1641_v22, %v1640_v21 }
 0xc0d   : > { %3831 = vmatmul.mubr.msk.bf16.vlgmr.msra.gmra.mrb[32].mxu1 %vm497_vm4, %v1647_v12  ;;  %v4036_v12 = vld [vmem:[%s4939_s6 + $0xa8] sm:$0xff]  }
 0xc0e   : > { %3846 = vmatprep.mubr.msk.bf16.mxu1 %vm4163_vm2, %v4161_v1 }
 0xce0   : > { %v1701_v26 = vpop.f32.mrb[32].mxu1 }
 0xce1   : > { %v1702_v28 = vadd.f32 %v1701_v26, %v1651_v25  ;;  %v3832_v30 = vpop.f32.mrb[33].mxu1 }
 0xce2   : > { %v1704_v31 = vpop.f32.mrb[34].mxu1 }
 0xce3   : > { %v1710_v32 = vmul.f32 0.044715, %v1702_v28  ;;  %v1705_v33 = vadd.f32 %v1704_v31, %v1651_v25  ;;  %v3833_v34 = vpop.f32.mrb[35].mxu1  ;;  %v1708_v47 = vmul.f32 0.5, %v1702_v28  ;;  %v1823_v31 = vrot.slane %v4489_v46, %v4484_v45 }
 0xce5   : > { %v1712_v35 = vmul.f32 %v1710_v32, %v1702_v28  ;;  %v1711_v36 = vmul.f32 0.044715, %v1705_v33  ;;  %v1709_v51 = vmul.f32 0.5, %v1705_v33 }
 0xce7   : > { %v1714_v37 = vmul.f32 %v1712_v35, %v1702_v28  ;;  %v1713_v38 = vmul.f32 %v1711_v36, %v1705_v33 }
 0xce9   : > { %v1716_v39 = vadd.f32 %v1714_v37, %v1702_v28  ;;  %v1715_v40 = vmul.f32 %v1713_v38, %v1705_v33  ;;  %v1829_v37 = vrot.slane %v4489_v46, %v4475_v27  ;;  %v4038_v46 = vld [vmem:[%s4939_s6 + $0xc8] sm:$0xff]  }
 0xceb   : > { %v1718_v41 = vmul.f32 0.7978846, %v1716_v39  ;;  %v1717_v42 = vadd.f32 %v1715_v40, %v1705_v33 }
 0xced   : > { %4089 = vtanh.f32 %v1718_v41  ;;  %v1719_v43 = vmul.f32 0.7978846, %v1717_v42  ;;  %v4037_v41 = vld [vmem:[%s4939_s6 + $0xc0] sm:$0xff]  }
 0xcef   : > { %4091 = vtanh.f32 %v1719_v43  ;;  %v4636_v43 = vld [vmem:[%s4940_s7 + $0x10] sm:$0xff] }
 0xcf7   : > { %v4090_v44 = vpop.eup %4089 }
 0xcf8   : > { %v1722_v3 = vadd.f32 1.0, %v4090_v44  ;;  %v1906_v44 = vrot.slane %v4636_v43, %v4281_v60 }
 0xcf9   : > { %v4092_v4 = vpop.eup %4091 }
 0xcfa   : > { %v1723_v52 = vadd.f32 1.0, %v4092_v4  ;;  %v1724_v54 = vmul.f32 %v1722_v3, %v1708_v47 }
 0xcfc   : > { %v1725_v53 = vmul.f32 %v1723_v52, %v1709_v51 }
 0xcfe   : > { %v1731_v56 = vpack.c.bf16 %v1725_v53, %v1724_v54 }
 0xd00   : > { %3839 = vmatmul.mubr.msk.bf16.vlgmr.msra.gmra.mrb[36].mxu0 %vm497_vm4, %v1731_v56 }
 0xd01   : > { %3854 = vmatprep.mubr.msk.bf16.mxu0 %vm4163_vm2, %v4161_v1  ;;  %3851 = vmatpush3.bf16.msra.mxu0 %v4033_v20  ;;  %v1968_v20 = vrot.slane %v4636_v43, %v4339_v29 }
 0xd02   : > { %3852 = vmatprep.subr.bf16.mxu0 %v4161_v1 }
 0xdd3   : > { %v1785_v58 = vpop.f32.mrb[36].mxu0 }
 0xdd4   : > { %v1786_v7 = vadd.f32 %v1785_v58, %v1735_v57  ;;  %v3840_v59 = vpop.f32.mrb[37].mxu0 }
 0xdd5   : > { %v1788_v61 = vpop.f32.mrb[38].mxu0 }
 0xdd6   : > { %v1789_v48 = vadd.f32 %v1788_v61, %v1735_v57  ;;  %v3841_v49 = vpop.f32.mrb[39].mxu0  ;;  %v1792_v62 = vadd.f32 %v1786_v7, %v1640_v21  ;;  %v4034_v21 = vld [vmem:[%s4939_s6 + $0xa0] sm:$0xff]   ;;  %v4649_v61 = vld [vmem:[%s4936_s3 + $0x8] sm:$0xff] }
 0xdd7   : > { %3843 = vmatpush3.bf16.msra.mxu1 %v4034_v21  ;;  %v4643_v7 = vld [vmem:[%s4936_s3] sm:$0xff] }
 0xdd8   : > { %v1794_v63 = vsel %vm497_vm4, %v1792_v62, 0.0  ;;  %v1793_v2 = vadd.f32 %v1789_v48, %v1641_v22  ;;  %v4035_v22 = vld [vmem:[%s4939_s6 + $0xb8] sm:$0xff]   ;;  %3844 = vmatprep.subr.bf16.mxu1 %v4161_v1 }
 0xdd9   : > { %1795 = vadd.xlane.f32.xlu0 %v1794_v63  ;;  %3853 = vmatpush3.bf16.msra.mxu0 %v4035_v22 }
 0xdda   : > { %v1797_v6 = vsel %vm497_vm4, %v1793_v2, 0.0  ;;  %3866 = vmatprep.subr.bf16.mxu0 %v4161_v1 }
 0xddb   : > { %1798 = vadd.xlane.f32.xlu1 %v1797_v6  ;;  %3845 = vmatpush3.bf16.msra.mxu1 %v4036_v12 }
 0xddc   : > { %3858 = vmatprep.subr.bf16.mxu1 %v4161_v1 }
 0xe66   : > { %v1796_v9 = vpop.xlane.xlu0 %1795 }
 0xe67   : > { %v1800_v10 = vmul.f32 0.03125, %v1796_v9 }
 0xe68   : > { %v1799_v8 = vpop.xlane.xlu1 %1798 }
 0xe69   : > { %v1802_v11 = vsub.f32 %v1792_v62, %v1800_v10  ;;  %v1801_v13 = vmul.f32 0.03125, %v1799_v8  ;;  %v4658_v10 = vld [vmem:[%s4936_s3 + $0x10] sm:$0xff] }
 0xe6b   : > { %v1803_v14 = vsub.f32 %v1793_v2, %v1801_v13  ;;  %v1804_v15 = vmul.f32 %v1802_v11, %v1802_v11 }
 0xe6d   : > { %v1806_v17 = vsel %vm497_vm4, %v1804_v15, 0.0  ;;  %v1805_v18 = vmul.f32 %v1803_v14, %v1803_v14 }
 0xe6e   : > { %1807 = vadd.xlane.f32.xlu0 %v1806_v17 }
 0xe6f   : > { %v1809_v19 = vsel %vm497_vm4, %v1805_v18, 0.0 }
 0xe70   : > { %1810 = vadd.xlane.f32.xlu1 %v1809_v19 }
 0xefb   : > { %v1808_v16 = vpop.xlane.xlu0 %1807 }
 0xefc   : > { %v1812_v24 = vmul.f32 0.03125, %v1808_v16  ;;  %v1841_v16 = vrot.slane %v4636_v43, %v4274_v55 }
 0xefd   : > { %v1811_v25 = vpop.xlane.xlu1 %1810 }
 0xefe   : > { %v1814_v26 = vadd.f32 1e-05, %v1812_v24  ;;  %v1813_v28 = vmul.f32 0.03125, %v1811_v25 }
 0xf00   : > { %4093 = vrsqrt.f32 %v1814_v26  ;;  %v1815_v30 = vadd.f32 1e-05, %v1813_v28 }
 0xf02   : > { %4095 = vrsqrt.f32 %v1815_v30 }
 0xf0a   : > { %v4094_v32 = vpop.eup %4093 }
 0xf0b   : > { %v1818_v33 = vmul.f32 %v4094_v32, %v1802_v11  ;;  %v4664_v11 = vld [vmem:[%s4936_s3 + $0x18] sm:$0xff] }
 0xf0c   : > { %v4096_v34 = vpop.eup %4095 }
 0xf0d   : > { %v1824_v35 = vmul.f32 %v1823_v31, %v1818_v33  ;;  %v1819_v36 = vmul.f32 %v4096_v34, %v1803_v14 }
 0xf0f   : > { %v1825_v38 = vmul.f32 %v1823_v31, %v1819_v36  ;;  %v4610_v39 = vadd.f32 %v1829_v37, %v1824_v35 }
 0xf11   : > { %v4612_v40 = vadd.f32 %v1829_v37, %v1825_v38 }
 0xf13   : > { %v1837_v42 = vpack.c.bf16 %v4612_v40, %v4610_v39 }
 0xf15   : > { %3847 = vmatmul.mubr.msk.bf16.vlgmr.msra.gmra.mrb[36].mxu1 %vm497_vm4, %v1837_v42  ;;  %3855 = vmatmul.mubr.msk.bf16.vlgmr.msra.gmra.mrb[40].mxu0 %vm497_vm4, %v1837_v42 }
 0xf16   : > { %3859 = vmatpush3.bf16.msra.mxu1 %v4037_v41  ;;  %3862 = vmatprep.mubr.msk.bf16.mxu1 %vm4163_vm2, %v4161_v1 }
 0xf17   : > { %3860 = vmatprep.subr.bf16.mxu1 %v4161_v1  ;;  %3870 = vmatprep.mubr.msk.bf16.mxu0 %vm4163_vm2, %v4161_v1 }
 0xf1a   : > { %3861 = vmatpush3.bf16.msra.mxu1 %v4038_v46 }
 0xf1b   : > { %3874 = vmatprep.subr.bf16.mxu1 %v4161_v1 }
 0xf1d   : > { %3863 = vmatmul.mubr.msk.bf16.vlgmr.msra.gmra.mrb[40].mxu1 %vm497_vm4, %v1837_v42 }
 0xf1e   : > { %3878 = vmatprep.mubr.msk.bf16.mxu1 %vm4163_vm2, %v4161_v1 }
 0xfe8   : > { %v1891_v3 = vpop.f32.mrb[36].mxu1  ;;  %v1953_v4 = vpop.f32.mrb[40].mxu0 }
 0xfe9   : > { %v1954_v47 = vadd.f32 %v1953_v4, %v1906_v44  ;;  %v3848_v51 = vpop.f32.mrb[37].mxu1  ;;  %v3856_v52 = vpop.f32.mrb[41].mxu0  ;;  %v1892_v30 = vadd.f32 %v1891_v3, %v1841_v16 }
 0xfea   : > { %v1894_v54 = vpop.f32.mrb[38].mxu1  ;;  %v1956_v53 = vpop.f32.mrb[42].mxu0 }
 0xfeb   : > { %v1957_v56 = vadd.f32 %v1956_v53, %v1906_v44  ;;  %v3849_v57 = vpop.f32.mrb[39].mxu1  ;;  %v3857_v58 = vpop.f32.mrb[43].mxu0  ;;  %v2022_v59 = vmul.f32 %v4643_v7, %v1954_v47  ;;  %v2023_v48 = vmul.f32 %v4649_v61, %v1954_v47  ;;  %v2024_v8 = vmul.f32 %v4658_v10, %v1954_v47 }
 0xfec   : > { %v2025_v13 = vmul.f32 %v4664_v11, %v1954_v47  ;;  %v1895_v31 = vadd.f32 %v1894_v54, %v1841_v16  ;;  %v2046_v36 = vpack.c.bf16 %v1892_v30, %v1892_v30 }
 0xfed   : > { %v2026_v49 = vmul.f32 %v4643_v7, %v1957_v56  ;;  %v2027_v62 = vmul.f32 %v4649_v61, %v1957_v56  ;;  %v2030_v63 = vpack.c.bf16 %v2023_v48, %v2022_v59  ;;  %v2028_v17 = vmul.f32 %v4658_v10, %v1957_v56  ;;  %v4701_v59 = vld [vmem:[%s4935_s2] sm:$0xff] }
 0xfee   : > { %v2029_v18 = vmul.f32 %v4664_v11, %v1957_v56  ;;  %v2031_v22 = vpack.c.bf16 %v2025_v13, %v2024_v8  ;;  %v2047_v37 = vpack.c.bf16 %v1895_v31, %v1895_v31 }
 0xfef   : > { %v2032_v2 = vpack.c.bf16 %v2027_v62, %v2026_v49  ;;  %v2052_v9 = vsel %vm497_vm4, %v2030_v63, 0 }
 0xff0   : > { %v2015_v6 = vpop.f32.mrb[40].mxu1  ;;  %3867 = vmatpush3.bf16.xpose.msra.mxu0 %v2052_v9  ;;  %v2033_v12 = vpack.c.bf16 %v2029_v18, %v2028_v17  ;;  %v2055_v26 = vsel %vm497_vm4, %v2031_v22, 0 }
 0xff1   : > { %v3864_v14 = vpop.f32.mrb[41].mxu1  ;;  %v2101_v15 = vsel %vm497_vm4, %v2032_v2, 0  ;;  %3868 = vmatprep.subr.bf16.mxu0 %v4161_v1  ;;  %v2016_v24 = vadd.f32 %v2015_v6, %v1968_v20 }
 0xff2   : > { %v2018_v19 = vpop.f32.mrb[42].mxu1  ;;  %3875 = vmatpush3.bf16.xpose.msra.mxu1 %v2101_v15  ;;  %v2104_v28 = vsel %vm497_vm4, %v2033_v12, 0 }
 0xff3   : > { %v3865_v21 = vpop.f32.mrb[43].mxu1  ;;  %3876 = vmatprep.subr.bf16.mxu1 %v4161_v1  ;;  %v2019_v25 = vadd.f32 %v2018_v19, %v1968_v20  ;;  %v2034_v32 = vmul.f32 %v4643_v7, %v2016_v24  ;;  %v2035_v33 = vmul.f32 %v4649_v61, %v2016_v24  ;;  %v2036_v38 = vmul.f32 %v4658_v10, %v2016_v24 }
 0xff4   : > { %v2037_v41 = vmul.f32 %v4664_v11, %v2016_v24 }
 0xff5   : > { %v2038_v34 = vmul.f32 %v4643_v7, %v2019_v25  ;;  %v2039_v35 = vmul.f32 %v4649_v61, %v2019_v25  ;;  %v2042_v42 = vpack.c.bf16 %v2035_v33, %v2034_v32  ;;  %v2040_v46 = vmul.f32 %v4658_v10, %v2019_v25 }
 0xff6   : > { %v2041_v44 = vmul.f32 %v4664_v11, %v2019_v25  ;;  %v2043_v4 = vpack.c.bf16 %v2037_v41, %v2036_v38 }
 0xff7   : > { %v2044_v3 = vpack.c.bf16 %v2039_v35, %v2038_v34 }
 0xff8   : > { %3869 = vmatpush3.bf16.xpose.msra.mxu0 %v2055_v26  ;;  %v2045_v47 = vpack.c.bf16 %v2041_v44, %v2040_v46 }
 0xff9   : > { %3882 = vmatprep.subr.bf16.mxu0 %v4161_v1 }
 0xffa   : > { %3877 = vmatpush3.bf16.xpose.msra.mxu1 %v2104_v28 }
 0xffb   : > { %3890 = vmatprep.subr.bf16.mxu1 %v4161_v1 }
 0xfff   : > { %3871 = vmatmul.mubr.msk.bf16.vlgmr.msra.gmra.mrb[44].mxu0 %vm497_vm4, %v2046_v36 }
0x1000   : > { %3883 = vmatpush3.bf16.msra.mxu0 %v2042_v42  ;;  %3886 = vmatprep.mubr.msk.bf16.mxu0 %vm4163_vm2, %v4161_v1 }
0x1001   : > { %3879 = vmatmul.mubr.msk.bf16.vlgmr.msra.gmra.mrb[44].mxu1 %vm497_vm4, %v2047_v37  ;;  %3884 = vmatprep.subr.bf16.mxu0 %v4161_v1 }
0x1002   : > { %3891 = vmatpush3.bf16.msra.mxu1 %v2044_v3  ;;  %3894 = vmatprep.mubr.msk.bf16.mxu1 %vm4163_vm2, %v4161_v1 }
0x1003   : > { %3892 = vmatprep.subr.bf16.mxu1 %v4161_v1 }
0x1004   : > { %3885 = vmatpush3.bf16.msra.mxu0 %v2043_v4 }
0x1005   : > { %3898 = vmatprep.subr.bf16.mxu0 %v4161_v1 }
0x1006   : > { %3893 = vmatpush3.bf16.msra.mxu1 %v2045_v47 }
0x1007   : > { %3906 = vmatprep.subr.bf16.mxu1 %v4161_v1 }
0x10d2   : > { %v2091_v51 = vpop.f32.mrb[44].mxu0 }
0x10d3   : > { %v2146_v52 = vmul.f32 0.35355338, %v2091_v51  ;;  %v3872_v54 = vpop.f32.mrb[45].mxu0 }
0x10d4   : > { %v2140_v53 = vpop.f32.mrb[44].mxu1  ;;  %v2094_v56 = vpop.f32.mrb[46].mxu0 }
0x10d5   : > { %v2147_v57 = vmul.f32 0.35355338, %v2140_v53  ;;  %v3880_v58 = vpop.f32.mrb[45].mxu1  ;;  %v2148_v48 = vadd.f32 %v4701_v59, %v2146_v52  ;;  %v3873_v49 = vpop.f32.mrb[47].mxu0  ;;  %v4039_v56 = vld [vmem:[%s4939_s6 + $0xd0] sm:$0xff]  }
0x10d6   : > { %v2143_v62 = vpop.f32.mrb[46].mxu1 }
0x10d7   : > { %v2149_v63 = vadd.f32 %v4701_v59, %v2147_v57  ;;  %v3881_v2 = vpop.f32.mrb[47].mxu1  ;;  %v2150_v6 = vsel %vm497_vm4, %v2148_v48, -inf }
0x10d8   : > { %v2151_v9 = vrot.slane %v2150_v6, 4 }
0x10d9   : > { %v2157_v8 = vsel %vm497_vm4, %v2149_v63, -inf }
0x10da   : > { %v2158_v13 = vrot.slane %v2157_v8, 4  ;;  %v2152_v14 = vmax.f32 %v2150_v6, %v2151_v9 }
0x10dc   : > { %v2159_v15 = vmax.f32 %v2157_v8, %v2158_v13  ;;  %v2153_v17 = vrot.slane %v2152_v14, 2 }
0x10de   : > { %v2160_v18 = vrot.slane %v2159_v15, 2  ;;  %v2154_v19 = vmax.f32 %v2152_v14, %v2153_v17 }
0x10e0   : > { %v2161_v20 = vmax.f32 %v2159_v15, %v2160_v18  ;;  %v2155_v21 = vrot.slane %v2154_v19, 1  ;;  %v2285_v15 = vrot.slane %v4636_v43, %v4404_v23 }
0x10e2   : > { %v2162_v22 = vrot.slane %v2161_v20, 1  ;;  %v2156_v12 = vmax.f32 %v2154_v19, %v2155_v21 }
0x10e4   : > { %v2163_v16 = vmax.f32 %v2161_v20, %v2162_v22  ;;  %v2164_v24 = vsub.f32 %v2148_v48, %v2156_v12  ;;  %v4040_v48 = vld [vmem:[%s4939_s6 + $0xd8] sm:$0xff]  }
0x10e6   : > { %v2165_v25 = vsub.f32 %v2149_v63, %v2163_v16  ;;  %v2166_v26 = vmul.f32 1.442695, %v2164_v24 }
0x10e8   : > { %v2168_v28 = vmul.f32 1.442695, %v2165_v25  ;;  %4097 = vpow2.f32 %v2166_v26 }
0x10ea   : > { %4099 = vpow2.f32 %v2168_v28 }
0x10f2   : > { %v4098_v30 = vpop.eup %4097 }
0x10f3   : > { %v2170_v32 = vsel %vm497_vm4, %v4098_v30, 0.0 }
0x10f4   : > { %v4100_v31 = vpop.eup %4099  ;;  %v2171_v33 = vrot.slane %v2170_v32, 4 }
0x10f5   : > { %v2177_v34 = vsel %vm497_vm4, %v4100_v31, 0.0 }
0x10f6   : > { %v2178_v35 = vrot.slane %v2177_v34, 4  ;;  %v2172_v36 = vadd.f32 %v2171_v33, %v2170_v32 }
0x10f8   : > { %v2179_v37 = vadd.f32 %v2178_v35, %v2177_v34  ;;  %v2173_v38 = vrot.slane %v2172_v36, 2 }
0x10fa   : > { %v2180_v41 = vrot.slane %v2179_v37, 2  ;;  %v2174_v42 = vadd.f32 %v2173_v38, %v2172_v36  ;;  %v4043_v38 = vld [vmem:[%s4939_s6 + $0xf0] sm:$0xff]  }
0x10fc   : > { %v2181_v46 = vadd.f32 %v2180_v41, %v2179_v37  ;;  %v2175_v44 = vrot.slane %v2174_v42, 1  ;;  %v4042_v37 = vld [vmem:[%s4939_s6 + $0xe8] sm:$0xff]   ;;  %v4044_v41 = vld [vmem:[%s4939_s6 + $0x100] sm:$0xff]  }
0x10fe   : > { %v2182_v3 = vrot.slane %v2181_v46, 1  ;;  %v2176_v4 = vadd.f32 %v2175_v44, %v2174_v42  ;;  %v4045_v42 = vld [vmem:[%s4939_s6 + $0xf8] sm:$0xff]  }
0x1100   : > { %v2183_v47 = vadd.f32 %v2182_v3, %v2181_v46  ;;  %4101 = vrcp.f32 %v2176_v4  ;;  %v4046_v46 = vld [vmem:[%s4939_s6 + $0x108] sm:$0xff]  }
0x1102   : > { %4103 = vrcp.f32 %v2183_v47 }
0x110a   : > { %v4102_v51 = vpop.eup %4101 }
0x110b   : > { %v2185_v54 = vmul.f32 %v4102_v51, %v4098_v30 }
0x110c   : > { %v4104_v52 = vpop.eup %4103 }
0x110d   : > { %v2187_v53 = vmul.f32 %v4104_v52, %v4100_v31  ;;  %v2188_v57 = vpack.c.bf16 %v2185_v54, %v2185_v54  ;;  %v2373_v52 = vrot.slane %v4636_v43, %v4459_v0 }
0x110f   : > { %v2189_v58 = vpack.c.bf16 %v2187_v53, %v2187_v53  ;;  %3887 = vmatmul.mubr.msk.bf16.vlgmr.msra.gmra.mrb[48].mxu0 %vm497_vm4, %v2188_v57 }
0x1110   : > { %3899 = vmatpush3.bf16.msra.mxu0 %v4039_v56  ;;  %3902 = vmatprep.mubr.msk.bf16.mxu0 %vm4163_vm2, %v4161_v1 }
0x1111   : > { %3895 = vmatmul.mubr.msk.bf16.vlgmr.msra.gmra.mrb[48].mxu1 %vm497_vm4, %v2189_v58  ;;  %3900 = vmatprep.subr.bf16.mxu0 %v4161_v1 }
0x1112   : > { %3910 = vmatprep.mubr.msk.bf16.mxu1 %vm4163_vm2, %v4161_v1 }
0x1114   : > { %3901 = vmatpush3.bf16.msra.mxu0 %v4040_v48  ;;  %v2379_v48 = vrot.slane %v4636_v43, %v4464_v5 }
0x1115   : > { %3914 = vmatprep.subr.bf16.mxu0 %v4161_v1 }
0x11e2   : > { %v2227_v49 = vpop.f32.mrb[48].mxu0 }
0x11e3   : > { %v3888_v62 = vpop.f32.mrb[49].mxu0 }
0x11e4   : > { %v2270_v63 = vpop.f32.mrb[48].mxu1  ;;  %v2230_v2 = vpop.f32.mrb[50].mxu0 }
0x11e5   : > { %v2281_v6 = vpack.c.bf16 %v2270_v63, %v2227_v49  ;;  %v3896_v9 = vpop.f32.mrb[49].mxu1  ;;  %v3889_v8 = vpop.f32.mrb[51].mxu0 }
0x11e6   : > { %v2273_v13 = vpop.f32.mrb[50].mxu1 }
0x11e7   : > { %v3897_v14 = vpop.f32.mrb[51].mxu1  ;;  %3903 = vmatmul.mubr.msk.bf16.vlgmr.msra.gmra.mrb[52].mxu0 %vm497_vm4, %v2281_v6 }
0x11e8   : > { %3918 = vmatprep.mubr.msk.bf16.mxu0 %vm4163_vm2, %v4161_v1  ;;  %3915 = vmatpush3.bf16.msra.mxu0 %v4043_v38  ;;  %v2453_v14 = vrot.slane %v4636_v43, %v4475_v27 }
0x11e9   : > { %3916 = vmatprep.subr.bf16.mxu0 %v4161_v1 }
0x11ec   : > { %3917 = vmatpush3.bf16.msra.mxu0 %v4045_v42 }
0x11ed   : > { %3930 = vmatprep.subr.bf16.mxu0 %v4161_v1 }
0x12ba   : > { %v2335_v17 = vpop.f32.mrb[52].mxu0 }
0x12bb   : > { %v2336_v18 = vadd.f32 %v2335_v17, %v2285_v15  ;;  %v3904_v19 = vpop.f32.mrb[53].mxu0 }
0x12bc   : > { %v2338_v20 = vpop.f32.mrb[54].mxu0 }
0x12bd   : > { %v2339_v21 = vadd.f32 %v2338_v20, %v2285_v15  ;;  %v3905_v22 = vpop.f32.mrb[55].mxu0  ;;  %v2342_v12 = vadd.f32 %v2336_v18, %v4610_v39 }
0x12bf   : > { %v2344_v16 = vsel %vm497_vm4, %v2342_v12, 0.0  ;;  %v2343_v24 = vadd.f32 %v2339_v21, %v4612_v40  ;;  %v4041_v40 = vld [vmem:[%s4939_s6 + $0xe0] sm:$0xff]  }
0x12c0   : > { %2345 = vadd.xlane.f32.xlu0 %v2344_v16  ;;  %3907 = vmatpush3.bf16.msra.mxu1 %v4041_v40 }
0x12c1   : > { %v2347_v25 = vsel %vm497_vm4, %v2343_v24, 0.0  ;;  %3908 = vmatprep.subr.bf16.mxu1 %v4161_v1 }
0x12c2   : > { %2348 = vadd.xlane.f32.xlu1 %v2347_v25 }
0x12c4   : > { %3909 = vmatpush3.bf16.msra.mxu1 %v4042_v37 }
0x12c5   : > { %3922 = vmatprep.subr.bf16.mxu1 %v4161_v1 }
0x12c7   : > { %3911 = vmatmul.mubr.msk.bf16.vlgmr.msra.gmra.mrb[52].mxu1 %vm497_vm4, %v4435_v50 }
0x12c8   : > { %3923 = vmatpush3.bf16.msra.mxu1 %v4044_v41  ;;  %3926 = vmatprep.mubr.msk.bf16.mxu1 %vm4163_vm2, %v4161_v1  ;;  %v2390_v41 = vrot.slane %v4636_v43, %v4484_v45 }
0x12c9   : > { %3924 = vmatprep.subr.bf16.mxu1 %v4161_v1 }
0x12cc   : > { %3925 = vmatpush3.bf16.msra.mxu1 %v4046_v46 }
0x12cd   : > { %3938 = vmatprep.subr.bf16.mxu1 %v4161_v1 }
0x134d   : > { %v2346_v26 = vpop.xlane.xlu0 %2345 }
0x134e   : > { %v2350_v28 = vmul.f32 0.03125, %v2346_v26 }
0x134f   : > { %v2349_v30 = vpop.xlane.xlu1 %2348 }
0x1350   : > { %v2352_v31 = vsub.f32 %v2342_v12, %v2350_v28  ;;  %v2351_v32 = vmul.f32 0.03125, %v2349_v30 }
0x1352   : > { %v2353_v33 = vsub.f32 %v2343_v24, %v2351_v32  ;;  %v2354_v34 = vmul.f32 %v2352_v31, %v2352_v31  ;;  %v4781_v32 = vld [vmem:[%s4940_s7 + $0x18] sm:$0xff] }
0x1353   : > { %v2518_v38 = vrot.slane %v4781_v32, %v4274_v55 }
0x1354   : > { %v2356_v35 = vsel %vm497_vm4, %v2354_v34, 0.0  ;;  %v2355_v36 = vmul.f32 %v2353_v33, %v2353_v33 }
0x1355   : > { %2357 = vadd.xlane.f32.xlu0 %v2356_v35 }
0x1356   : > { %v2359_v39 = vsel %vm497_vm4, %v2355_v36, 0.0 }
0x1357   : > { %2360 = vadd.xlane.f32.xlu1 %v2359_v39 }
0x139a   : > { %v2437_v6 = vpop.f32.mrb[52].mxu1 }
0x139b   : > { %v3912_v9 = vpop.f32.mrb[53].mxu1 }
0x139c   : > { %v2440_v8 = vpop.f32.mrb[54].mxu1 }
0x139d   : > { %v3913_v13 = vpop.f32.mrb[55].mxu1 }
0x13e2   : > { %v2358_v50 = vpop.xlane.xlu0 %2357 }
0x13e3   : > { %v2362_v44 = vmul.f32 0.03125, %v2358_v50 }
0x13e4   : > { %v2361_v3 = vpop.xlane.xlu1 %2360 }
0x13e5   : > { %v2364_v4 = vadd.f32 1e-05, %v2362_v44  ;;  %v2363_v47 = vmul.f32 0.03125, %v2361_v3  ;;  %v2438_v44 = vadd.f32 %v2437_v6, %v2390_v41 }
0x13e7   : > { %4105 = vrsqrt.f32 %v2364_v4  ;;  %v2365_v51 = vadd.f32 1e-05, %v2363_v47  ;;  %v2596_v43 = vpack.c.bf16 %v2438_v44, %v2438_v44 }
0x13e9   : > { %4107 = vrsqrt.f32 %v2365_v51 }
0x13f1   : > { %v4106_v54 = vpop.eup %4105 }
0x13f2   : > { %v2368_v53 = vmul.f32 %v4106_v54, %v2352_v31 }
0x13f3   : > { %v4108_v56 = vpop.eup %4107 }
0x13f4   : > { %v2374_v57 = vmul.f32 %v2373_v52, %v2368_v53  ;;  %v2369_v58 = vmul.f32 %v4108_v56, %v2353_v33 }
0x13f6   : > { %v2375_v49 = vmul.f32 %v2373_v52, %v2369_v58  ;;  %v2380_v62 = vadd.f32 %v2379_v48, %v2374_v57  ;;  %v2441_v52 = vadd.f32 %v2440_v8, %v2390_v41 }
0x13f8   : > { %v2381_v63 = vadd.f32 %v2379_v48, %v2375_v49  ;;  %v2597_v48 = vpack.c.bf16 %v2441_v52, %v2441_v52 }
0x13fa   : > { %v2449_v2 = vpack.c.bf16 %v2381_v63, %v2380_v62 }
0x13fc   : > { %3919 = vmatmul.mubr.msk.bf16.vlgmr.msra.gmra.mrb[56].mxu0 %vm497_vm4, %v2449_v2  ;;  %3927 = vmatmul.mubr.msk.bf16.vlgmr.msra.gmra.mrb[56].mxu1 %vm497_vm4, %v2449_v2 }
0x13fd   : > { %3934 = vmatprep.mubr.msk.bf16.mxu0 %vm4163_vm2, %v4161_v1  ;;  %3942 = vmatprep.mubr.msk.bf16.mxu1 %vm4163_vm2, %v4161_v1 }
0x14cf   : > { %v2503_v15 = vpop.f32.mrb[56].mxu0  ;;  %v2565_v17 = vpop.f32.mrb[56].mxu1 }
0x14d0   : > { %v2504_v18 = vadd.f32 %v2503_v15, %v2453_v14  ;;  %v3920_v19 = vpop.f32.mrb[57].mxu0  ;;  %v3928_v20 = vpop.f32.mrb[57].mxu1  ;;  %v2566_v50 = vadd.f32 %v2565_v17, %v2518_v38 }
0x14d1   : > { %v2506_v21 = vpop.f32.mrb[58].mxu0  ;;  %v2568_v22 = vpop.f32.mrb[58].mxu1 }
0x14d2   : > { %v3921_v12 = vpop.f32.mrb[59].mxu0  ;;  %v3929_v16 = vpop.f32.mrb[59].mxu1  ;;  %v2507_v24 = vadd.f32 %v2506_v21, %v2453_v14  ;;  %v2572_v25 = vmul.f32 %v4643_v7, %v2504_v18  ;;  %v2573_v26 = vmul.f32 %v4649_v61, %v2504_v18  ;;  %v2574_v35 = vmul.f32 %v4658_v10, %v2504_v18 }
0x14d3   : > { %v2575_v36 = vmul.f32 %v4664_v11, %v2504_v18  ;;  %v2569_v4 = vadd.f32 %v2568_v22, %v2518_v38  ;;  %v2584_v55 = vmul.f32 %v4643_v7, %v2566_v50  ;;  %v2585_v51 = vmul.f32 %v4649_v61, %v2566_v50 }
0x14d4   : > { %v2580_v28 = vpack.c.bf16 %v2573_v26, %v2572_v25  ;;  %v2576_v30 = vmul.f32 %v4643_v7, %v2507_v24  ;;  %v2577_v31 = vmul.f32 %v4649_v61, %v2507_v24  ;;  %v2578_v40 = vmul.f32 %v4658_v10, %v2507_v24 }
0x14d5   : > { %v2579_v37 = vmul.f32 %v4664_v11, %v2507_v24  ;;  %v2581_v42 = vpack.c.bf16 %v2575_v36, %v2574_v35  ;;  %v2588_v54 = vmul.f32 %v4643_v7, %v2569_v4  ;;  %v2589_v53 = vmul.f32 %v4649_v61, %v2569_v4 }
0x14d6   : > { %v2602_v33 = vsel %vm497_vm4, %v2580_v28, 0  ;;  %v2582_v34 = vpack.c.bf16 %v2577_v31, %v2576_v30  ;;  %v2586_v56 = vmul.f32 %v4658_v10, %v2566_v50  ;;  %v2587_v57 = vmul.f32 %v4664_v11, %v2566_v50 }
0x14d7   : > { %3931 = vmatpush3.bf16.xpose.msra.mxu0 %v2602_v33  ;;  %v2583_v46 = vpack.c.bf16 %v2579_v37, %v2578_v40  ;;  %v2605_v3 = vsel %vm497_vm4, %v2581_v42, 0  ;;  %v2592_v58 = vpack.c.bf16 %v2585_v51, %v2584_v55  ;;  %v2590_v49 = vmul.f32 %v4658_v10, %v2569_v4 }
0x14d8   : > { %v2651_v39 = vsel %vm497_vm4, %v2582_v34, 0  ;;  %3932 = vmatprep.subr.bf16.mxu0 %v4161_v1  ;;  %v2591_v62 = vmul.f32 %v4664_v11, %v2569_v4  ;;  %v2594_v63 = vpack.c.bf16 %v2589_v53, %v2588_v54  ;;  %v2593_v7 = vpack.c.bf16 %v2587_v57, %v2586_v56 }
0x14d9   : > { %3939 = vmatpush3.bf16.xpose.msra.mxu1 %v2651_v39  ;;  %v2654_v47 = vsel %vm497_vm4, %v2583_v46, 0 }
0x14da   : > { %3940 = vmatprep.subr.bf16.mxu1 %v4161_v1  ;;  %v2595_v61 = vpack.c.bf16 %v2591_v62, %v2590_v49 }
0x14df   : > { %3933 = vmatpush3.bf16.xpose.msra.mxu0 %v2605_v3 }
0x14e0   : > { %3946 = vmatprep.subr.bf16.mxu0 %v4161_v1 }
0x14e1   : > { %3941 = vmatpush3.bf16.xpose.msra.mxu1 %v2654_v47 }
0x14e2   : > { %3954 = vmatprep.subr.bf16.mxu1 %v4161_v1 }
0x14e6   : > { %3935 = vmatmul.mubr.msk.bf16.vlgmr.msra.gmra.mrb[60].mxu0 %vm497_vm4, %v2596_v43 }
0x14e7   : > { %3947 = vmatpush3.bf16.msra.mxu0 %v2592_v58  ;;  %3950 = vmatprep.mubr.msk.bf16.mxu0 %vm4163_vm2, %v4161_v1 }
0x14e8   : > { %3943 = vmatmul.mubr.msk.bf16.vlgmr.msra.gmra.mrb[60].mxu1 %vm497_vm4, %v2597_v48  ;;  %3948 = vmatprep.subr.bf16.mxu0 %v4161_v1  ;;  %v4047_v48 = vld [vmem:[%s4939_s6 + $0x110] sm:$0xff]  }
0x14e9   : > { %3955 = vmatpush3.bf16.msra.mxu1 %v2594_v63  ;;  %3958 = vmatprep.mubr.msk.bf16.mxu1 %vm4163_vm2, %v4161_v1 }
0x14ea   : > { %3956 = vmatprep.subr.bf16.mxu1 %v4161_v1 }
0x14eb   : > { %3949 = vmatpush3.bf16.msra.mxu0 %v2593_v7  ;;  %v4048_v7 = vld [vmem:[%s4939_s6 + $0x118] sm:$0xff]  }
0x14ec   : > { %3962 = vmatprep.subr.bf16.mxu0 %v4161_v1 }
0x14ed   : > { %3957 = vmatpush3.bf16.msra.mxu1 %v2595_v61 }
0x14ee   : > { %3970 = vmatprep.subr.bf16.mxu1 %v4161_v1 }
0x15b9   : > { %v2641_v10 = vpop.f32.mrb[60].mxu0 }
0x15ba   : > { %v2696_v11 = vmul.f32 0.35355338, %v2641_v10  ;;  %v3936_v2 = vpop.f32.mrb[61].mxu0 }
0x15bb   : > { %v2644_v6 = vpop.f32.mrb[62].mxu0  ;;  %v2690_v9 = vpop.f32.mrb[60].mxu1 }
0x15bc   : > { %v2698_v8 = vadd.f32 %v4701_v59, %v2696_v11  ;;  %v2697_v13 = vmul.f32 0.35355338, %v2690_v9  ;;  %v3937_v14 = vpop.f32.mrb[63].mxu0  ;;  %v3944_v15 = vpop.f32.mrb[61].mxu1 }
0x15bd   : > { %v2693_v17 = vpop.f32.mrb[62].mxu1  ;;  %v2835_v15 = vrot.slane %v4781_v32, %v4281_v60 }
0x15be   : > { %v2700_v18 = vsel %vm497_vm4, %v2698_v8, -inf  ;;  %v2699_v19 = vadd.f32 %v4701_v59, %v2697_v13  ;;  %v3945_v20 = vpop.f32.mrb[63].mxu1 }
0x15bf   : > { %v2701_v21 = vrot.slane %v2700_v18, 4 }
0x15c0   : > { %v2707_v22 = vsel %vm497_vm4, %v2699_v19, -inf }
0x15c1   : > { %v2702_v12 = vmax.f32 %v2700_v18, %v2701_v21  ;;  %v2708_v16 = vrot.slane %v2707_v22, 4 }
0x15c3   : > { %v2703_v24 = vrot.slane %v2702_v12, 2  ;;  %v2709_v25 = vmax.f32 %v2707_v22, %v2708_v16 }
0x15c5   : > { %v2704_v26 = vmax.f32 %v2702_v12, %v2703_v24  ;;  %v2710_v28 = vrot.slane %v2709_v25, 2  ;;  %v4150_v12 = vld [vmem:[%s4421_s26] sm:$0xff] }
0x15c7   : > { %v2705_v30 = vrot.slane %v2704_v26, 1  ;;  %v2711_v31 = vmax.f32 %v2709_v25, %v2710_v28  ;;  %v4151_v25 = vld [vmem:[%s4421_s26 + $0x8] sm:$0xff] }
0x15c9   : > { %v2706_v33 = vmax.f32 %v2704_v26, %v2705_v30  ;;  %v2712_v34 = vrot.slane %v2711_v31, 1 }
0x15cb   : > { %v2714_v35 = vsub.f32 %v2698_v8, %v2706_v33  ;;  %v2713_v36 = vmax.f32 %v2711_v31, %v2712_v34 }
0x15cd   : > { %v2716_v39 = vmul.f32 1.442695, %v2714_v35  ;;  %v2715_v40 = vsub.f32 %v2699_v19, %v2713_v36 }
0x15cf   : > { %4109 = vpow2.f32 %v2716_v39  ;;  %v2718_v59 = vmul.f32 1.442695, %v2715_v40 }
0x15d1   : > { %4111 = vpow2.f32 %v2718_v59 }
0x15d9   : > { %v4110_v37 = vpop.eup %4109 }
0x15da   : > { %v2720_v38 = vsel %vm497_vm4, %v4110_v37, 0.0 }
0x15db   : > { %v4112_v41 = vpop.eup %4111  ;;  %v2721_v42 = vrot.slane %v2720_v38, 4 }
0x15dc   : > { %v2727_v46 = vsel %vm497_vm4, %v4112_v41, 0.0 }
0x15dd   : > { %v2722_v50 = vadd.f32 %v2721_v42, %v2720_v38  ;;  %v2728_v44 = vrot.slane %v2727_v46, 4  ;;  %v4050_v38 = vld [vmem:[%s4939_s6 + $0x128] sm:$0xff]  }
0x15df   : > { %v2723_v3 = vrot.slane %v2722_v50, 2  ;;  %v2729_v4 = vadd.f32 %v2728_v44, %v2727_v46 }
0x15e1   : > { %v2724_v47 = vadd.f32 %v2723_v3, %v2722_v50  ;;  %v2730_v55 = vrot.slane %v2729_v4, 2 }
0x15e3   : > { %v2725_v51 = vrot.slane %v2724_v47, 1  ;;  %v2731_v43 = vadd.f32 %v2730_v55, %v2729_v4  ;;  %v2923_v4 = vrot.slane %v4781_v32, %v4339_v29 }
0x15e5   : > { %v2726_v52 = vadd.f32 %v2725_v51, %v2724_v47  ;;  %v2732_v54 = vrot.slane %v2731_v43, 1 }
0x15e7   : > { %4113 = vrcp.f32 %v2726_v52  ;;  %v2733_v53 = vadd.f32 %v2732_v54, %v2731_v43  ;;  %v2929_v54 = vrot.slane %v4781_v32, %v4404_v23 }
0x15e9   : > { %4115 = vrcp.f32 %v2733_v53 }
0x15f1   : > { %v4114_v56 = vpop.eup %4113 }
0x15f2   : > { %v2735_v57 = vmul.f32 %v4114_v56, %v4110_v37  ;;  %v4049_v37 = vld [vmem:[%s4939_s6 + $0x120] sm:$0xff]  }
0x15f3   : > { %v4116_v58 = vpop.eup %4115 }
0x15f4   : > { %v2738_v49 = vpack.c.bf16 %v2735_v57, %v2735_v57  ;;  %v2737_v62 = vmul.f32 %v4116_v58, %v4112_v41 }
0x15f6   : > { %3951 = vmatmul.mubr.msk.bf16.vlgmr.msra.gmra.mrb[64].mxu0 %vm497_vm4, %v2738_v49  ;;  %v2739_v63 = vpack.c.bf16 %v2737_v62, %v2737_v62  ;;  %v4052_v49 = vld [vmem:[%s4939_s6 + $0x138] sm:$0xff]   ;;  %v2941_v62 = vrot.slane %v4781_v32, %v4459_v0 }
0x15f7   : > { %3963 = vmatpush3.bf16.msra.mxu0 %v4047_v48  ;;  %3966 = vmatprep.mubr.msk.bf16.mxu0 %vm4163_vm2, %v4161_v1  ;;  %v4051_v48 = vld [vmem:[%s4939_s6 + $0x130] sm:$0xff]  }
0x15f8   : > { %3959 = vmatmul.mubr.msk.bf16.vlgmr.msra.gmra.mrb[64].mxu1 %vm497_vm4, %v2739_v63  ;;  %3964 = vmatprep.subr.bf16.mxu0 %v4161_v1 }
0x15f9   : > { %3974 = vmatprep.mubr.msk.bf16.mxu1 %vm4163_vm2, %v4161_v1  ;;  %3971 = vmatpush3.bf16.msra.mxu1 %v4049_v37 }
0x15fa   : > { %3972 = vmatprep.subr.bf16.mxu1 %v4161_v1 }
0x15fb   : > { %3965 = vmatpush3.bf16.msra.mxu0 %v4048_v7 }
0x15fc   : > { %3978 = vmatprep.subr.bf16.mxu0 %v4161_v1 }
0x15fd   : > { %3973 = vmatpush3.bf16.msra.mxu1 %v4050_v38 }
0x15fe   : > { %3986 = vmatprep.subr.bf16.mxu1 %v4161_v1 }
0x16c9   : > { %v2777_v61 = vpop.f32.mrb[64].mxu0 }
0x16ca   : > { %v3952_v10 = vpop.f32.mrb[65].mxu0 }
0x16cb   : > { %v2780_v11 = vpop.f32.mrb[66].mxu0  ;;  %v2820_v2 = vpop.f32.mrb[64].mxu1 }
0x16cc   : > { %v2831_v6 = vpack.c.bf16 %v2820_v2, %v2777_v61  ;;  %v3953_v9 = vpop.f32.mrb[67].mxu0  ;;  %v3960_v8 = vpop.f32.mrb[65].mxu1 }
0x16cd   : > { %v2823_v13 = vpop.f32.mrb[66].mxu1 }
0x16ce   : > { %v3961_v14 = vpop.f32.mrb[67].mxu1  ;;  %3967 = vmatmul.mubr.msk.bf16.vlgmr.msra.gmra.mrb[68].mxu0 %vm497_vm4, %v2831_v6 }
0x16cf   : > { %3982 = vmatprep.mubr.msk.bf16.mxu0 %vm4163_vm2, %v4161_v1  ;;  %3979 = vmatpush3.bf16.msra.mxu0 %v4051_v48  ;;  %v3113_v48 = vrot.slane %v4781_v32, %v4484_v45 }
0x16d0   : > { %3980 = vmatprep.subr.bf16.mxu0 %v4161_v1 }
0x16d3   : > { %3981 = vmatpush3.bf16.msra.mxu0 %v4052_v49 }
0x16d4   : > { %3994 = vmatprep.subr.bf16.mxu0 %v4161_v1 }
0x17a1   : > { %v2885_v17 = vpop.f32.mrb[68].mxu0 }
0x17a2   : > { %v2886_v18 = vadd.f32 %v2885_v17, %v2835_v15  ;;  %v3968_v19 = vpop.f32.mrb[69].mxu0 }
0x17a3   : > { %v2888_v20 = vpop.f32.mrb[70].mxu0 }
0x17a4   : > { %v2889_v21 = vadd.f32 %v2888_v20, %v2835_v15  ;;  %v3969_v22 = vpop.f32.mrb[71].mxu0  ;;  %v2892_v16 = vadd.f32 %v4150_v12, %v2886_v18 }
0x17a6   : > { %v2894_v24 = vsel %vm497_vm4, %v2892_v16, 0.0  ;;  %v2893_v26 = vadd.f32 %v4151_v25, %v2889_v21 }
0x17a7   : > { %2895 = vadd.xlane.f32.xlu0 %v2894_v24 }
0x17a8   : > { %v2897_v28 = vsel %vm497_vm4, %v2893_v26, 0.0 }
0x17a9   : > { %2898 = vadd.xlane.f32.xlu1 %v2897_v28 }
0x1834   : > { %v2896_v30 = vpop.xlane.xlu0 %2895 }
0x1835   : > { %v2900_v31 = vmul.f32 0.03125, %v2896_v30 }
0x1836   : > { %v2899_v33 = vpop.xlane.xlu1 %2898 }
0x1837   : > { %v2902_v60 = vsub.f32 %v2892_v16, %v2900_v31  ;;  %v2901_v34 = vmul.f32 0.03125, %v2899_v33  ;;  %v3025_v31 = vrot.slane %v4781_v32, %v4464_v5 }
0x1839   : > { %v2903_v35 = vsub.f32 %v2893_v26, %v2901_v34  ;;  %v2904_v36 = vmul.f32 %v2902_v60, %v2902_v60 }
0x183b   : > { %v2906_v39 = vsel %vm497_vm4, %v2904_v36, 0.0  ;;  %v2905_v40 = vmul.f32 %v2903_v35, %v2903_v35 }
0x183c   : > { %2907 = vadd.xlane.f32.xlu0 %v2906_v39 }
0x183d   : > { %v2909_v59 = vsel %vm497_vm4, %v2905_v40, 0.0 }
0x183e   : > { %2910 = vadd.xlane.f32.xlu1 %v2909_v59 }
0x18c9   : > { %v2908_v41 = vpop.xlane.xlu0 %2907 }
0x18ca   : > { %v2912_v42 = vmul.f32 0.03125, %v2908_v41 }
0x18cb   : > { %v2911_v46 = vpop.xlane.xlu1 %2910 }
0x18cc   : > { %v2914_v50 = vadd.f32 1e-05, %v2912_v42  ;;  %v2913_v44 = vmul.f32 0.03125, %v2911_v46 }
0x18ce   : > { %4117 = vrsqrt.f32 %v2914_v50  ;;  %v2915_v3 = vadd.f32 1e-05, %v2913_v44 }
0x18d0   : > { %4119 = vrsqrt.f32 %v2915_v3 }
0x18d8   : > { %v4118_v47 = vpop.eup %4117 }
0x18d9   : > { %v2918_v55 = vmul.f32 %v4118_v47, %v2902_v60 }
0x18da   : > { %v4120_v51 = vpop.eup %4119 }
0x18db   : > { %v2924_v43 = vmul.f32 %v2923_v4, %v2918_v55  ;;  %v2919_v52 = vmul.f32 %v4120_v51, %v2903_v35  ;;  %v4053_v51 = vld [vmem:[%s4941_s8] sm:$0xff]  }
0x18dd   : > { %v2925_v53 = vmul.f32 %v2923_v4, %v2919_v52  ;;  %v2930_v56 = vadd.f32 %v2929_v54, %v2924_v43  ;;  %v4054_v43 = vld [vmem:[%s4941_s8 + $0x8] sm:$0xff]  }
0x18df   : > { %v2931_v57 = vadd.f32 %v2929_v54, %v2925_v53 }
0x18e1   : > { %v2937_v58 = vpack.c.bf16 %v2931_v57, %v2930_v56 }
0x18e3   : > { %3975 = vmatmul.mubr.msk.bf16.vlgmr.msra.gmra.mrb[68].mxu1 %vm497_vm4, %v2937_v58 }
0x18e4   : > { %3990 = vmatprep.mubr.msk.bf16.mxu1 %vm4163_vm2, %v4161_v1  ;;  %3987 = vmatpush3.bf16.msra.mxu1 %v4053_v51 }
0x18e5   : > { %3988 = vmatprep.subr.bf16.mxu1 %v4161_v1 }
0x18e8   : > { %3989 = vmatpush3.bf16.msra.mxu1 %v4054_v43 }
0x19b6   : > { %v2991_v63 = vpop.f32.mrb[68].mxu1 }
0x19b7   : > { %v2992_v7 = vadd.f32 %v2991_v63, %v2941_v62  ;;  %v3976_v61 = vpop.f32.mrb[69].mxu1 }
0x19b8   : > { %v2994_v10 = vpop.f32.mrb[70].mxu1 }
0x19b9   : > { %v3000_v11 = vmul.f32 0.044715, %v2992_v7  ;;  %v2995_v2 = vadd.f32 %v2994_v10, %v2941_v62  ;;  %v3977_v6 = vpop.f32.mrb[71].mxu1  ;;  %v2998_v16 = vmul.f32 0.5, %v2992_v7  ;;  %v3119_v10 = vrot.slane %v4781_v32, %v4475_v27 }
0x19bb   : > { %v3002_v9 = vmul.f32 %v3000_v11, %v2992_v7  ;;  %v3001_v8 = vmul.f32 0.044715, %v2995_v2  ;;  %v2999_v24 = vmul.f32 0.5, %v2995_v2 }
0x19bd   : > { %v3004_v13 = vmul.f32 %v3002_v9, %v2992_v7  ;;  %v3003_v14 = vmul.f32 %v3001_v8, %v2995_v2  ;;  %v4897_v8 = vld [vmem:[%s4938_s5] sm:$0x1f] }
0x19be   : > { %v3130_v45 = vrot.slane %v4897_v8, %v4339_v29 }
0x19bf   : > { %v3006_v15 = vadd.f32 %v3004_v13, %v2992_v7  ;;  %v3005_v17 = vmul.f32 %v3003_v14, %v2995_v2 }
0x19c1   : > { %v3008_v18 = vmul.f32 0.7978846, %v3006_v15  ;;  %v3007_v19 = vadd.f32 %v3005_v17, %v2995_v2 }
0x19c3   : > { %4121 = vtanh.f32 %v3008_v18  ;;  %v3009_v20 = vmul.f32 0.7978846, %v3007_v19 }
0x19c5   : > { %4123 = vtanh.f32 %v3009_v20 }
0x19cd   : > { %v4122_v21 = vpop.eup %4121 }
0x19ce   : > { %v3012_v22 = vadd.f32 1.0, %v4122_v21 }
0x19cf   : > { %v4124_v12 = vpop.eup %4123 }
0x19d0   : > { %v3013_v25 = vadd.f32 1.0, %v4124_v12  ;;  %v3014_v26 = vmul.f32 %v3012_v22, %v2998_v16 }
0x19d2   : > { %v3015_v28 = vmul.f32 %v3013_v25, %v2999_v24 }
0x19d4   : > { %v3021_v30 = vpack.c.bf16 %v3015_v28, %v3014_v26 }
0x19d6   : > { %3983 = vmatmul.mubr.msk.bf16.vlgmr.msra.gmra.mrb[72].mxu0 %vm497_vm4, %v3021_v30 }
0x19d7   : > { %3998 = vmatprep.mubr.msk.bf16.mxu0 %vm4163_vm2, %v4161_v1 }
0x1aa9   : > { %v3075_v33 = vpop.f32.mrb[72].mxu0 }
0x1aaa   : > { %v3076_v60 = vadd.f32 %v3075_v33, %v3025_v31  ;;  %v3984_v34 = vpop.f32.mrb[73].mxu0 }
0x1aab   : > { %v3078_v35 = vpop.f32.mrb[74].mxu0 }
0x1aac   : > { %v3079_v36 = vadd.f32 %v3078_v35, %v3025_v31  ;;  %v3985_v39 = vpop.f32.mrb[75].mxu0  ;;  %v3082_v40 = vadd.f32 %v3076_v60, %v2930_v56 }
0x1aae   : > { %v3084_v59 = vsel %vm497_vm4, %v3082_v40, 0.0  ;;  %v3083_v37 = vadd.f32 %v3079_v36, %v2931_v57 }
0x1aaf   : > { %3085 = vadd.xlane.f32.xlu0 %v3084_v59 }
0x1ab0   : > { %v3087_v38 = vsel %vm497_vm4, %v3083_v37, 0.0 }
0x1ab1   : > { %3088 = vadd.xlane.f32.xlu1 %v3087_v38 }
0x1b3c   : > { %v3086_v41 = vpop.xlane.xlu0 %3085 }
0x1b3d   : > { %v3090_v42 = vmul.f32 0.03125, %v3086_v41 }
0x1b3e   : > { %v3089_v46 = vpop.xlane.xlu1 %3088 }
0x1b3f   : > { %v3092_v50 = vsub.f32 %v3082_v40, %v3090_v42  ;;  %v3091_v44 = vmul.f32 0.03125, %v3089_v46 }
0x1b41   : > { %v3093_v5 = vsub.f32 %v3083_v37, %v3091_v44  ;;  %v3094_v3 = vmul.f32 %v3092_v50, %v3092_v50 }
0x1b43   : > { %v3096_v4 = vsel %vm497_vm4, %v3094_v3, 0.0  ;;  %v3095_v47 = vmul.f32 %v3093_v5, %v3093_v5  ;;  %v4055_v3 = vld [vmem:[%s4942_s9] sm:$0xff]  }
0x1b44   : > { %3097 = vadd.xlane.f32.xlu0 %v3096_v4  ;;  %3995 = vmatpush3.bf16.msra.mxu0 %v4055_v3  ;;  %v4056_v4 = vld [vmem:[%s4942_s9 + $0x8] sm:$0xff]  }
0x1b45   : > { %v3099_v55 = vsel %vm497_vm4, %v3095_v47, 0.0  ;;  %3996 = vmatprep.subr.bf16.mxu0 %v4161_v1  ;;  %v3240_v1 = vrot.slane %v4897_v8, %v4459_v0 }
0x1b46   : > { %3100 = vadd.xlane.f32.xlu1 %v3099_v55 }
0x1b48   : > { %3997 = vmatpush3.bf16.msra.mxu0 %v4056_v4 }
0x1bd1   : > { %v3098_v52 = vpop.xlane.xlu0 %3097 }
0x1bd2   : > { %v3102_v54 = vmul.f32 0.03125, %v3098_v52 }
0x1bd3   : > { %v3101_v53 = vpop.xlane.xlu1 %3100 }
0x1bd4   : > { %v3104_v56 = vadd.f32 1e-05, %v3102_v54  ;;  %v3103_v57 = vmul.f32 0.03125, %v3101_v53  ;;  %v3234_v53 = vrot.slane %v4897_v8, %v4404_v23 }
0x1bd6   : > { %4125 = vrsqrt.f32 %v3104_v56  ;;  %v3105_v58 = vadd.f32 1e-05, %v3103_v57 }
0x1bd8   : > { %4127 = vrsqrt.f32 %v3105_v58 }
0x1be0   : > { %v4126_v49 = vpop.eup %4125 }
0x1be1   : > { %v3108_v62 = vmul.f32 %v4126_v49, %v3092_v50 }
0x1be2   : > { %v4128_v63 = vpop.eup %4127 }
0x1be3   : > { %v3114_v7 = vmul.f32 %v3113_v48, %v3108_v62  ;;  %v3109_v61 = vmul.f32 %v4128_v63, %v3093_v5 }
0x1be5   : > { %v3115_v11 = vmul.f32 %v3113_v48, %v3109_v61  ;;  %v3120_v2 = vadd.f32 %v3119_v10, %v3114_v7 }
0x1be7   : > { %v3121_v6 = vadd.f32 %v3119_v10, %v3115_v11  ;;  %v3570_v10 = vld [vmem:[%s4943_s10] ss:$0 sm:$0xff] }
0x1be9   : > { %v3126_v9 = vpack.c.bf16 %v3121_v6, %v3120_v2 }
0x1beb   : > { %3991 = vmatmul.mubr.msk.bf16.vlgmr.msra.gmra.mrb[72].mxu1 %vm497_vm4, %v3126_v9 }
0x1cbe   : > { %v3180_v13 = vpop.f32.mrb[72].mxu1 }
0x1cbf   : > { %v3181_v14 = vadd.f32 %v3180_v13, %v3130_v45  ;;  %v3992_v15 = vpop.f32.mrb[73].mxu1 }
0x1cc0   : > { %v3183_v17 = vpop.f32.mrb[74].mxu1 }
0x1cc1   : > { %v3189_v18 = vmul.f32 0.044715, %v3181_v14  ;;  %v3184_v27 = vadd.f32 %v3183_v17, %v3130_v45  ;;  %v3993_v32 = vpop.f32.mrb[75].mxu1  ;;  %v3187_v29 = vmul.f32 0.5, %v3181_v14 }
0x1cc3   : > { %v3190_v19 = vmul.f32 0.044715, %v3184_v27  ;;  %v3191_v20 = vmul.f32 %v3189_v18, %v3181_v14  ;;  %v3188_v60 = vmul.f32 0.5, %v3184_v27 }
0x1cc5   : > { %v3193_v21 = vmul.f32 %v3191_v20, %v3181_v14  ;;  %v3192_v22 = vmul.f32 %v3190_v19, %v3184_v27 }
0x1cc7   : > { %v3195_v12 = vadd.f32 %v3193_v21, %v3181_v14  ;;  %v3194_v16 = vmul.f32 %v3192_v22, %v3184_v27 }
0x1cc9   : > { %v3197_v24 = vmul.f32 0.7978846, %v3195_v12  ;;  %v3196_v25 = vadd.f32 %v3194_v16, %v3184_v27 }
0x1ccb   : > { %4129 = vtanh.f32 %v3197_v24  ;;  %v3198_v26 = vmul.f32 0.7978846, %v3196_v25 }
0x1ccd   : > { %4131 = vtanh.f32 %v3198_v26 }
0x1cd5   : > { %v4130_v28 = vpop.eup %4129 }
0x1cd6   : > { %v3201_v30 = vadd.f32 1.0, %v4130_v28 }
0x1cd7   : > { %v4132_v31 = vpop.eup %4131 }
0x1cd8   : > { %v3203_v33 = vmul.f32 %v3201_v30, %v3187_v29  ;;  %v3202_v34 = vadd.f32 1.0, %v4132_v31 }
0x1cda   : > { %v3205_v35 = vsel %vm497_vm4, %v3203_v33, 0.0  ;;  %v3204_v36 = vmul.f32 %v3202_v34, %v3188_v60 }
0x1cdb   : > { %3206 = vadd.xlane.f32.xlu0 %v3205_v35 }
0x1cdc   : > { %v3208_v39 = vsel %vm497_vm4, %v3204_v36, 0.0 }
0x1cdd   : > { %3209 = vadd.xlane.f32.xlu1 %v3208_v39 }
0x1d68   : > { %v3207_v40 = vpop.xlane.xlu0 %3206 }
0x1d69   : > { %v3211_v59 = vmul.f32 0.03125, %v3207_v40 }
0x1d6a   : > { %v3210_v37 = vpop.xlane.xlu1 %3209 }
0x1d6b   : > { %v3213_v38 = vsub.f32 %v3203_v33, %v3211_v59  ;;  %v3212_v41 = vmul.f32 0.03125, %v3210_v37 }
0x1d6d   : > { %v3214_v42 = vsub.f32 %v3204_v36, %v3212_v41  ;;  %v3215_v46 = vmul.f32 %v3213_v38, %v3213_v38 }
0x1d6f   : > { %v3217_v50 = vsel %vm497_vm4, %v3215_v46, 0.0  ;;  %v3216_v44 = vmul.f32 %v3214_v42, %v3214_v42 }
0x1d70   : > { %3218 = vadd.xlane.f32.xlu0 %v3217_v50 }
0x1d71   : > { %v3220_v5 = vsel %vm497_vm4, %v3216_v44, 0.0 }
0x1d72   : > { %3221 = vadd.xlane.f32.xlu1 %v3220_v5 }
0x1dfd   : > { %v3219_v47 = vpop.xlane.xlu0 %3218 }
0x1dfe   : > { %v3223_v55 = vmul.f32 0.03125, %v3219_v47 }
0x1dff   : > { %v3222_v51 = vpop.xlane.xlu1 %3221 }
0x1e00   : > { %v3225_v43 = vadd.f32 1e-05, %v3223_v55  ;;  %v3224_v52 = vmul.f32 0.03125, %v3222_v51 }
0x1e02   : > { %4133 = vrsqrt.f32 %v3225_v43  ;;  %v3226_v54 = vadd.f32 1e-05, %v3224_v52 }
0x1e04   : > { %4135 = vrsqrt.f32 %v3226_v54 }
0x1e0c   : > { %v4134_v56 = vpop.eup %4133 }
0x1e0d   : > { %v3229_v57 = vmul.f32 %v4134_v56, %v3213_v38 }
0x1e0e   : > { %v4136_v58 = vpop.eup %4135 }
0x1e0f   : > { %v3235_v48 = vmul.f32 %v3234_v53, %v3229_v57  ;;  %v3230_v49 = vmul.f32 %v4136_v58, %v3214_v42 }
0x1e11   : > { %v3236_v62 = vmul.f32 %v3234_v53, %v3230_v49  ;;  %v3241_v63 = vadd.f32 %v3240_v1, %v3235_v48 }
0x1e13   : > { %v3242_v7 = vadd.f32 %v3240_v1, %v3236_v62 }
0x1e15   : > { %v3247_v61 = vpack.c.bf16 %v3242_v7, %v3241_v63 }
0x1e17   : > { %3999 = vmatmul.mubr.msk.bf16.vlgmr.msra.gmra.mrb[76].mxu0 %vm497_vm4, %v3247_v61 }
0x1eea   : > { %v3304_v11 = vpop.f32.mrb[76].mxu0 }
0x1eeb   : > { %v3305_v23 = vadd.f32 %v3570_v10, %v3304_v11  ;;  %v4000_v2 = vpop.f32.mrb[77].mxu0 }
0x1eec   : > { %v3307_v6 = vpop.f32.mrb[78].mxu0 }
0x1eed   : > { %v3308_v9 = vadd.f32 %v3570_v10, %v3307_v6  ;;  %v4001_v45 = vpop.f32.mrb[79].mxu0  ;;  %v3311_v13 = vsel %vm427_vm3, %v3305_v23, -inf }
0x1eee   : > { %3312 = vmax.xlane.f32.xlu0 %v3311_v13 }
0x1eef   : > { %v3314_v0 = vsel %vm427_vm3, %v3308_v9, -inf }
0x1ef0   : > { %3315 = vmax.xlane.f32.xlu1 %v3314_v0 }
0x1f7b   : > { %v3313_v8 = vpop.xlane.xlu0 %3312 }
0x1f7c   : > { %v3317_v14 = vsub.f32 %v3305_v23, %v3313_v8 }
0x1f7d   : > { %v3316_v15 = vpop.xlane.xlu1 %3315 }
0x1f7e   : > { %v3319_v17 = vmul.f32 1.442695, %v3317_v14  ;;  %v3318_v18 = vsub.f32 %v3308_v9, %v3316_v15 }
0x1f80   : > { %4137 = vpow2.f32 %v3319_v17  ;;  %v3321_v27 = vmul.f32 1.442695, %v3318_v18 }
0x1f82   : > { %4139 = vpow2.f32 %v3321_v27 }
0x1f8a   : > { %v4138_v32 = vpop.eup %4137 }
0x1f8b   : > { %v3323_v19 = vsel %vm427_vm3, %v4138_v32, 0.0 }
0x1f8c   : > { %v4140_v20 = vpop.eup %4139  ;;  %3324 = vadd.xlane.f32.xlu0 %v3323_v19 }
0x1f8d   : > { %v3326_v21 = vsel %vm427_vm3, %v4140_v20, 0.0 }
0x1f8e   : > { %3327 = vadd.xlane.f32.xlu1 %v3326_v21 }
0x2019   : > { %v3325_v22 = vpop.xlane.xlu0 %3324 }
0x201a   : > { %4141 = vrcp.f32 %v3325_v22 }
0x201b   : > { %v3328_v12 = vpop.xlane.xlu1 %3327 }
0x201c   : > { %4143 = vrcp.f32 %v3328_v12 }
0x2024   : > { %v4142_v16 = vpop.eup %4141 }
0x2025   : > { %v3330_v24 = vmul.f32 %v4142_v16, %v4138_v32 }
0x2026   : > { %v4144_v25 = vpop.eup %4143 }
0x2027   : > { %3333 = vst.msk [vmem:[%s410_s19] sm:$0xff] %vm427_vm3, %v3330_v24  ;;  %v3332_v26 = vmul.f32 %v4144_v25, %v4140_v20 }
0x2029   : > { %3334 = vst.msk [vmem:[%s410_s19 + $0x8] sm:$0xff] %vm427_vm3, %v3332_v26 }
0x202a PF: > { %s21_s17 = sadd.s32 1, %s4159_s17  }
0x202b   : > { %p18_p4 = scmp.ge.s32.totalorder %s21_s17, 4  }
0x202d   :  { %20 = sbr.rel (!%p18_p4) target bundleno = 1 (0x1), region = 116 }

</bundles_post_ra>
